<compile_context>
chip_gen: v6e
topology: v6e:2x2x1
jax: 0.10.0
libtpu: 0.0.40
codegen_flags: <defaults>
</compile_context>

<pallas_src>
import functools
import math

import jax
import jax.numpy as jnp
from jax.experimental import pallas as pl
from jax.experimental.pallas import tpu as pltpu


# ---------------------------------------------------------------------------
# Pallas kernel: one query tile per grid step, full-S K/V cached in VMEM.
# ---------------------------------------------------------------------------
def _encoder_layer_kernel(src_ref, pos_ref,
                          wq_ref, wk_ref, wv_ref,      # [H, D, hd] (q pre-scaled)
                          bq_ref, bk_ref, bv_ref,      # [H, 1, hd] (q pre-scaled)
                          wo_ref, bo_ref,              # [H, hd, D], [1, D]
                          w1_ref, b1_ref,              # [D, FF],   [1, FF]
                          w2_ref, b2_ref,              # [FF, D],   [1, D]
                          g1_ref, be1_ref, g2_ref, be2_ref,   # [1, D]
                          out_ref,                     # [TQ, B, D] block
                          k_scr, v_scr,                # [B, H, S, hd] scratch
                          *, nhead, tq):
    S, B, D = src_ref.shape
    H = nhead
    hd = D // H
    cdt = wq_ref.dtype            # MXU compute dtype (f32 or bf16)
    f32 = jnp.float32

    qi = pl.program_id(0)

    # ---- build the K / V caches once; reused by every query tile ----------
    @pl.when(qi == 0)
    def _():
        src_all = src_ref[...]                              # [S, B, D]
        kv_in = (src_all + pos_ref[...]).astype(cdt)        # keys use src + pos
        val_in = src_all.astype(cdt)                        # values use src
        for b in range(B):                                  # B is small & static
            kin_b = kv_in[:, b, :]                          # [S, D]
            vin_b = val_in[:, b, :]
            for h in range(H):
                k_scr[b, h] = (jnp.dot(kin_b, wk_ref[h],
                                       preferred_element_type=f32)
                               + bk_ref[h]).astype(cdt)     # [S, hd]
                v_scr[b, h] = (jnp.dot(vin_b, wv_ref[h],
                                       preferred_element_type=f32)
                               + bv_ref[h]).astype(cdt)

    # ---- per query-tile work ----------------------------------------------
    q0 = pl.multiple_of(qi * tq, tq)
    src_t = src_ref[pl.ds(q0, tq)]                          # [TQ, B, D]
    q_in = (src_t + pos_ref[pl.ds(q0, tq)]).astype(cdt)

    ys = []
    for b in range(B):
        xq = q_in[:, b, :]                                  # [TQ, D]

        # Q projection, head-split (1/sqrt(hd) already folded into wq/bq).
        q_heads = jnp.stack(
            [(jnp.dot(xq, wq_ref[h], preferred_element_type=f32)
              + bq_ref[h]).astype(cdt) for h in range(H)],
            axis=0)                                         # [H, TQ, hd]
        k_heads = k_scr[b]                                  # [H, S, hd]
        v_heads = v_scr[b]                                  # [H, S, hd]

        # Scaled-dot-product attention, softmax in f32.
        s = jnp.einsum('hqd,hkd->hqk', q_heads, k_heads,
                       preferred_element_type=f32)          # [H, TQ, S]
        s = s - jnp.max(s, axis=-1, keepdims=True)
        p = jnp.exp(s)
        p = p * pl.reciprocal(jnp.sum(p, axis=-1, keepdims=True), approx=True)
        o = jnp.einsum('hqk,hkd->hqd', p.astype(cdt), v_heads,
                       preferred_element_type=f32)          # [H, TQ, hd]

        # Output projection: accumulate per head (no lane-axis concatenate).
        attn = jnp.zeros((tq, D), f32)
        for h in range(H):
            attn = attn + jnp.dot(o[h].astype(cdt), wo_ref[h],
                                  preferred_element_type=f32)
        attn = attn + bo_ref[...]

        # ---- residual + LayerNorm 1 (f32) ----
        x = src_t[:, b, :].astype(f32) + attn
        mu = jnp.mean(x, axis=-1, keepdims=True)
        var = jnp.mean(jnp.square(x - mu), axis=-1, keepdims=True)
        x = (x - mu) * jax.lax.rsqrt(var + 1e-5) * g1_ref[...] + be1_ref[...]

        # ---- FFN: linear1 -> relu -> linear2 (bounded to [TQ, FF]) ----
        h1 = jnp.dot(x.astype(cdt), w1_ref[...],
                     preferred_element_type=f32) + b1_ref[...]
        h1 = jnp.maximum(h1, 0.0)
        ff = jnp.dot(h1.astype(cdt), w2_ref[...],
                     preferred_element_type=f32) + b2_ref[...]

        # ---- residual + LayerNorm 2 ----
        y = x + ff
        mu = jnp.mean(y, axis=-1, keepdims=True)
        var = jnp.mean(jnp.square(y - mu), axis=-1, keepdims=True)
        y = (y - mu) * jax.lax.rsqrt(var + 1e-5) * g2_ref[...] + be2_ref[...]
        ys.append(y)

    out_ref[...] = jnp.stack(ys, axis=1).astype(out_ref.dtype)


# ---------------------------------------------------------------------------
# Wrapper: weight plumbing (transpose / head-split / scale-fold / dtype cast),
# BlockSpecs, query-tile grid.  src, pos: [S, B, D]; returns [S, B, D].
# ---------------------------------------------------------------------------
def _pick_q_tile(S, target):
    t = min(target, S)
    while S % t:
        t -= 1
    return t


def transformer_encoder_layer(src, pos, params, nhead, *,
                              q_tile=128, compute_dtype=None):
    S, B, D = src.shape
    assert D % nhead == 0
    H, hd = nhead, D // nhead
    cdt = compute_dtype if compute_dtype is not None else src.dtype
    f32 = jnp.float32
    scale = 1.0 / math.sqrt(hd)

    # --- trace-time weight preprocessing (free at runtime) -----------------
    def split_heads_in(w):   # torch Linear weight [out, in] -> [H, in, hd]
        return jnp.transpose(w.T.reshape(D, H, hd), (1, 0, 2))

    wq = (split_heads_in(params['wq']) * scale).astype(cdt)
    wk = split_heads_in(params['wk']).astype(cdt)
    wv = split_heads_in(params['wv']).astype(cdt)
    bq = (params['bq'].reshape(H, 1, hd) * scale).astype(f32)
    bk = params['bk'].reshape(H, 1, hd).astype(f32)
    bv = params['bv'].reshape(H, 1, hd).astype(f32)
    wo = params['wo'].T.reshape(H, hd, D).astype(cdt)        # attn @ wo.T, head-split rows
    bo = params['bo'].reshape(1, D).astype(f32)
    w1 = params['w1'].T.astype(cdt)                          # [D, FF]
    b1 = params['b1'].reshape(1, -1).astype(f32)
    w2 = params['w2'].T.astype(cdt)                          # [FF, D]
    b2 = params['b2'].reshape(1, D).astype(f32)
    g1 = params['g1'].reshape(1, D).astype(f32)
    be1 = params['be1'].reshape(1, D).astype(f32)
    g2 = params['g2'].reshape(1, D).astype(f32)
    be2 = params['be2'].reshape(1, D).astype(f32)

    weights = [wq, wk, wv, bq, bk, bv, wo, bo,
               w1, b1, w2, b2, g1, be1, g2, be2]

    FF = w1.shape[1]
    tq = _pick_q_tile(S, q_tile)
    n_q = S // tq

    def resident(shape):     # full-array block, constant index map (stays in VMEM)
        nd = len(shape)
        return pl.BlockSpec(shape, lambda qi, _nd=nd: (0,) * _nd)

    in_specs = [resident((S, B, D)), resident((S, B, D))]
    in_specs += [resident(tuple(w.shape)) for w in weights]
    out_spec = pl.BlockSpec((tq, B, D), lambda qi: (qi, 0, 0))

    # Advisory cost estimate for the XLA scheduler.
    flops = B * (8 * S * D * D + 4 * S * S * D + 4 * S * D * FF)
    transcendentals = B * H * S * S
    bytes_accessed = 3 * S * B * D * src.dtype.itemsize \
        + sum(int(w.size) * w.dtype.itemsize for w in weights)

    kernel = functools.partial(_encoder_layer_kernel, nhead=H, tq=tq)

    out = pl.pallas_call(
        kernel,
        out_shape=jax.ShapeDtypeStruct((S, B, D), src.dtype),
        grid_spec=pltpu.PrefetchScalarGridSpec(
            num_scalar_prefetch=0,
            grid=(n_q,),
            in_specs=in_specs,
            out_specs=out_spec,
            scratch_shapes=[pltpu.VMEM((B, H, S, hd), cdt),   # K cache
                            pltpu.VMEM((B, H, S, hd), cdt)],  # V cache
        ),
        compiler_params=pltpu.CompilerParams(
            # K/V scratch carries across query tiles -> sequential axis.
            dimension_semantics=("arbitrary",),
            # Raise the scoped-VMEM limit above the v5e default (16 MiB) while
            # staying under v7x's 64 MiB physical VMEM.
            vmem_limit_bytes=48 * 1024 * 1024,
        ),
        cost_estimate=pl.CostEstimate(flops=flops,
                                      transcendentals=transcendentals,
                                      bytes_accessed=bytes_accessed),
    )(src, pos, *weights)
    return out


# ---------------------------------------------------------------------------
# Pure-JAX reference for verification (f32, original param layout)
# ---------------------------------------------------------------------------
def reference(src, pos, p, nhead):
    x = jnp.transpose(src, (1, 0, 2)).astype(jnp.float32)   # [B, S, D]
    pe = jnp.transpose(pos, (1, 0, 2)).astype(jnp.float32)
    B, S, D = x.shape
    hd = D // nhead
    qk = x + pe
    q = qk @ p['wq'].T + p['bq'][0]
    k = qk @ p['wk'].T + p['bk'][0]
    v = x @ p['wv'].T + p['bv'][0]
    qh = q.reshape(B, S, nhead, hd).transpose(0, 2, 1, 3) / math.sqrt(hd)
    kh = k.reshape(B, S, nhead, hd).transpose(0, 2, 1, 3)
    vh = v.reshape(B, S, nhead, hd).transpose(0, 2, 1, 3)
    s = jnp.einsum('bhqd,bhkd->bhqk', qh, kh)
    a = jax.nn.softmax(s, axis=-1)
    o = jnp.einsum('bhqk,bhkd->bhqd', a, vh).transpose(0, 2, 1, 3).reshape(B, S, D)
    o = o @ p['wo'].T + p['bo'][0]

    def ln(z, g, b):
        mu = z.mean(-1, keepdims=True)
        var = ((z - mu) ** 2).mean(-1, keepdims=True)
        return (z - mu) / jnp.sqrt(var + 1e-5) * g + b

    y = ln(x + o, p['g1'][0], p['be1'][0])
    ff = jnp.maximum(y @ p['w1'].T + p['b1'][0], 0.0) @ p['w2'].T + p['b2'][0]
    y = ln(y + ff, p['g2'][0], p['be2'][0])
    return jnp.transpose(y, (1, 0, 2))


# ---------------------------------------------------------------------------
# TODO(synk): attn_mask / key_padding_mask paths of nn.MultiheadAttention are
# not implemented (the reference forward passes None for both).
# ---------------------------------------------------------------------------
if __name__ == "__main__":
    S, B, D, NHEAD, FF = 8, 2, 32, 4, 64
    key = jax.random.PRNGKey(0)
    ks = jax.random.split(key, 12)

    def rnd(k, shape, scale=0.05):
        return (scale * jax.random.normal(k, shape)).astype(jnp.float32)

    params = {
        # nn.MultiheadAttention in_proj split into q/k/v chunks
        'wq': rnd(ks[0], (D, D)), 'wk': rnd(ks[1], (D, D)), 'wv': rnd(ks[2], (D, D)),
        'bq': rnd(ks[3], (1, D)), 'bk': rnd(ks[4], (1, D)), 'bv': rnd(ks[5], (1, D)),
        'wo': rnd(ks[6], (D, D)), 'bo': rnd(ks[7], (1, D)),
        'w1': rnd(ks[8], (FF, D)), 'b1': rnd(ks[9], (1, FF)),
        'w2': rnd(ks[10], (D, FF)), 'b2': rnd(ks[11], (1, D)),
        'g1': jnp.ones((1, D), jnp.float32), 'be1': jnp.zeros((1, D), jnp.float32),
        'g2': jnp.ones((1, D), jnp.float32), 'be2': jnp.zeros((1, D), jnp.float32),
    }

    src = jax.random.normal(jax.random.PRNGKey(1), (S, B, D), jnp.float32)
    pos = jax.random.normal(jax.random.PRNGKey(2), (S, B, D), jnp.float32)

    # q_tile=4 -> grid=(2,) so the K/V-cache reuse path across query tiles is
    # actually exercised at this toy size.
    out = transformer_encoder_layer(src, pos, params, NHEAD, q_tile=4)
    out = jax.block_until_ready(out)

    ref = reference(src, pos, params, NHEAD)
    assert out.shape == (S, B, D)
    # Tolerance loosened slightly for the approximate (EUP) softmax reciprocal.
    assert jnp.allclose(out, ref, atol=2e-3, rtol=2e-3), \
        f"max abs err {jnp.max(jnp.abs(out - ref))}"

    print("KERNEL_OK")
</pallas_src>

<mosaic_0001>
module attributes {stable_mosaic.version = 11 : i64} {
  func.func @_encoder_layer_kernel(%arg0: i32, %arg1: memref<8x2x32xf32, #tpu.memory_space<vmem>>, %arg2: memref<8x2x32xf32, #tpu.memory_space<vmem>>, %arg3: memref<4x32x8xf32, #tpu.memory_space<vmem>>, %arg4: memref<4x32x8xf32, #tpu.memory_space<vmem>>, %arg5: memref<4x32x8xf32, #tpu.memory_space<vmem>>, %arg6: memref<4x1x8xf32, #tpu.memory_space<vmem>>, %arg7: memref<4x1x8xf32, #tpu.memory_space<vmem>>, %arg8: memref<4x1x8xf32, #tpu.memory_space<vmem>>, %arg9: memref<4x8x32xf32, #tpu.memory_space<vmem>>, %arg10: memref<1x32xf32, #tpu.memory_space<vmem>>, %arg11: memref<32x64xf32, #tpu.memory_space<vmem>>, %arg12: memref<1x64xf32, #tpu.memory_space<vmem>>, %arg13: memref<64x32xf32, #tpu.memory_space<vmem>>, %arg14: memref<1x32xf32, #tpu.memory_space<vmem>>, %arg15: memref<1x32xf32, #tpu.memory_space<vmem>>, %arg16: memref<1x32xf32, #tpu.memory_space<vmem>>, %arg17: memref<1x32xf32, #tpu.memory_space<vmem>>, %arg18: memref<1x32xf32, #tpu.memory_space<vmem>>, %arg19: memref<4x2x32xf32, #tpu.memory_space<vmem>>, %arg20: memref<2x4x8x8xf32, #tpu.memory_space<vmem>>, %arg21: memref<2x4x8x8xf32, #tpu.memory_space<vmem>>) attributes {dimension_semantics = [#tpu.dimension_semantics<arbitrary>], iteration_bounds = array<i64: 2>, scalar_prefetch = 0 : i64, scratch_operands = 2 : i64, tpu.core_type = #tpu.core_type<tc>, window_params = [{pipeline_mode = #tpu.pipeline_mode<synchronous>, transform_indices = @transform_0, window_bounds = array<i64: 8, 2, 32>}, {pipeline_mode = #tpu.pipeline_mode<synchronous>, transform_indices = @transform_1, window_bounds = array<i64: 8, 2, 32>}, {pipeline_mode = #tpu.pipeline_mode<synchronous>, transform_indices = @transform_2, window_bounds = array<i64: 4, 32, 8>}, {pipeline_mode = #tpu.pipeline_mode<synchronous>, transform_indices = @transform_3, window_bounds = array<i64: 4, 32, 8>}, {pipeline_mode = #tpu.pipeline_mode<synchronous>, transform_indices = @transform_4, window_bounds = array<i64: 4, 32, 8>}, {pipeline_mode = #tpu.pipeline_mode<synchronous>, transform_indices = @transform_5, window_bounds = array<i64: 4, 1, 8>}, {pipeline_mode = #tpu.pipeline_mode<synchronous>, transform_indices = @transform_6, window_bounds = array<i64: 4, 1, 8>}, {pipeline_mode = #tpu.pipeline_mode<synchronous>, transform_indices = @transform_7, window_bounds = array<i64: 4, 1, 8>}, {pipeline_mode = #tpu.pipeline_mode<synchronous>, transform_indices = @transform_8, window_bounds = array<i64: 4, 8, 32>}, {pipeline_mode = #tpu.pipeline_mode<synchronous>, transform_indices = @transform_9, window_bounds = array<i64: 1, 32>}, {pipeline_mode = #tpu.pipeline_mode<synchronous>, transform_indices = @transform_10, window_bounds = array<i64: 32, 64>}, {pipeline_mode = #tpu.pipeline_mode<synchronous>, transform_indices = @transform_11, window_bounds = array<i64: 1, 64>}, {pipeline_mode = #tpu.pipeline_mode<synchronous>, transform_indices = @transform_12, window_bounds = array<i64: 64, 32>}, {pipeline_mode = #tpu.pipeline_mode<synchronous>, transform_indices = @transform_13, window_bounds = array<i64: 1, 32>}, {pipeline_mode = #tpu.pipeline_mode<synchronous>, transform_indices = @transform_14, window_bounds = array<i64: 1, 32>}, {pipeline_mode = #tpu.pipeline_mode<synchronous>, transform_indices = @transform_15, window_bounds = array<i64: 1, 32>}, {pipeline_mode = #tpu.pipeline_mode<synchronous>, transform_indices = @transform_16, window_bounds = array<i64: 1, 32>}, {pipeline_mode = #tpu.pipeline_mode<synchronous>, transform_indices = @transform_17, window_bounds = array<i64: 1, 32>}, {transform_indices = @transform_18, window_bounds = array<i64: 4, 2, 32>}]} {
    %c0_i32 = arith.constant 0 : i32
    %0 = arith.cmpi eq, %arg0, %c0_i32 : i32
    %1 = arith.extui %0 : i1 to i32
    %c0_i32_0 = arith.constant 0 : i32
    %2 = arith.cmpi ne, %1, %c0_i32_0 : i32
    scf.if %2 {
      %c0_179 = arith.constant 0 : index
      %c0_180 = arith.constant 0 : index
      %c0_181 = arith.constant 0 : index
      %300 = vector.load %arg1[%c0_179, %c0_180, %c0_181] : memref<8x2x32xf32, #tpu.memory_space<vmem>>, vector<8x2x32xf32>
      %c0_182 = arith.constant 0 : index
      %c0_183 = arith.constant 0 : index
      %c0_184 = arith.constant 0 : index
      %301 = vector.load %arg2[%c0_182, %c0_183, %c0_184] : memref<8x2x32xf32, #tpu.memory_space<vmem>>, vector<8x2x32xf32>
      %302 = arith.addf %300, %301 : vector<8x2x32xf32>
      %303 = vector.extract_strided_slice %302 {offsets = [0, 0, 0], sizes = [8, 1, 32], strides = [1, 1, 1]} : vector<8x2x32xf32> to vector<8x1x32xf32>
      %304 = vector.shape_cast %303 : vector<8x1x32xf32> to vector<8x32xf32>
      %305 = vector.extract_strided_slice %300 {offsets = [0, 0, 0], sizes = [8, 1, 32], strides = [1, 1, 1]} : vector<8x2x32xf32> to vector<8x1x32xf32>
      %306 = vector.shape_cast %305 : vector<8x1x32xf32> to vector<8x32xf32>
      %c0_185 = arith.constant 0 : index
      %c0_186 = arith.constant 0 : index
      %c0_187 = arith.constant 0 : index
      %307 = vector.load %arg4[%c0_185, %c0_186, %c0_187] : memref<4x32x8xf32, #tpu.memory_space<vmem>>, vector<1x32x8xf32>
      %308 = vector.shape_cast %307 : vector<1x32x8xf32> to vector<32x8xf32>
      %cst_188 = arith.constant dense<0.000000e+00> : vector<8x8xf32>
      %309 = tpu.matmul %304, %308, %cst_188 {dimension_numbers = #tpu.dot_dimension_numbers<[1], [0], [0], [1], [0, 0, 1, 1], [], []>} : vector<8x32xf32>, vector<32x8xf32>, vector<8x8xf32> -> vector<8x8xf32>
      %c0_189 = arith.constant 0 : index
      %c0_190 = arith.constant 0 : index
      %c0_191 = arith.constant 0 : index
      %310 = vector.load %arg7[%c0_189, %c0_190, %c0_191] : memref<4x1x8xf32, #tpu.memory_space<vmem>>, vector<1x1x8xf32>
      %311 = vector.shape_cast %310 : vector<1x1x8xf32> to vector<1x8xf32>
      %312 = vector.broadcast %311 : vector<1x8xf32> to vector<8x8xf32>
      %313 = arith.addf %309, %312 : vector<8x8xf32>
      %c0_192 = arith.constant 0 : index
      %c0_193 = arith.constant 0 : index
      %c0_194 = arith.constant 0 : index
      %c0_195 = arith.constant 0 : index
      %314 = vector.load %arg20[%c0_192, %c0_193, %c0_194, %c0_195] : memref<2x4x8x8xf32, #tpu.memory_space<vmem>>, vector<1x1x8x8xf32>
      %315 = vector.shape_cast %314 : vector<1x1x8x8xf32> to vector<8x8xf32>
      %316 = vector.shape_cast %313 : vector<8x8xf32> to vector<1x1x8x8xf32>
      tpu.vector_store %arg20[%c0_192, %c0_193, %c0_194, %c0_195], %316 {strides = array<i32>} : memref<2x4x8x8xf32, #tpu.memory_space<vmem>>, vector<1x1x8x8xf32>,
      %c0_196 = arith.constant 0 : index
      %c0_197 = arith.constant 0 : index
      %c0_198 = arith.constant 0 : index
      %317 = vector.load %arg5[%c0_196, %c0_197, %c0_198] : memref<4x32x8xf32, #tpu.memory_space<vmem>>, vector<1x32x8xf32>
      %318 = vector.shape_cast %317 : vector<1x32x8xf32> to vector<32x8xf32>
      %cst_199 = arith.constant dense<0.000000e+00> : vector<8x8xf32>
      %319 = tpu.matmul %306, %318, %cst_199 {dimension_numbers = #tpu.dot_dimension_numbers<[1], [0], [0], [1], [0, 0, 1, 1], [], []>} : vector<8x32xf32>, vector<32x8xf32>, vector<8x8xf32> -> vector<8x8xf32>
      %c0_200 = arith.constant 0 : index
      %c0_201 = arith.constant 0 : index
      %c0_202 = arith.constant 0 : index
      %320 = vector.load %arg8[%c0_200, %c0_201, %c0_202] : memref<4x1x8xf32, #tpu.memory_space<vmem>>, vector<1x1x8xf32>
      %321 = vector.shape_cast %320 : vector<1x1x8xf32> to vector<1x8xf32>
      %322 = vector.broadcast %321 : vector<1x8xf32> to vector<8x8xf32>
      %323 = arith.addf %319, %322 : vector<8x8xf32>
      %c0_203 = arith.constant 0 : index
      %c0_204 = arith.constant 0 : index
      %c0_205 = arith.constant 0 : index
      %c0_206 = arith.constant 0 : index
      %324 = vector.load %arg21[%c0_203, %c0_204, %c0_205, %c0_206] : memref<2x4x8x8xf32, #tpu.memory_space<vmem>>, vector<1x1x8x8xf32>
      %325 = vector.shape_cast %324 : vector<1x1x8x8xf32> to vector<8x8xf32>
      %326 = vector.shape_cast %323 : vector<8x8xf32> to vector<1x1x8x8xf32>
      tpu.vector_store %arg21[%c0_203, %c0_204, %c0_205, %c0_206], %326 {strides = array<i32>} : memref<2x4x8x8xf32, #tpu.memory_space<vmem>>, vector<1x1x8x8xf32>,
      %c1_207 = arith.constant 1 : index
      %c0_208 = arith.constant 0 : index
      %c0_209 = arith.constant 0 : index
      %327 = vector.load %arg4[%c1_207, %c0_208, %c0_209] : memref<4x32x8xf32, #tpu.memory_space<vmem>>, vector<1x32x8xf32>
      %328 = vector.shape_cast %327 : vector<1x32x8xf32> to vector<32x8xf32>
      %cst_210 = arith.constant dense<0.000000e+00> : vector<8x8xf32>
      %329 = tpu.matmul %304, %328, %cst_210 {dimension_numbers = #tpu.dot_dimension_numbers<[1], [0], [0], [1], [0, 0, 1, 1], [], []>} : vector<8x32xf32>, vector<32x8xf32>, vector<8x8xf32> -> vector<8x8xf32>
      %c1_211 = arith.constant 1 : index
      %c0_212 = arith.constant 0 : index
      %c0_213 = arith.constant 0 : index
      %330 = vector.load %arg7[%c1_211, %c0_212, %c0_213] : memref<4x1x8xf32, #tpu.memory_space<vmem>>, vector<1x1x8xf32>
      %331 = vector.shape_cast %330 : vector<1x1x8xf32> to vector<1x8xf32>
      %332 = vector.broadcast %331 : vector<1x8xf32> to vector<8x8xf32>
      %333 = arith.addf %329, %332 : vector<8x8xf32>
      %c0_214 = arith.constant 0 : index
      %c1_215 = arith.constant 1 : index
      %c0_216 = arith.constant 0 : index
      %c0_217 = arith.constant 0 : index
      %334 = vector.load %arg20[%c0_214, %c1_215, %c0_216, %c0_217] : memref<2x4x8x8xf32, #tpu.memory_space<vmem>>, vector<1x1x8x8xf32>
      %335 = vector.shape_cast %334 : vector<1x1x8x8xf32> to vector<8x8xf32>
      %336 = vector.shape_cast %333 : vector<8x8xf32> to vector<1x1x8x8xf32>
      tpu.vector_store %arg20[%c0_214, %c1_215, %c0_216, %c0_217], %336 {strides = array<i32>} : memref<2x4x8x8xf32, #tpu.memory_space<vmem>>, vector<1x1x8x8xf32>,
      %c1_218 = arith.constant 1 : index
      %c0_219 = arith.constant 0 : index
      %c0_220 = arith.constant 0 : index
      %337 = vector.load %arg5[%c1_218, %c0_219, %c0_220] : memref<4x32x8xf32, #tpu.memory_space<vmem>>, vector<1x32x8xf32>
      %338 = vector.shape_cast %337 : vector<1x32x8xf32> to vector<32x8xf32>
      %cst_221 = arith.constant dense<0.000000e+00> : vector<8x8xf32>
      %339 = tpu.matmul %306, %338, %cst_221 {dimension_numbers = #tpu.dot_dimension_numbers<[1], [0], [0], [1], [0, 0, 1, 1], [], []>} : vector<8x32xf32>, vector<32x8xf32>, vector<8x8xf32> -> vector<8x8xf32>
      %c1_222 = arith.constant 1 : index
      %c0_223 = arith.constant 0 : index
      %c0_224 = arith.constant 0 : index
      %340 = vector.load %arg8[%c1_222, %c0_223, %c0_224] : memref<4x1x8xf32, #tpu.memory_space<vmem>>, vector<1x1x8xf32>
      %341 = vector.shape_cast %340 : vector<1x1x8xf32> to vector<1x8xf32>
      %342 = vector.broadcast %341 : vector<1x8xf32> to vector<8x8xf32>
      %343 = arith.addf %339, %342 : vector<8x8xf32>
      %c0_225 = arith.constant 0 : index
      %c1_226 = arith.constant 1 : index
      %c0_227 = arith.constant 0 : index
      %c0_228 = arith.constant 0 : index
      %344 = vector.load %arg21[%c0_225, %c1_226, %c0_227, %c0_228] : memref<2x4x8x8xf32, #tpu.memory_space<vmem>>, vector<1x1x8x8xf32>
      %345 = vector.shape_cast %344 : vector<1x1x8x8xf32> to vector<8x8xf32>
      %346 = vector.shape_cast %343 : vector<8x8xf32> to vector<1x1x8x8xf32>
      tpu.vector_store %arg21[%c0_225, %c1_226, %c0_227, %c0_228], %346 {strides = array<i32>} : memref<2x4x8x8xf32, #tpu.memory_space<vmem>>, vector<1x1x8x8xf32>,
      %c2_229 = arith.constant 2 : index
      %c0_230 = arith.constant 0 : index
      %c0_231 = arith.constant 0 : index
      %347 = vector.load %arg4[%c2_229, %c0_230, %c0_231] : memref<4x32x8xf32, #tpu.memory_space<vmem>>, vector<1x32x8xf32>
      %348 = vector.shape_cast %347 : vector<1x32x8xf32> to vector<32x8xf32>
      %cst_232 = arith.constant dense<0.000000e+00> : vector<8x8xf32>
      %349 = tpu.matmul %304, %348, %cst_232 {dimension_numbers = #tpu.dot_dimension_numbers<[1], [0], [0], [1], [0, 0, 1, 1], [], []>} : vector<8x32xf32>, vector<32x8xf32>, vector<8x8xf32> -> vector<8x8xf32>
      %c2_233 = arith.constant 2 : index
      %c0_234 = arith.constant 0 : index
      %c0_235 = arith.constant 0 : index
      %350 = vector.load %arg7[%c2_233, %c0_234, %c0_235] : memref<4x1x8xf32, #tpu.memory_space<vmem>>, vector<1x1x8xf32>
      %351 = vector.shape_cast %350 : vector<1x1x8xf32> to vector<1x8xf32>
      %352 = vector.broadcast %351 : vector<1x8xf32> to vector<8x8xf32>
      %353 = arith.addf %349, %352 : vector<8x8xf32>
      %c0_236 = arith.constant 0 : index
      %c2_237 = arith.constant 2 : index
      %c0_238 = arith.constant 0 : index
      %c0_239 = arith.constant 0 : index
      %354 = vector.load %arg20[%c0_236, %c2_237, %c0_238, %c0_239] : memref<2x4x8x8xf32, #tpu.memory_space<vmem>>, vector<1x1x8x8xf32>
      %355 = vector.shape_cast %354 : vector<1x1x8x8xf32> to vector<8x8xf32>
      %356 = vector.shape_cast %353 : vector<8x8xf32> to vector<1x1x8x8xf32>
      tpu.vector_store %arg20[%c0_236, %c2_237, %c0_238, %c0_239], %356 {strides = array<i32>} : memref<2x4x8x8xf32, #tpu.memory_space<vmem>>, vector<1x1x8x8xf32>,
      %c2_240 = arith.constant 2 : index
      %c0_241 = arith.constant 0 : index
      %c0_242 = arith.constant 0 : index
      %357 = vector.load %arg5[%c2_240, %c0_241, %c0_242] : memref<4x32x8xf32, #tpu.memory_space<vmem>>, vector<1x32x8xf32>
      %358 = vector.shape_cast %357 : vector<1x32x8xf32> to vector<32x8xf32>
      %cst_243 = arith.constant dense<0.000000e+00> : vector<8x8xf32>
      %359 = tpu.matmul %306, %358, %cst_243 {dimension_numbers = #tpu.dot_dimension_numbers<[1], [0], [0], [1], [0, 0, 1, 1], [], []>} : vector<8x32xf32>, vector<32x8xf32>, vector<8x8xf32> -> vector<8x8xf32>
      %c2_244 = arith.constant 2 : index
      %c0_245 = arith.constant 0 : index
      %c0_246 = arith.constant 0 : index
      %360 = vector.load %arg8[%c2_244, %c0_245, %c0_246] : memref<4x1x8xf32, #tpu.memory_space<vmem>>, vector<1x1x8xf32>
      %361 = vector.shape_cast %360 : vector<1x1x8xf32> to vector<1x8xf32>
      %362 = vector.broadcast %361 : vector<1x8xf32> to vector<8x8xf32>
      %363 = arith.addf %359, %362 : vector<8x8xf32>
      %c0_247 = arith.constant 0 : index
      %c2_248 = arith.constant 2 : index
      %c0_249 = arith.constant 0 : index
      %c0_250 = arith.constant 0 : index
      %364 = vector.load %arg21[%c0_247, %c2_248, %c0_249, %c0_250] : memref<2x4x8x8xf32, #tpu.memory_space<vmem>>, vector<1x1x8x8xf32>
      %365 = vector.shape_cast %364 : vector<1x1x8x8xf32> to vector<8x8xf32>
      %366 = vector.shape_cast %363 : vector<8x8xf32> to vector<1x1x8x8xf32>
      tpu.vector_store %arg21[%c0_247, %c2_248, %c0_249, %c0_250], %366 {strides = array<i32>} : memref<2x4x8x8xf32, #tpu.memory_space<vmem>>, vector<1x1x8x8xf32>,
      %c3_251 = arith.constant 3 : index
      %c0_252 = arith.constant 0 : index
      %c0_253 = arith.constant 0 : index
      %367 = vector.load %arg4[%c3_251, %c0_252, %c0_253] : memref<4x32x8xf32, #tpu.memory_space<vmem>>, vector<1x32x8xf32>
      %368 = vector.shape_cast %367 : vector<1x32x8xf32> to vector<32x8xf32>
      %cst_254 = arith.constant dense<0.000000e+00> : vector<8x8xf32>
      %369 = tpu.matmul %304, %368, %cst_254 {dimension_numbers = #tpu.dot_dimension_numbers<[1], [0], [0], [1], [0, 0, 1, 1], [], []>} : vector<8x32xf32>, vector<32x8xf32>, vector<8x8xf32> -> vector<8x8xf32>
      %c3_255 = arith.constant 3 : index
      %c0_256 = arith.constant 0 : index
      %c0_257 = arith.constant 0 : index
      %370 = vector.load %arg7[%c3_255, %c0_256, %c0_257] : memref<4x1x8xf32, #tpu.memory_space<vmem>>, vector<1x1x8xf32>
      %371 = vector.shape_cast %370 : vector<1x1x8xf32> to vector<1x8xf32>
      %372 = vector.broadcast %371 : vector<1x8xf32> to vector<8x8xf32>
      %373 = arith.addf %369, %372 : vector<8x8xf32>
      %c0_258 = arith.constant 0 : index
      %c3_259 = arith.constant 3 : index
      %c0_260 = arith.constant 0 : index
      %c0_261 = arith.constant 0 : index
      %374 = vector.load %arg20[%c0_258, %c3_259, %c0_260, %c0_261] : memref<2x4x8x8xf32, #tpu.memory_space<vmem>>, vector<1x1x8x8xf32>
      %375 = vector.shape_cast %374 : vector<1x1x8x8xf32> to vector<8x8xf32>
      %376 = vector.shape_cast %373 : vector<8x8xf32> to vector<1x1x8x8xf32>
      tpu.vector_store %arg20[%c0_258, %c3_259, %c0_260, %c0_261], %376 {strides = array<i32>} : memref<2x4x8x8xf32, #tpu.memory_space<vmem>>, vector<1x1x8x8xf32>,
      %c3_262 = arith.constant 3 : index
      %c0_263 = arith.constant 0 : index
      %c0_264 = arith.constant 0 : index
      %377 = vector.load %arg5[%c3_262, %c0_263, %c0_264] : memref<4x32x8xf32, #tpu.memory_space<vmem>>, vector<1x32x8xf32>
      %378 = vector.shape_cast %377 : vector<1x32x8xf32> to vector<32x8xf32>
      %cst_265 = arith.constant dense<0.000000e+00> : vector<8x8xf32>
      %379 = tpu.matmul %306, %378, %cst_265 {dimension_numbers = #tpu.dot_dimension_numbers<[1], [0], [0], [1], [0, 0, 1, 1], [], []>} : vector<8x32xf32>, vector<32x8xf32>, vector<8x8xf32> -> vector<8x8xf32>
      %c3_266 = arith.constant 3 : index
      %c0_267 = arith.constant 0 : index
      %c0_268 = arith.constant 0 : index
      %380 = vector.load %arg8[%c3_266, %c0_267, %c0_268] : memref<4x1x8xf32, #tpu.memory_space<vmem>>, vector<1x1x8xf32>
      %381 = vector.shape_cast %380 : vector<1x1x8xf32> to vector<1x8xf32>
      %382 = vector.broadcast %381 : vector<1x8xf32> to vector<8x8xf32>
      %383 = arith.addf %379, %382 : vector<8x8xf32>
      %c0_269 = arith.constant 0 : index
      %c3_270 = arith.constant 3 : index
      %c0_271 = arith.constant 0 : index
      %c0_272 = arith.constant 0 : index
      %384 = vector.load %arg21[%c0_269, %c3_270, %c0_271, %c0_272] : memref<2x4x8x8xf32, #tpu.memory_space<vmem>>, vector<1x1x8x8xf32>
      %385 = vector.shape_cast %384 : vector<1x1x8x8xf32> to vector<8x8xf32>
      %386 = vector.shape_cast %383 : vector<8x8xf32> to vector<1x1x8x8xf32>
      tpu.vector_store %arg21[%c0_269, %c3_270, %c0_271, %c0_272], %386 {strides = array<i32>} : memref<2x4x8x8xf32, #tpu.memory_space<vmem>>, vector<1x1x8x8xf32>,
      %387 = vector.extract_strided_slice %302 {offsets = [0, 1, 0], sizes = [8, 1, 32], strides = [1, 1, 1]} : vector<8x2x32xf32> to vector<8x1x32xf32>
      %388 = vector.shape_cast %387 : vector<8x1x32xf32> to vector<8x32xf32>
      %389 = vector.extract_strided_slice %300 {offsets = [0, 1, 0], sizes = [8, 1, 32], strides = [1, 1, 1]} : vector<8x2x32xf32> to vector<8x1x32xf32>
      %390 = vector.shape_cast %389 : vector<8x1x32xf32> to vector<8x32xf32>
      %c0_273 = arith.constant 0 : index
      %c0_274 = arith.constant 0 : index
      %c0_275 = arith.constant 0 : index
      %391 = vector.load %arg4[%c0_273, %c0_274, %c0_275] : memref<4x32x8xf32, #tpu.memory_space<vmem>>, vector<1x32x8xf32>
      %392 = vector.shape_cast %391 : vector<1x32x8xf32> to vector<32x8xf32>
      %cst_276 = arith.constant dense<0.000000e+00> : vector<8x8xf32>
      %393 = tpu.matmul %388, %392, %cst_276 {dimension_numbers = #tpu.dot_dimension_numbers<[1], [0], [0], [1], [0, 0, 1, 1], [], []>} : vector<8x32xf32>, vector<32x8xf32>, vector<8x8xf32> -> vector<8x8xf32>
      %c0_277 = arith.constant 0 : index
      %c0_278 = arith.constant 0 : index
      %c0_279 = arith.constant 0 : index
      %394 = vector.load %arg7[%c0_277, %c0_278, %c0_279] : memref<4x1x8xf32, #tpu.memory_space<vmem>>, vector<1x1x8xf32>
      %395 = vector.shape_cast %394 : vector<1x1x8xf32> to vector<1x8xf32>
      %396 = vector.broadcast %395 : vector<1x8xf32> to vector<8x8xf32>
      %397 = arith.addf %393, %396 : vector<8x8xf32>
      %c1_280 = arith.constant 1 : index
      %c0_281 = arith.constant 0 : index
      %c0_282 = arith.constant 0 : index
      %c0_283 = arith.constant 0 : index
      %398 = vector.load %arg20[%c1_280, %c0_281, %c0_282, %c0_283] : memref<2x4x8x8xf32, #tpu.memory_space<vmem>>, vector<1x1x8x8xf32>
      %399 = vector.shape_cast %398 : vector<1x1x8x8xf32> to vector<8x8xf32>
      %400 = vector.shape_cast %397 : vector<8x8xf32> to vector<1x1x8x8xf32>
      tpu.vector_store %arg20[%c1_280, %c0_281, %c0_282, %c0_283], %400 {strides = array<i32>} : memref<2x4x8x8xf32, #tpu.memory_space<vmem>>, vector<1x1x8x8xf32>,
      %c0_284 = arith.constant 0 : index
      %c0_285 = arith.constant 0 : index
      %c0_286 = arith.constant 0 : index
      %401 = vector.load %arg5[%c0_284, %c0_285, %c0_286] : memref<4x32x8xf32, #tpu.memory_space<vmem>>, vector<1x32x8xf32>
      %402 = vector.shape_cast %401 : vector<1x32x8xf32> to vector<32x8xf32>
      %cst_287 = arith.constant dense<0.000000e+00> : vector<8x8xf32>
      %403 = tpu.matmul %390, %402, %cst_287 {dimension_numbers = #tpu.dot_dimension_numbers<[1], [0], [0], [1], [0, 0, 1, 1], [], []>} : vector<8x32xf32>, vector<32x8xf32>, vector<8x8xf32> -> vector<8x8xf32>
      %c0_288 = arith.constant 0 : index
      %c0_289 = arith.constant 0 : index
      %c0_290 = arith.constant 0 : index
      %404 = vector.load %arg8[%c0_288, %c0_289, %c0_290] : memref<4x1x8xf32, #tpu.memory_space<vmem>>, vector<1x1x8xf32>
      %405 = vector.shape_cast %404 : vector<1x1x8xf32> to vector<1x8xf32>
      %406 = vector.broadcast %405 : vector<1x8xf32> to vector<8x8xf32>
      %407 = arith.addf %403, %406 : vector<8x8xf32>
      %c1_291 = arith.constant 1 : index
      %c0_292 = arith.constant 0 : index
      %c0_293 = arith.constant 0 : index
      %c0_294 = arith.constant 0 : index
      %408 = vector.load %arg21[%c1_291, %c0_292, %c0_293, %c0_294] : memref<2x4x8x8xf32, #tpu.memory_space<vmem>>, vector<1x1x8x8xf32>
      %409 = vector.shape_cast %408 : vector<1x1x8x8xf32> to vector<8x8xf32>
      %410 = vector.shape_cast %407 : vector<8x8xf32> to vector<1x1x8x8xf32>
      tpu.vector_store %arg21[%c1_291, %c0_292, %c0_293, %c0_294], %410 {strides = array<i32>} : memref<2x4x8x8xf32, #tpu.memory_space<vmem>>, vector<1x1x8x8xf32>,
      %c1_295 = arith.constant 1 : index
      %c0_296 = arith.constant 0 : index
      %c0_297 = arith.constant 0 : index
      %411 = vector.load %arg4[%c1_295, %c0_296, %c0_297] : memref<4x32x8xf32, #tpu.memory_space<vmem>>, vector<1x32x8xf32>
      %412 = vector.shape_cast %411 : vector<1x32x8xf32> to vector<32x8xf32>
      %cst_298 = arith.constant dense<0.000000e+00> : vector<8x8xf32>
      %413 = tpu.matmul %388, %412, %cst_298 {dimension_numbers = #tpu.dot_dimension_numbers<[1], [0], [0], [1], [0, 0, 1, 1], [], []>} : vector<8x32xf32>, vector<32x8xf32>, vector<8x8xf32> -> vector<8x8xf32>
      %c1_299 = arith.constant 1 : index
      %c0_300 = arith.constant 0 : index
      %c0_301 = arith.constant 0 : index
      %414 = vector.load %arg7[%c1_299, %c0_300, %c0_301] : memref<4x1x8xf32, #tpu.memory_space<vmem>>, vector<1x1x8xf32>
      %415 = vector.shape_cast %414 : vector<1x1x8xf32> to vector<1x8xf32>
      %416 = vector.broadcast %415 : vector<1x8xf32> to vector<8x8xf32>
      %417 = arith.addf %413, %416 : vector<8x8xf32>
      %c1_302 = arith.constant 1 : index
      %c1_303 = arith.constant 1 : index
      %c0_304 = arith.constant 0 : index
      %c0_305 = arith.constant 0 : index
      %418 = vector.load %arg20[%c1_302, %c1_303, %c0_304, %c0_305] : memref<2x4x8x8xf32, #tpu.memory_space<vmem>>, vector<1x1x8x8xf32>
      %419 = vector.shape_cast %418 : vector<1x1x8x8xf32> to vector<8x8xf32>
      %420 = vector.shape_cast %417 : vector<8x8xf32> to vector<1x1x8x8xf32>
      tpu.vector_store %arg20[%c1_302, %c1_303, %c0_304, %c0_305], %420 {strides = array<i32>} : memref<2x4x8x8xf32, #tpu.memory_space<vmem>>, vector<1x1x8x8xf32>,
      %c1_306 = arith.constant 1 : index
      %c0_307 = arith.constant 0 : index
      %c0_308 = arith.constant 0 : index
      %421 = vector.load %arg5[%c1_306, %c0_307, %c0_308] : memref<4x32x8xf32, #tpu.memory_space<vmem>>, vector<1x32x8xf32>
      %422 = vector.shape_cast %421 : vector<1x32x8xf32> to vector<32x8xf32>
      %cst_309 = arith.constant dense<0.000000e+00> : vector<8x8xf32>
      %423 = tpu.matmul %390, %422, %cst_309 {dimension_numbers = #tpu.dot_dimension_numbers<[1], [0], [0], [1], [0, 0, 1, 1], [], []>} : vector<8x32xf32>, vector<32x8xf32>, vector<8x8xf32> -> vector<8x8xf32>
      %c1_310 = arith.constant 1 : index
      %c0_311 = arith.constant 0 : index
      %c0_312 = arith.constant 0 : index
      %424 = vector.load %arg8[%c1_310, %c0_311, %c0_312] : memref<4x1x8xf32, #tpu.memory_space<vmem>>, vector<1x1x8xf32>
      %425 = vector.shape_cast %424 : vector<1x1x8xf32> to vector<1x8xf32>
      %426 = vector.broadcast %425 : vector<1x8xf32> to vector<8x8xf32>
      %427 = arith.addf %423, %426 : vector<8x8xf32>
      %c1_313 = arith.constant 1 : index
      %c1_314 = arith.constant 1 : index
      %c0_315 = arith.constant 0 : index
      %c0_316 = arith.constant 0 : index
      %428 = vector.load %arg21[%c1_313, %c1_314, %c0_315, %c0_316] : memref<2x4x8x8xf32, #tpu.memory_space<vmem>>, vector<1x1x8x8xf32>
      %429 = vector.shape_cast %428 : vector<1x1x8x8xf32> to vector<8x8xf32>
      %430 = vector.shape_cast %427 : vector<8x8xf32> to vector<1x1x8x8xf32>
      tpu.vector_store %arg21[%c1_313, %c1_314, %c0_315, %c0_316], %430 {strides = array<i32>} : memref<2x4x8x8xf32, #tpu.memory_space<vmem>>, vector<1x1x8x8xf32>,
      %c2_317 = arith.constant 2 : index
      %c0_318 = arith.constant 0 : index
      %c0_319 = arith.constant 0 : index
      %431 = vector.load %arg4[%c2_317, %c0_318, %c0_319] : memref<4x32x8xf32, #tpu.memory_space<vmem>>, vector<1x32x8xf32>
      %432 = vector.shape_cast %431 : vector<1x32x8xf32> to vector<32x8xf32>
      %cst_320 = arith.constant dense<0.000000e+00> : vector<8x8xf32>
      %433 = tpu.matmul %388, %432, %cst_320 {dimension_numbers = #tpu.dot_dimension_numbers<[1], [0], [0], [1], [0, 0, 1, 1], [], []>} : vector<8x32xf32>, vector<32x8xf32>, vector<8x8xf32> -> vector<8x8xf32>
      %c2_321 = arith.constant 2 : index
      %c0_322 = arith.constant 0 : index
      %c0_323 = arith.constant 0 : index
      %434 = vector.load %arg7[%c2_321, %c0_322, %c0_323] : memref<4x1x8xf32, #tpu.memory_space<vmem>>, vector<1x1x8xf32>
      %435 = vector.shape_cast %434 : vector<1x1x8xf32> to vector<1x8xf32>
      %436 = vector.broadcast %435 : vector<1x8xf32> to vector<8x8xf32>
      %437 = arith.addf %433, %436 : vector<8x8xf32>
      %c1_324 = arith.constant 1 : index
      %c2_325 = arith.constant 2 : index
      %c0_326 = arith.constant 0 : index
      %c0_327 = arith.constant 0 : index
      %438 = vector.load %arg20[%c1_324, %c2_325, %c0_326, %c0_327] : memref<2x4x8x8xf32, #tpu.memory_space<vmem>>, vector<1x1x8x8xf32>
      %439 = vector.shape_cast %438 : vector<1x1x8x8xf32> to vector<8x8xf32>
      %440 = vector.shape_cast %437 : vector<8x8xf32> to vector<1x1x8x8xf32>
      tpu.vector_store %arg20[%c1_324, %c2_325, %c0_326, %c0_327], %440 {strides = array<i32>} : memref<2x4x8x8xf32, #tpu.memory_space<vmem>>, vector<1x1x8x8xf32>,
      %c2_328 = arith.constant 2 : index
      %c0_329 = arith.constant 0 : index
      %c0_330 = arith.constant 0 : index
      %441 = vector.load %arg5[%c2_328, %c0_329, %c0_330] : memref<4x32x8xf32, #tpu.memory_space<vmem>>, vector<1x32x8xf32>
      %442 = vector.shape_cast %441 : vector<1x32x8xf32> to vector<32x8xf32>
      %cst_331 = arith.constant dense<0.000000e+00> : vector<8x8xf32>
      %443 = tpu.matmul %390, %442, %cst_331 {dimension_numbers = #tpu.dot_dimension_numbers<[1], [0], [0], [1], [0, 0, 1, 1], [], []>} : vector<8x32xf32>, vector<32x8xf32>, vector<8x8xf32> -> vector<8x8xf32>
      %c2_332 = arith.constant 2 : index
      %c0_333 = arith.constant 0 : index
      %c0_334 = arith.constant 0 : index
      %444 = vector.load %arg8[%c2_332, %c0_333, %c0_334] : memref<4x1x8xf32, #tpu.memory_space<vmem>>, vector<1x1x8xf32>
      %445 = vector.shape_cast %444 : vector<1x1x8xf32> to vector<1x8xf32>
      %446 = vector.broadcast %445 : vector<1x8xf32> to vector<8x8xf32>
      %447 = arith.addf %443, %446 : vector<8x8xf32>
      %c1_335 = arith.constant 1 : index
      %c2_336 = arith.constant 2 : index
      %c0_337 = arith.constant 0 : index
      %c0_338 = arith.constant 0 : index
      %448 = vector.load %arg21[%c1_335, %c2_336, %c0_337, %c0_338] : memref<2x4x8x8xf32, #tpu.memory_space<vmem>>, vector<1x1x8x8xf32>
      %449 = vector.shape_cast %448 : vector<1x1x8x8xf32> to vector<8x8xf32>
      %450 = vector.shape_cast %447 : vector<8x8xf32> to vector<1x1x8x8xf32>
      tpu.vector_store %arg21[%c1_335, %c2_336, %c0_337, %c0_338], %450 {strides = array<i32>} : memref<2x4x8x8xf32, #tpu.memory_space<vmem>>, vector<1x1x8x8xf32>,
      %c3_339 = arith.constant 3 : index
      %c0_340 = arith.constant 0 : index
      %c0_341 = arith.constant 0 : index
      %451 = vector.load %arg4[%c3_339, %c0_340, %c0_341] : memref<4x32x8xf32, #tpu.memory_space<vmem>>, vector<1x32x8xf32>
      %452 = vector.shape_cast %451 : vector<1x32x8xf32> to vector<32x8xf32>
      %cst_342 = arith.constant dense<0.000000e+00> : vector<8x8xf32>
      %453 = tpu.matmul %388, %452, %cst_342 {dimension_numbers = #tpu.dot_dimension_numbers<[1], [0], [0], [1], [0, 0, 1, 1], [], []>} : vector<8x32xf32>, vector<32x8xf32>, vector<8x8xf32> -> vector<8x8xf32>
      %c3_343 = arith.constant 3 : index
      %c0_344 = arith.constant 0 : index
      %c0_345 = arith.constant 0 : index
      %454 = vector.load %arg7[%c3_343, %c0_344, %c0_345] : memref<4x1x8xf32, #tpu.memory_space<vmem>>, vector<1x1x8xf32>
      %455 = vector.shape_cast %454 : vector<1x1x8xf32> to vector<1x8xf32>
      %456 = vector.broadcast %455 : vector<1x8xf32> to vector<8x8xf32>
      %457 = arith.addf %453, %456 : vector<8x8xf32>
      %c1_346 = arith.constant 1 : index
      %c3_347 = arith.constant 3 : index
      %c0_348 = arith.constant 0 : index
      %c0_349 = arith.constant 0 : index
      %458 = vector.load %arg20[%c1_346, %c3_347, %c0_348, %c0_349] : memref<2x4x8x8xf32, #tpu.memory_space<vmem>>, vector<1x1x8x8xf32>
      %459 = vector.shape_cast %458 : vector<1x1x8x8xf32> to vector<8x8xf32>
      %460 = vector.shape_cast %457 : vector<8x8xf32> to vector<1x1x8x8xf32>
      tpu.vector_store %arg20[%c1_346, %c3_347, %c0_348, %c0_349], %460 {strides = array<i32>} : memref<2x4x8x8xf32, #tpu.memory_space<vmem>>, vector<1x1x8x8xf32>,
      %c3_350 = arith.constant 3 : index
      %c0_351 = arith.constant 0 : index
      %c0_352 = arith.constant 0 : index
      %461 = vector.load %arg5[%c3_350, %c0_351, %c0_352] : memref<4x32x8xf32, #tpu.memory_space<vmem>>, vector<1x32x8xf32>
      %462 = vector.shape_cast %461 : vector<1x32x8xf32> to vector<32x8xf32>
      %cst_353 = arith.constant dense<0.000000e+00> : vector<8x8xf32>
      %463 = tpu.matmul %390, %462, %cst_353 {dimension_numbers = #tpu.dot_dimension_numbers<[1], [0], [0], [1], [0, 0, 1, 1], [], []>} : vector<8x32xf32>, vector<32x8xf32>, vector<8x8xf32> -> vector<8x8xf32>
      %c3_354 = arith.constant 3 : index
      %c0_355 = arith.constant 0 : index
      %c0_356 = arith.constant 0 : index
      %464 = vector.load %arg8[%c3_354, %c0_355, %c0_356] : memref<4x1x8xf32, #tpu.memory_space<vmem>>, vector<1x1x8xf32>
      %465 = vector.shape_cast %464 : vector<1x1x8xf32> to vector<1x8xf32>
      %466 = vector.broadcast %465 : vector<1x8xf32> to vector<8x8xf32>
      %467 = arith.addf %463, %466 : vector<8x8xf32>
      %c1_357 = arith.constant 1 : index
      %c3_358 = arith.constant 3 : index
      %c0_359 = arith.constant 0 : index
      %c0_360 = arith.constant 0 : index
      %468 = vector.load %arg21[%c1_357, %c3_358, %c0_359, %c0_360] : memref<2x4x8x8xf32, #tpu.memory_space<vmem>>, vector<1x1x8x8xf32>
      %469 = vector.shape_cast %468 : vector<1x1x8x8xf32> to vector<8x8xf32>
      %470 = vector.shape_cast %467 : vector<8x8xf32> to vector<1x1x8x8xf32>
      tpu.vector_store %arg21[%c1_357, %c3_358, %c0_359, %c0_360], %470 {strides = array<i32>} : memref<2x4x8x8xf32, #tpu.memory_space<vmem>>, vector<1x1x8x8xf32>,
    } else {
    }
    %c4_i32 = arith.constant 4 : i32
    %3 = arith.muli %arg0, %c4_i32 : i32
    %4 = tpu.assume_multiple %3, 4 : i32
    %5 = arith.index_cast %4 : i32 to index
    %c0 = arith.constant 0 : index
    %c0_1 = arith.constant 0 : index
    %6 = vector.load %arg1[%5, %c0, %c0_1] : memref<8x2x32xf32, #tpu.memory_space<vmem>>, vector<4x2x32xf32>
    %7 = arith.index_cast %4 : i32 to index
    %c0_2 = arith.constant 0 : index
    %c0_3 = arith.constant 0 : index
    %8 = vector.load %arg2[%7, %c0_2, %c0_3] : memref<8x2x32xf32, #tpu.memory_space<vmem>>, vector<4x2x32xf32>
    %9 = arith.addf %6, %8 : vector<4x2x32xf32>
    %10 = vector.extract_strided_slice %9 {offsets = [0, 0, 0], sizes = [4, 1, 32], strides = [1, 1, 1]} : vector<4x2x32xf32> to vector<4x1x32xf32>
    %11 = vector.shape_cast %10 : vector<4x1x32xf32> to vector<4x32xf32>
    %c0_4 = arith.constant 0 : index
    %c0_5 = arith.constant 0 : index
    %c0_6 = arith.constant 0 : index
    %12 = vector.load %arg3[%c0_4, %c0_5, %c0_6] : memref<4x32x8xf32, #tpu.memory_space<vmem>>, vector<1x32x8xf32>
    %13 = vector.shape_cast %12 : vector<1x32x8xf32> to vector<32x8xf32>
    %cst = arith.constant dense<0.000000e+00> : vector<4x8xf32>
    %14 = tpu.matmul %11, %13, %cst {dimension_numbers = #tpu.dot_dimension_numbers<[1], [0], [0], [1], [0, 0, 1, 1], [], []>} : vector<4x32xf32>, vector<32x8xf32>, vector<4x8xf32> -> vector<4x8xf32>
    %c0_7 = arith.constant 0 : index
    %c0_8 = arith.constant 0 : index
    %c0_9 = arith.constant 0 : index
    %15 = vector.load %arg6[%c0_7, %c0_8, %c0_9] : memref<4x1x8xf32, #tpu.memory_space<vmem>>, vector<1x1x8xf32>
    %16 = vector.shape_cast %15 : vector<1x1x8xf32> to vector<1x8xf32>
    %17 = vector.broadcast %16 : vector<1x8xf32> to vector<4x8xf32>
    %18 = arith.addf %14, %17 : vector<4x8xf32>
    %c1 = arith.constant 1 : index
    %c0_10 = arith.constant 0 : index
    %c0_11 = arith.constant 0 : index
    %19 = vector.load %arg3[%c1, %c0_10, %c0_11] : memref<4x32x8xf32, #tpu.memory_space<vmem>>, vector<1x32x8xf32>
    %20 = vector.shape_cast %19 : vector<1x32x8xf32> to vector<32x8xf32>
    %cst_12 = arith.constant dense<0.000000e+00> : vector<4x8xf32>
    %21 = tpu.matmul %11, %20, %cst_12 {dimension_numbers = #tpu.dot_dimension_numbers<[1], [0], [0], [1], [0, 0, 1, 1], [], []>} : vector<4x32xf32>, vector<32x8xf32>, vector<4x8xf32> -> vector<4x8xf32>
    %c1_13 = arith.constant 1 : index
    %c0_14 = arith.constant 0 : index
    %c0_15 = arith.constant 0 : index
    %22 = vector.load %arg6[%c1_13, %c0_14, %c0_15] : memref<4x1x8xf32, #tpu.memory_space<vmem>>, vector<1x1x8xf32>
    %23 = vector.shape_cast %22 : vector<1x1x8xf32> to vector<1x8xf32>
    %24 = vector.broadcast %23 : vector<1x8xf32> to vector<4x8xf32>
    %25 = arith.addf %21, %24 : vector<4x8xf32>
    %c2 = arith.constant 2 : index
    %c0_16 = arith.constant 0 : index
    %c0_17 = arith.constant 0 : index
    %26 = vector.load %arg3[%c2, %c0_16, %c0_17] : memref<4x32x8xf32, #tpu.memory_space<vmem>>, vector<1x32x8xf32>
    %27 = vector.shape_cast %26 : vector<1x32x8xf32> to vector<32x8xf32>
    %cst_18 = arith.constant dense<0.000000e+00> : vector<4x8xf32>
    %28 = tpu.matmul %11, %27, %cst_18 {dimension_numbers = #tpu.dot_dimension_numbers<[1], [0], [0], [1], [0, 0, 1, 1], [], []>} : vector<4x32xf32>, vector<32x8xf32>, vector<4x8xf32> -> vector<4x8xf32>
    %c2_19 = arith.constant 2 : index
    %c0_20 = arith.constant 0 : index
    %c0_21 = arith.constant 0 : index
    %29 = vector.load %arg6[%c2_19, %c0_20, %c0_21] : memref<4x1x8xf32, #tpu.memory_space<vmem>>, vector<1x1x8xf32>
    %30 = vector.shape_cast %29 : vector<1x1x8xf32> to vector<1x8xf32>
    %31 = vector.broadcast %30 : vector<1x8xf32> to vector<4x8xf32>
    %32 = arith.addf %28, %31 : vector<4x8xf32>
    %c3 = arith.constant 3 : index
    %c0_22 = arith.constant 0 : index
    %c0_23 = arith.constant 0 : index
    %33 = vector.load %arg3[%c3, %c0_22, %c0_23] : memref<4x32x8xf32, #tpu.memory_space<vmem>>, vector<1x32x8xf32>
    %34 = vector.shape_cast %33 : vector<1x32x8xf32> to vector<32x8xf32>
    %cst_24 = arith.constant dense<0.000000e+00> : vector<4x8xf32>
    %35 = tpu.matmul %11, %34, %cst_24 {dimension_numbers = #tpu.dot_dimension_numbers<[1], [0], [0], [1], [0, 0, 1, 1], [], []>} : vector<4x32xf32>, vector<32x8xf32>, vector<4x8xf32> -> vector<4x8xf32>
    %c3_25 = arith.constant 3 : index
    %c0_26 = arith.constant 0 : index
    %c0_27 = arith.constant 0 : index
    %36 = vector.load %arg6[%c3_25, %c0_26, %c0_27] : memref<4x1x8xf32, #tpu.memory_space<vmem>>, vector<1x1x8xf32>
    %37 = vector.shape_cast %36 : vector<1x1x8xf32> to vector<1x8xf32>
    %38 = vector.broadcast %37 : vector<1x8xf32> to vector<4x8xf32>
    %39 = arith.addf %35, %38 : vector<4x8xf32>
    %40 = vector.shape_cast %18 : vector<4x8xf32> to vector<1x4x8xf32>
    %41 = vector.shape_cast %25 : vector<4x8xf32> to vector<1x4x8xf32>
    %42 = vector.shape_cast %32 : vector<4x8xf32> to vector<1x4x8xf32>
    %43 = vector.shape_cast %39 : vector<4x8xf32> to vector<1x4x8xf32>
    %44 = tpu.concatenate %40, %41, %42, %43 in 0 : vector<1x4x8xf32>, vector<1x4x8xf32>, vector<1x4x8xf32>, vector<1x4x8xf32> -> vector<4x4x8xf32>
    %c0_28 = arith.constant 0 : index
    %c0_29 = arith.constant 0 : index
    %c0_30 = arith.constant 0 : index
    %c0_31 = arith.constant 0 : index
    %45 = vector.load %arg20[%c0_28, %c0_29, %c0_30, %c0_31] : memref<2x4x8x8xf32, #tpu.memory_space<vmem>>, vector<1x4x8x8xf32>
    %46 = vector.shape_cast %45 : vector<1x4x8x8xf32> to vector<4x8x8xf32>
    %c0_32 = arith.constant 0 : index
    %c0_33 = arith.constant 0 : index
    %c0_34 = arith.constant 0 : index
    %c0_35 = arith.constant 0 : index
    %47 = vector.load %arg21[%c0_32, %c0_33, %c0_34, %c0_35] : memref<2x4x8x8xf32, #tpu.memory_space<vmem>>, vector<1x4x8x8xf32>
    %48 = vector.shape_cast %47 : vector<1x4x8x8xf32> to vector<4x8x8xf32>
    "tpu.trace_start"() <{level = 10 : i32, message = "hqd,hkd->hqk"}> : () -> ()
    %cst_36 = arith.constant dense<0.000000e+00> : vector<4x4x8xf32>
    %49 = tpu.matmul %44, %46, %cst_36 {dimension_numbers = #tpu.dot_dimension_numbers<[2], [2], [1], [1], [0, 0, 0, 1, 1, 1], [0], [0]>} : vector<4x4x8xf32>, vector<4x8x8xf32>, vector<4x4x8xf32> -> vector<4x4x8xf32>
    "tpu.trace_stop"() : () -> ()
    %cst_37 = arith.constant dense<0xFF800000> : vector<4x4xf32>
    %50 = vector.multi_reduction <maximumf>, %49, %cst_37 [2] : vector<4x4x8xf32> to vector<4x4xf32>
    %51 = vector.shape_cast %50 : vector<4x4xf32> to vector<4x4x1xf32>
    %52 = vector.broadcast %51 : vector<4x4x1xf32> to vector<4x4x8xf32>
    %53 = arith.subf %49, %52 : vector<4x4x8xf32>
    %54 = math.exp %53 : vector<4x4x8xf32>
    %cst_38 = arith.constant dense<0.000000e+00> : vector<4x4xf32>
    %55 = vector.multi_reduction <add>, %54, %cst_38 [2] : vector<4x4x8xf32> to vector<4x4xf32>
    %56 = vector.shape_cast %55 : vector<4x4xf32> to vector<4x4x1xf32>
    %57 = tpu.reciprocal %56 {approx = true} : vector<4x4x1xf32> -> vector<4x4x1xf32>
    %58 = vector.broadcast %57 : vector<4x4x1xf32> to vector<4x4x8xf32>
    %59 = arith.mulf %54, %58 : vector<4x4x8xf32>
    "tpu.trace_start"() <{level = 10 : i32, message = "hqk,hkd->hqd"}> : () -> ()
    %cst_39 = arith.constant dense<0.000000e+00> : vector<4x4x8xf32>
    %60 = tpu.matmul %59, %48, %cst_39 {dimension_numbers = #tpu.dot_dimension_numbers<[2], [1], [1], [2], [0, 0, 0, 1, 1, 2], [0], [0]>} : vector<4x4x8xf32>, vector<4x8x8xf32>, vector<4x4x8xf32> -> vector<4x4x8xf32>
    %cst_40 = arith.constant 0.000000e+00 : f32
    "tpu.trace_stop"() : () -> ()
    %61 = vector.broadcast %cst_40 : f32 to vector<4x32xf32>
    %62 = vector.extract_strided_slice %60 {offsets = [0, 0, 0], sizes = [1, 4, 8], strides = [1, 1, 1]} : vector<4x4x8xf32> to vector<1x4x8xf32>
    %63 = vector.shape_cast %62 : vector<1x4x8xf32> to vector<4x8xf32>
    %c0_41 = arith.constant 0 : index
    %c0_42 = arith.constant 0 : index
    %c0_43 = arith.constant 0 : index
    %64 = vector.load %arg9[%c0_41, %c0_42, %c0_43] : memref<4x8x32xf32, #tpu.memory_space<vmem>>, vector<1x8x32xf32>
    %65 = vector.shape_cast %64 : vector<1x8x32xf32> to vector<8x32xf32>
    %cst_44 = arith.constant dense<0.000000e+00> : vector<4x32xf32>
    %66 = tpu.matmul %63, %65, %cst_44 {dimension_numbers = #tpu.dot_dimension_numbers<[1], [0], [0], [1], [0, 0, 1, 1], [], []>} : vector<4x8xf32>, vector<8x32xf32>, vector<4x32xf32> -> vector<4x32xf32>
    %67 = arith.addf %61, %66 : vector<4x32xf32>
    %68 = vector.extract_strided_slice %60 {offsets = [1, 0, 0], sizes = [1, 4, 8], strides = [1, 1, 1]} : vector<4x4x8xf32> to vector<1x4x8xf32>
    %69 = vector.shape_cast %68 : vector<1x4x8xf32> to vector<4x8xf32>
    %c1_45 = arith.constant 1 : index
    %c0_46 = arith.constant 0 : index
    %c0_47 = arith.constant 0 : index
    %70 = vector.load %arg9[%c1_45, %c0_46, %c0_47] : memref<4x8x32xf32, #tpu.memory_space<vmem>>, vector<1x8x32xf32>
    %71 = vector.shape_cast %70 : vector<1x8x32xf32> to vector<8x32xf32>
    %cst_48 = arith.constant dense<0.000000e+00> : vector<4x32xf32>
    %72 = tpu.matmul %69, %71, %cst_48 {dimension_numbers = #tpu.dot_dimension_numbers<[1], [0], [0], [1], [0, 0, 1, 1], [], []>} : vector<4x8xf32>, vector<8x32xf32>, vector<4x32xf32> -> vector<4x32xf32>
    %73 = arith.addf %67, %72 : vector<4x32xf32>
    %74 = vector.extract_strided_slice %60 {offsets = [2, 0, 0], sizes = [1, 4, 8], strides = [1, 1, 1]} : vector<4x4x8xf32> to vector<1x4x8xf32>
    %75 = vector.shape_cast %74 : vector<1x4x8xf32> to vector<4x8xf32>
    %c2_49 = arith.constant 2 : index
    %c0_50 = arith.constant 0 : index
    %c0_51 = arith.constant 0 : index
    %76 = vector.load %arg9[%c2_49, %c0_50, %c0_51] : memref<4x8x32xf32, #tpu.memory_space<vmem>>, vector<1x8x32xf32>
    %77 = vector.shape_cast %76 : vector<1x8x32xf32> to vector<8x32xf32>
    %cst_52 = arith.constant dense<0.000000e+00> : vector<4x32xf32>
    %78 = tpu.matmul %75, %77, %cst_52 {dimension_numbers = #tpu.dot_dimension_numbers<[1], [0], [0], [1], [0, 0, 1, 1], [], []>} : vector<4x8xf32>, vector<8x32xf32>, vector<4x32xf32> -> vector<4x32xf32>
    %79 = arith.addf %73, %78 : vector<4x32xf32>
    %80 = vector.extract_strided_slice %60 {offsets = [3, 0, 0], sizes = [1, 4, 8], strides = [1, 1, 1]} : vector<4x4x8xf32> to vector<1x4x8xf32>
    %81 = vector.shape_cast %80 : vector<1x4x8xf32> to vector<4x8xf32>
    %c3_53 = arith.constant 3 : index
    %c0_54 = arith.constant 0 : index
    %c0_55 = arith.constant 0 : index
    %82 = vector.load %arg9[%c3_53, %c0_54, %c0_55] : memref<4x8x32xf32, #tpu.memory_space<vmem>>, vector<1x8x32xf32>
    %83 = vector.shape_cast %82 : vector<1x8x32xf32> to vector<8x32xf32>
    %cst_56 = arith.constant dense<0.000000e+00> : vector<4x32xf32>
    %84 = tpu.matmul %81, %83, %cst_56 {dimension_numbers = #tpu.dot_dimension_numbers<[1], [0], [0], [1], [0, 0, 1, 1], [], []>} : vector<4x8xf32>, vector<8x32xf32>, vector<4x32xf32> -> vector<4x32xf32>
    %85 = arith.addf %79, %84 : vector<4x32xf32>
    %c0_57 = arith.constant 0 : index
    %c0_58 = arith.constant 0 : index
    %86 = vector.load %arg10[%c0_57, %c0_58] : memref<1x32xf32, #tpu.memory_space<vmem>>, vector<1x32xf32>
    %87 = vector.broadcast %86 : vector<1x32xf32> to vector<4x32xf32>
    %88 = arith.addf %85, %87 : vector<4x32xf32>
    %89 = vector.extract_strided_slice %6 {offsets = [0, 0, 0], sizes = [4, 1, 32], strides = [1, 1, 1]} : vector<4x2x32xf32> to vector<4x1x32xf32>
    %90 = vector.shape_cast %89 : vector<4x1x32xf32> to vector<4x32xf32>
    %91 = arith.addf %90, %88 : vector<4x32xf32>
    %cst_59 = arith.constant dense<0.000000e+00> : vector<4xf32>
    %92 = vector.multi_reduction <add>, %91, %cst_59 [1] : vector<4x32xf32> to vector<4xf32>
    %93 = vector.shape_cast %92 : vector<4xf32> to vector<4x1xf32>
    %cst_60 = arith.constant 3.200000e+01 : f32
    %94 = vector.broadcast %cst_60 : f32 to vector<4x1xf32>
    %95 = arith.divf %93, %94 : vector<4x1xf32>
    %96 = vector.broadcast %95 : vector<4x1xf32> to vector<4x32xf32>
    %97 = arith.subf %91, %96 : vector<4x32xf32>
    %98 = arith.mulf %97, %97 : vector<4x32xf32>
    %cst_61 = arith.constant dense<0.000000e+00> : vector<4xf32>
    %99 = vector.multi_reduction <add>, %98, %cst_61 [1] : vector<4x32xf32> to vector<4xf32>
    %100 = vector.shape_cast %99 : vector<4xf32> to vector<4x1xf32>
    %cst_62 = arith.constant 3.200000e+01 : f32
    %101 = vector.broadcast %cst_62 : f32 to vector<4x1xf32>
    %102 = arith.divf %100, %101 : vector<4x1xf32>
    %103 = vector.broadcast %95 : vector<4x1xf32> to vector<4x32xf32>
    %104 = arith.subf %91, %103 : vector<4x32xf32>
    %cst_63 = arith.constant 9.99999974E-6 : f32
    %105 = vector.broadcast %cst_63 : f32 to vector<4x1xf32>
    %106 = arith.addf %102, %105 : vector<4x1xf32>
    %107 = math.rsqrt %106 : vector<4x1xf32>
    %108 = vector.broadcast %107 : vector<4x1xf32> to vector<4x32xf32>
    %109 = arith.mulf %104, %108 : vector<4x32xf32>
    %c0_64 = arith.constant 0 : index
    %c0_65 = arith.constant 0 : index
    %110 = vector.load %arg15[%c0_64, %c0_65] : memref<1x32xf32, #tpu.memory_space<vmem>>, vector<1x32xf32>
    %111 = vector.broadcast %110 : vector<1x32xf32> to vector<4x32xf32>
    %112 = arith.mulf %109, %111 : vector<4x32xf32>
    %c0_66 = arith.constant 0 : index
    %c0_67 = arith.constant 0 : index
    %113 = vector.load %arg16[%c0_66, %c0_67] : memref<1x32xf32, #tpu.memory_space<vmem>>, vector<1x32xf32>
    %114 = vector.broadcast %113 : vector<1x32xf32> to vector<4x32xf32>
    %115 = arith.addf %112, %114 : vector<4x32xf32>
    %c0_68 = arith.constant 0 : index
    %c0_69 = arith.constant 0 : index
    %116 = vector.load %arg11[%c0_68, %c0_69] : memref<32x64xf32, #tpu.memory_space<vmem>>, vector<32x64xf32>
    %cst_70 = arith.constant dense<0.000000e+00> : vector<4x64xf32>
    %117 = tpu.matmul %115, %116, %cst_70 {dimension_numbers = #tpu.dot_dimension_numbers<[1], [0], [0], [1], [0, 0, 1, 1], [], []>} : vector<4x32xf32>, vector<32x64xf32>, vector<4x64xf32> -> vector<4x64xf32>
    %c0_71 = arith.constant 0 : index
    %c0_72 = arith.constant 0 : index
    %118 = vector.load %arg12[%c0_71, %c0_72] : memref<1x64xf32, #tpu.memory_space<vmem>>, vector<1x64xf32>
    %119 = vector.broadcast %118 : vector<1x64xf32> to vector<4x64xf32>
    %120 = arith.addf %117, %119 : vector<4x64xf32>
    %cst_73 = arith.constant 0.000000e+00 : f32
    %121 = vector.broadcast %cst_73 : f32 to vector<4x64xf32>
    %122 = arith.maximumf %120, %121 : vector<4x64xf32>
    %c0_74 = arith.constant 0 : index
    %c0_75 = arith.constant 0 : index
    %123 = vector.load %arg13[%c0_74, %c0_75] : memref<64x32xf32, #tpu.memory_space<vmem>>, vector<64x32xf32>
    %cst_76 = arith.constant dense<0.000000e+00> : vector<4x32xf32>
    %124 = tpu.matmul %122, %123, %cst_76 {dimension_numbers = #tpu.dot_dimension_numbers<[1], [0], [0], [1], [0, 0, 1, 1], [], []>} : vector<4x64xf32>, vector<64x32xf32>, vector<4x32xf32> -> vector<4x32xf32>
    %c0_77 = arith.constant 0 : index
    %c0_78 = arith.constant 0 : index
    %125 = vector.load %arg14[%c0_77, %c0_78] : memref<1x32xf32, #tpu.memory_space<vmem>>, vector<1x32xf32>
    %126 = vector.broadcast %125 : vector<1x32xf32> to vector<4x32xf32>
    %127 = arith.addf %124, %126 : vector<4x32xf32>
    %128 = arith.addf %115, %127 : vector<4x32xf32>
    %cst_79 = arith.constant dense<0.000000e+00> : vector<4xf32>
    %129 = vector.multi_reduction <add>, %128, %cst_79 [1] : vector<4x32xf32> to vector<4xf32>
    %130 = vector.shape_cast %129 : vector<4xf32> to vector<4x1xf32>
    %cst_80 = arith.constant 3.200000e+01 : f32
    %131 = vector.broadcast %cst_80 : f32 to vector<4x1xf32>
    %132 = arith.divf %130, %131 : vector<4x1xf32>
    %133 = vector.broadcast %132 : vector<4x1xf32> to vector<4x32xf32>
    %134 = arith.subf %128, %133 : vector<4x32xf32>
    %135 = arith.mulf %134, %134 : vector<4x32xf32>
    %cst_81 = arith.constant dense<0.000000e+00> : vector<4xf32>
    %136 = vector.multi_reduction <add>, %135, %cst_81 [1] : vector<4x32xf32> to vector<4xf32>
    %137 = vector.shape_cast %136 : vector<4xf32> to vector<4x1xf32>
    %cst_82 = arith.constant 3.200000e+01 : f32
    %138 = vector.broadcast %cst_82 : f32 to vector<4x1xf32>
    %139 = arith.divf %137, %138 : vector<4x1xf32>
    %140 = vector.broadcast %132 : vector<4x1xf32> to vector<4x32xf32>
    %141 = arith.subf %128, %140 : vector<4x32xf32>
    %cst_83 = arith.constant 9.99999974E-6 : f32
    %142 = vector.broadcast %cst_83 : f32 to vector<4x1xf32>
    %143 = arith.addf %139, %142 : vector<4x1xf32>
    %144 = math.rsqrt %143 : vector<4x1xf32>
    %145 = vector.broadcast %144 : vector<4x1xf32> to vector<4x32xf32>
    %146 = arith.mulf %141, %145 : vector<4x32xf32>
    %c0_84 = arith.constant 0 : index
    %c0_85 = arith.constant 0 : index
    %147 = vector.load %arg17[%c0_84, %c0_85] : memref<1x32xf32, #tpu.memory_space<vmem>>, vector<1x32xf32>
    %148 = vector.broadcast %147 : vector<1x32xf32> to vector<4x32xf32>
    %149 = arith.mulf %146, %148 : vector<4x32xf32>
    %c0_86 = arith.constant 0 : index
    %c0_87 = arith.constant 0 : index
    %150 = vector.load %arg18[%c0_86, %c0_87] : memref<1x32xf32, #tpu.memory_space<vmem>>, vector<1x32xf32>
    %151 = vector.broadcast %150 : vector<1x32xf32> to vector<4x32xf32>
    %152 = arith.addf %149, %151 : vector<4x32xf32>
    %153 = vector.extract_strided_slice %9 {offsets = [0, 1, 0], sizes = [4, 1, 32], strides = [1, 1, 1]} : vector<4x2x32xf32> to vector<4x1x32xf32>
    %154 = vector.shape_cast %153 : vector<4x1x32xf32> to vector<4x32xf32>
    %c0_88 = arith.constant 0 : index
    %c0_89 = arith.constant 0 : index
    %c0_90 = arith.constant 0 : index
    %155 = vector.load %arg3[%c0_88, %c0_89, %c0_90] : memref<4x32x8xf32, #tpu.memory_space<vmem>>, vector<1x32x8xf32>
    %156 = vector.shape_cast %155 : vector<1x32x8xf32> to vector<32x8xf32>
    %cst_91 = arith.constant dense<0.000000e+00> : vector<4x8xf32>
    %157 = tpu.matmul %154, %156, %cst_91 {dimension_numbers = #tpu.dot_dimension_numbers<[1], [0], [0], [1], [0, 0, 1, 1], [], []>} : vector<4x32xf32>, vector<32x8xf32>, vector<4x8xf32> -> vector<4x8xf32>
    %c0_92 = arith.constant 0 : index
    %c0_93 = arith.constant 0 : index
    %c0_94 = arith.constant 0 : index
    %158 = vector.load %arg6[%c0_92, %c0_93, %c0_94] : memref<4x1x8xf32, #tpu.memory_space<vmem>>, vector<1x1x8xf32>
    %159 = vector.shape_cast %158 : vector<1x1x8xf32> to vector<1x8xf32>
    %160 = vector.broadcast %159 : vector<1x8xf32> to vector<4x8xf32>
    %161 = arith.addf %157, %160 : vector<4x8xf32>
    %c1_95 = arith.constant 1 : index
    %c0_96 = arith.constant 0 : index
    %c0_97 = arith.constant 0 : index
    %162 = vector.load %arg3[%c1_95, %c0_96, %c0_97] : memref<4x32x8xf32, #tpu.memory_space<vmem>>, vector<1x32x8xf32>
    %163 = vector.shape_cast %162 : vector<1x32x8xf32> to vector<32x8xf32>
    %cst_98 = arith.constant dense<0.000000e+00> : vector<4x8xf32>
    %164 = tpu.matmul %154, %163, %cst_98 {dimension_numbers = #tpu.dot_dimension_numbers<[1], [0], [0], [1], [0, 0, 1, 1], [], []>} : vector<4x32xf32>, vector<32x8xf32>, vector<4x8xf32> -> vector<4x8xf32>
    %c1_99 = arith.constant 1 : index
    %c0_100 = arith.constant 0 : index
    %c0_101 = arith.constant 0 : index
    %165 = vector.load %arg6[%c1_99, %c0_100, %c0_101] : memref<4x1x8xf32, #tpu.memory_space<vmem>>, vector<1x1x8xf32>
    %166 = vector.shape_cast %165 : vector<1x1x8xf32> to vector<1x8xf32>
    %167 = vector.broadcast %166 : vector<1x8xf32> to vector<4x8xf32>
    %168 = arith.addf %164, %167 : vector<4x8xf32>
    %c2_102 = arith.constant 2 : index
    %c0_103 = arith.constant 0 : index
    %c0_104 = arith.constant 0 : index
    %169 = vector.load %arg3[%c2_102, %c0_103, %c0_104] : memref<4x32x8xf32, #tpu.memory_space<vmem>>, vector<1x32x8xf32>
    %170 = vector.shape_cast %169 : vector<1x32x8xf32> to vector<32x8xf32>
    %cst_105 = arith.constant dense<0.000000e+00> : vector<4x8xf32>
    %171 = tpu.matmul %154, %170, %cst_105 {dimension_numbers = #tpu.dot_dimension_numbers<[1], [0], [0], [1], [0, 0, 1, 1], [], []>} : vector<4x32xf32>, vector<32x8xf32>, vector<4x8xf32> -> vector<4x8xf32>
    %c2_106 = arith.constant 2 : index
    %c0_107 = arith.constant 0 : index
    %c0_108 = arith.constant 0 : index
    %172 = vector.load %arg6[%c2_106, %c0_107, %c0_108] : memref<4x1x8xf32, #tpu.memory_space<vmem>>, vector<1x1x8xf32>
    %173 = vector.shape_cast %172 : vector<1x1x8xf32> to vector<1x8xf32>
    %174 = vector.broadcast %173 : vector<1x8xf32> to vector<4x8xf32>
    %175 = arith.addf %171, %174 : vector<4x8xf32>
    %c3_109 = arith.constant 3 : index
    %c0_110 = arith.constant 0 : index
    %c0_111 = arith.constant 0 : index
    %176 = vector.load %arg3[%c3_109, %c0_110, %c0_111] : memref<4x32x8xf32, #tpu.memory_space<vmem>>, vector<1x32x8xf32>
    %177 = vector.shape_cast %176 : vector<1x32x8xf32> to vector<32x8xf32>
    %cst_112 = arith.constant dense<0.000000e+00> : vector<4x8xf32>
    %178 = tpu.matmul %154, %177, %cst_112 {dimension_numbers = #tpu.dot_dimension_numbers<[1], [0], [0], [1], [0, 0, 1, 1], [], []>} : vector<4x32xf32>, vector<32x8xf32>, vector<4x8xf32> -> vector<4x8xf32>
    %c3_113 = arith.constant 3 : index
    %c0_114 = arith.constant 0 : index
    %c0_115 = arith.constant 0 : index
    %179 = vector.load %arg6[%c3_113, %c0_114, %c0_115] : memref<4x1x8xf32, #tpu.memory_space<vmem>>, vector<1x1x8xf32>
    %180 = vector.shape_cast %179 : vector<1x1x8xf32> to vector<1x8xf32>
    %181 = vector.broadcast %180 : vector<1x8xf32> to vector<4x8xf32>
    %182 = arith.addf %178, %181 : vector<4x8xf32>
    %183 = vector.shape_cast %161 : vector<4x8xf32> to vector<1x4x8xf32>
    %184 = vector.shape_cast %168 : vector<4x8xf32> to vector<1x4x8xf32>
    %185 = vector.shape_cast %175 : vector<4x8xf32> to vector<1x4x8xf32>
    %186 = vector.shape_cast %182 : vector<4x8xf32> to vector<1x4x8xf32>
    %187 = tpu.concatenate %183, %184, %185, %186 in 0 : vector<1x4x8xf32>, vector<1x4x8xf32>, vector<1x4x8xf32>, vector<1x4x8xf32> -> vector<4x4x8xf32>
    %c1_116 = arith.constant 1 : index
    %c0_117 = arith.constant 0 : index
    %c0_118 = arith.constant 0 : index
    %c0_119 = arith.constant 0 : index
    %188 = vector.load %arg20[%c1_116, %c0_117, %c0_118, %c0_119] : memref<2x4x8x8xf32, #tpu.memory_space<vmem>>, vector<1x4x8x8xf32>
    %189 = vector.shape_cast %188 : vector<1x4x8x8xf32> to vector<4x8x8xf32>
    %c1_120 = arith.constant 1 : index
    %c0_121 = arith.constant 0 : index
    %c0_122 = arith.constant 0 : index
    %c0_123 = arith.constant 0 : index
    %190 = vector.load %arg21[%c1_120, %c0_121, %c0_122, %c0_123] : memref<2x4x8x8xf32, #tpu.memory_space<vmem>>, vector<1x4x8x8xf32>
    %191 = vector.shape_cast %190 : vector<1x4x8x8xf32> to vector<4x8x8xf32>
    "tpu.trace_start"() <{level = 10 : i32, message = "hqd,hkd->hqk"}> : () -> ()
    %cst_124 = arith.constant dense<0.000000e+00> : vector<4x4x8xf32>
    %192 = tpu.matmul %187, %189, %cst_124 {dimension_numbers = #tpu.dot_dimension_numbers<[2], [2], [1], [1], [0, 0, 0, 1, 1, 1], [0], [0]>} : vector<4x4x8xf32>, vector<4x8x8xf32>, vector<4x4x8xf32> -> vector<4x4x8xf32>
    "tpu.trace_stop"() : () -> ()
    %cst_125 = arith.constant dense<0xFF800000> : vector<4x4xf32>
    %193 = vector.multi_reduction <maximumf>, %192, %cst_125 [2] : vector<4x4x8xf32> to vector<4x4xf32>
    %194 = vector.shape_cast %193 : vector<4x4xf32> to vector<4x4x1xf32>
    %195 = vector.broadcast %194 : vector<4x4x1xf32> to vector<4x4x8xf32>
    %196 = arith.subf %192, %195 : vector<4x4x8xf32>
    %197 = math.exp %196 : vector<4x4x8xf32>
    %cst_126 = arith.constant dense<0.000000e+00> : vector<4x4xf32>
    %198 = vector.multi_reduction <add>, %197, %cst_126 [2] : vector<4x4x8xf32> to vector<4x4xf32>
    %199 = vector.shape_cast %198 : vector<4x4xf32> to vector<4x4x1xf32>
    %200 = tpu.reciprocal %199 {approx = true} : vector<4x4x1xf32> -> vector<4x4x1xf32>
    %201 = vector.broadcast %200 : vector<4x4x1xf32> to vector<4x4x8xf32>
    %202 = arith.mulf %197, %201 : vector<4x4x8xf32>
    "tpu.trace_start"() <{level = 10 : i32, message = "hqk,hkd->hqd"}> : () -> ()
    %cst_127 = arith.constant dense<0.000000e+00> : vector<4x4x8xf32>
    %203 = tpu.matmul %202, %191, %cst_127 {dimension_numbers = #tpu.dot_dimension_numbers<[2], [1], [1], [2], [0, 0, 0, 1, 1, 2], [0], [0]>} : vector<4x4x8xf32>, vector<4x8x8xf32>, vector<4x4x8xf32> -> vector<4x4x8xf32>
    %cst_128 = arith.constant 0.000000e+00 : f32
    "tpu.trace_stop"() : () -> ()
    %204 = vector.broadcast %cst_128 : f32 to vector<4x32xf32>
    %205 = vector.extract_strided_slice %203 {offsets = [0, 0, 0], sizes = [1, 4, 8], strides = [1, 1, 1]} : vector<4x4x8xf32> to vector<1x4x8xf32>
    %206 = vector.shape_cast %205 : vector<1x4x8xf32> to vector<4x8xf32>
    %c0_129 = arith.constant 0 : index
    %c0_130 = arith.constant 0 : index
    %c0_131 = arith.constant 0 : index
    %207 = vector.load %arg9[%c0_129, %c0_130, %c0_131] : memref<4x8x32xf32, #tpu.memory_space<vmem>>, vector<1x8x32xf32>
    %208 = vector.shape_cast %207 : vector<1x8x32xf32> to vector<8x32xf32>
    %cst_132 = arith.constant dense<0.000000e+00> : vector<4x32xf32>
    %209 = tpu.matmul %206, %208, %cst_132 {dimension_numbers = #tpu.dot_dimension_numbers<[1], [0], [0], [1], [0, 0, 1, 1], [], []>} : vector<4x8xf32>, vector<8x32xf32>, vector<4x32xf32> -> vector<4x32xf32>
    %210 = arith.addf %204, %209 : vector<4x32xf32>
    %211 = vector.extract_strided_slice %203 {offsets = [1, 0, 0], sizes = [1, 4, 8], strides = [1, 1, 1]} : vector<4x4x8xf32> to vector<1x4x8xf32>
    %212 = vector.shape_cast %211 : vector<1x4x8xf32> to vector<4x8xf32>
    %c1_133 = arith.constant 1 : index
    %c0_134 = arith.constant 0 : index
    %c0_135 = arith.constant 0 : index
    %213 = vector.load %arg9[%c1_133, %c0_134, %c0_135] : memref<4x8x32xf32, #tpu.memory_space<vmem>>, vector<1x8x32xf32>
    %214 = vector.shape_cast %213 : vector<1x8x32xf32> to vector<8x32xf32>
    %cst_136 = arith.constant dense<0.000000e+00> : vector<4x32xf32>
    %215 = tpu.matmul %212, %214, %cst_136 {dimension_numbers = #tpu.dot_dimension_numbers<[1], [0], [0], [1], [0, 0, 1, 1], [], []>} : vector<4x8xf32>, vector<8x32xf32>, vector<4x32xf32> -> vector<4x32xf32>
    %216 = arith.addf %210, %215 : vector<4x32xf32>
    %217 = vector.extract_strided_slice %203 {offsets = [2, 0, 0], sizes = [1, 4, 8], strides = [1, 1, 1]} : vector<4x4x8xf32> to vector<1x4x8xf32>
    %218 = vector.shape_cast %217 : vector<1x4x8xf32> to vector<4x8xf32>
    %c2_137 = arith.constant 2 : index
    %c0_138 = arith.constant 0 : index
    %c0_139 = arith.constant 0 : index
    %219 = vector.load %arg9[%c2_137, %c0_138, %c0_139] : memref<4x8x32xf32, #tpu.memory_space<vmem>>, vector<1x8x32xf32>
    %220 = vector.shape_cast %219 : vector<1x8x32xf32> to vector<8x32xf32>
    %cst_140 = arith.constant dense<0.000000e+00> : vector<4x32xf32>
    %221 = tpu.matmul %218, %220, %cst_140 {dimension_numbers = #tpu.dot_dimension_numbers<[1], [0], [0], [1], [0, 0, 1, 1], [], []>} : vector<4x8xf32>, vector<8x32xf32>, vector<4x32xf32> -> vector<4x32xf32>
    %222 = arith.addf %216, %221 : vector<4x32xf32>
    %223 = vector.extract_strided_slice %203 {offsets = [3, 0, 0], sizes = [1, 4, 8], strides = [1, 1, 1]} : vector<4x4x8xf32> to vector<1x4x8xf32>
    %224 = vector.shape_cast %223 : vector<1x4x8xf32> to vector<4x8xf32>
    %c3_141 = arith.constant 3 : index
    %c0_142 = arith.constant 0 : index
    %c0_143 = arith.constant 0 : index
    %225 = vector.load %arg9[%c3_141, %c0_142, %c0_143] : memref<4x8x32xf32, #tpu.memory_space<vmem>>, vector<1x8x32xf32>
    %226 = vector.shape_cast %225 : vector<1x8x32xf32> to vector<8x32xf32>
    %cst_144 = arith.constant dense<0.000000e+00> : vector<4x32xf32>
    %227 = tpu.matmul %224, %226, %cst_144 {dimension_numbers = #tpu.dot_dimension_numbers<[1], [0], [0], [1], [0, 0, 1, 1], [], []>} : vector<4x8xf32>, vector<8x32xf32>, vector<4x32xf32> -> vector<4x32xf32>
    %228 = arith.addf %222, %227 : vector<4x32xf32>
    %c0_145 = arith.constant 0 : index
    %c0_146 = arith.constant 0 : index
    %229 = vector.load %arg10[%c0_145, %c0_146] : memref<1x32xf32, #tpu.memory_space<vmem>>, vector<1x32xf32>
    %230 = vector.broadcast %229 : vector<1x32xf32> to vector<4x32xf32>
    %231 = arith.addf %228, %230 : vector<4x32xf32>
    %232 = vector.extract_strided_slice %6 {offsets = [0, 1, 0], sizes = [4, 1, 32], strides = [1, 1, 1]} : vector<4x2x32xf32> to vector<4x1x32xf32>
    %233 = vector.shape_cast %232 : vector<4x1x32xf32> to vector<4x32xf32>
    %234 = arith.addf %233, %231 : vector<4x32xf32>
    %cst_147 = arith.constant dense<0.000000e+00> : vector<4xf32>
    %235 = vector.multi_reduction <add>, %234, %cst_147 [1] : vector<4x32xf32> to vector<4xf32>
    %236 = vector.shape_cast %235 : vector<4xf32> to vector<4x1xf32>
    %cst_148 = arith.constant 3.200000e+01 : f32
    %237 = vector.broadcast %cst_148 : f32 to vector<4x1xf32>
    %238 = arith.divf %236, %237 : vector<4x1xf32>
    %239 = vector.broadcast %238 : vector<4x1xf32> to vector<4x32xf32>
    %240 = arith.subf %234, %239 : vector<4x32xf32>
    %241 = arith.mulf %240, %240 : vector<4x32xf32>
    %cst_149 = arith.constant dense<0.000000e+00> : vector<4xf32>
    %242 = vector.multi_reduction <add>, %241, %cst_149 [1] : vector<4x32xf32> to vector<4xf32>
    %243 = vector.shape_cast %242 : vector<4xf32> to vector<4x1xf32>
    %cst_150 = arith.constant 3.200000e+01 : f32
    %244 = vector.broadcast %cst_150 : f32 to vector<4x1xf32>
    %245 = arith.divf %243, %244 : vector<4x1xf32>
    %246 = vector.broadcast %238 : vector<4x1xf32> to vector<4x32xf32>
    %247 = arith.subf %234, %246 : vector<4x32xf32>
    %cst_151 = arith.constant 9.99999974E-6 : f32
    %248 = vector.broadcast %cst_151 : f32 to vector<4x1xf32>
    %249 = arith.addf %245, %248 : vector<4x1xf32>
    %250 = math.rsqrt %249 : vector<4x1xf32>
    %251 = vector.broadcast %250 : vector<4x1xf32> to vector<4x32xf32>
    %252 = arith.mulf %247, %251 : vector<4x32xf32>
    %c0_152 = arith.constant 0 : index
    %c0_153 = arith.constant 0 : index
    %253 = vector.load %arg15[%c0_152, %c0_153] : memref<1x32xf32, #tpu.memory_space<vmem>>, vector<1x32xf32>
    %254 = vector.broadcast %253 : vector<1x32xf32> to vector<4x32xf32>
    %255 = arith.mulf %252, %254 : vector<4x32xf32>
    %c0_154 = arith.constant 0 : index
    %c0_155 = arith.constant 0 : index
    %256 = vector.load %arg16[%c0_154, %c0_155] : memref<1x32xf32, #tpu.memory_space<vmem>>, vector<1x32xf32>
    %257 = vector.broadcast %256 : vector<1x32xf32> to vector<4x32xf32>
    %258 = arith.addf %255, %257 : vector<4x32xf32>
    %c0_156 = arith.constant 0 : index
    %c0_157 = arith.constant 0 : index
    %259 = vector.load %arg11[%c0_156, %c0_157] : memref<32x64xf32, #tpu.memory_space<vmem>>, vector<32x64xf32>
    %cst_158 = arith.constant dense<0.000000e+00> : vector<4x64xf32>
    %260 = tpu.matmul %258, %259, %cst_158 {dimension_numbers = #tpu.dot_dimension_numbers<[1], [0], [0], [1], [0, 0, 1, 1], [], []>} : vector<4x32xf32>, vector<32x64xf32>, vector<4x64xf32> -> vector<4x64xf32>
    %c0_159 = arith.constant 0 : index
    %c0_160 = arith.constant 0 : index
    %261 = vector.load %arg12[%c0_159, %c0_160] : memref<1x64xf32, #tpu.memory_space<vmem>>, vector<1x64xf32>
    %262 = vector.broadcast %261 : vector<1x64xf32> to vector<4x64xf32>
    %263 = arith.addf %260, %262 : vector<4x64xf32>
    %cst_161 = arith.constant 0.000000e+00 : f32
    %264 = vector.broadcast %cst_161 : f32 to vector<4x64xf32>
    %265 = arith.maximumf %263, %264 : vector<4x64xf32>
    %c0_162 = arith.constant 0 : index
    %c0_163 = arith.constant 0 : index
    %266 = vector.load %arg13[%c0_162, %c0_163] : memref<64x32xf32, #tpu.memory_space<vmem>>, vector<64x32xf32>
    %cst_164 = arith.constant dense<0.000000e+00> : vector<4x32xf32>
    %267 = tpu.matmul %265, %266, %cst_164 {dimension_numbers = #tpu.dot_dimension_numbers<[1], [0], [0], [1], [0, 0, 1, 1], [], []>} : vector<4x64xf32>, vector<64x32xf32>, vector<4x32xf32> -> vector<4x32xf32>
    %c0_165 = arith.constant 0 : index
    %c0_166 = arith.constant 0 : index
    %268 = vector.load %arg14[%c0_165, %c0_166] : memref<1x32xf32, #tpu.memory_space<vmem>>, vector<1x32xf32>
    %269 = vector.broadcast %268 : vector<1x32xf32> to vector<4x32xf32>
    %270 = arith.addf %267, %269 : vector<4x32xf32>
    %271 = arith.addf %258, %270 : vector<4x32xf32>
    %cst_167 = arith.constant dense<0.000000e+00> : vector<4xf32>
    %272 = vector.multi_reduction <add>, %271, %cst_167 [1] : vector<4x32xf32> to vector<4xf32>
    %273 = vector.shape_cast %272 : vector<4xf32> to vector<4x1xf32>
    %cst_168 = arith.constant 3.200000e+01 : f32
    %274 = vector.broadcast %cst_168 : f32 to vector<4x1xf32>
    %275 = arith.divf %273, %274 : vector<4x1xf32>
    %276 = vector.broadcast %275 : vector<4x1xf32> to vector<4x32xf32>
    %277 = arith.subf %271, %276 : vector<4x32xf32>
    %278 = arith.mulf %277, %277 : vector<4x32xf32>
    %cst_169 = arith.constant dense<0.000000e+00> : vector<4xf32>
    %279 = vector.multi_reduction <add>, %278, %cst_169 [1] : vector<4x32xf32> to vector<4xf32>
    %280 = vector.shape_cast %279 : vector<4xf32> to vector<4x1xf32>
    %cst_170 = arith.constant 3.200000e+01 : f32
    %281 = vector.broadcast %cst_170 : f32 to vector<4x1xf32>
    %282 = arith.divf %280, %281 : vector<4x1xf32>
    %283 = vector.broadcast %275 : vector<4x1xf32> to vector<4x32xf32>
    %284 = arith.subf %271, %283 : vector<4x32xf32>
    %cst_171 = arith.constant 9.99999974E-6 : f32
    %285 = vector.broadcast %cst_171 : f32 to vector<4x1xf32>
    %286 = arith.addf %282, %285 : vector<4x1xf32>
    %287 = math.rsqrt %286 : vector<4x1xf32>
    %288 = vector.broadcast %287 : vector<4x1xf32> to vector<4x32xf32>
    %289 = arith.mulf %284, %288 : vector<4x32xf32>
    %c0_172 = arith.constant 0 : index
    %c0_173 = arith.constant 0 : index
    %290 = vector.load %arg17[%c0_172, %c0_173] : memref<1x32xf32, #tpu.memory_space<vmem>>, vector<1x32xf32>
    %291 = vector.broadcast %290 : vector<1x32xf32> to vector<4x32xf32>
    %292 = arith.mulf %289, %291 : vector<4x32xf32>
    %c0_174 = arith.constant 0 : index
    %c0_175 = arith.constant 0 : index
    %293 = vector.load %arg18[%c0_174, %c0_175] : memref<1x32xf32, #tpu.memory_space<vmem>>, vector<1x32xf32>
    %294 = vector.broadcast %293 : vector<1x32xf32> to vector<4x32xf32>
    %295 = arith.addf %292, %294 : vector<4x32xf32>
    %296 = vector.shape_cast %152 : vector<4x32xf32> to vector<4x1x32xf32>
    %297 = vector.shape_cast %295 : vector<4x32xf32> to vector<4x1x32xf32>
    %298 = tpu.concatenate %296, %297 in 1 : vector<4x1x32xf32>, vector<4x1x32xf32> -> vector<4x2x32xf32>
    %c0_176 = arith.constant 0 : index
    %c0_177 = arith.constant 0 : index
    %c0_178 = arith.constant 0 : index
    %299 = vector.load %arg19[%c0_176, %c0_177, %c0_178] : memref<4x2x32xf32, #tpu.memory_space<vmem>>, vector<4x2x32xf32>
    tpu.vector_store %arg19[%c0_176, %c0_177, %c0_178], %298 {strides = array<i32>} : memref<4x2x32xf32, #tpu.memory_space<vmem>>, vector<4x2x32xf32>,
    return
  }
  func.func @transform_0(%arg0: i32) -> (i32, i32, i32) {
    %c0_i32 = arith.constant 0 : i32
    %c0_i32_0 = arith.constant 0 : i32
    %c0_i32_1 = arith.constant 0 : i32
    %c0_i32_2 = arith.constant 0 : i32
    return %c0_i32, %c0_i32_0, %c0_i32_1 : i32, i32, i32
  }
  func.func @transform_1(%arg0: i32) -> (i32, i32, i32) {
    %c0_i32 = arith.constant 0 : i32
    %c0_i32_0 = arith.constant 0 : i32
    %c0_i32_1 = arith.constant 0 : i32
    %c0_i32_2 = arith.constant 0 : i32
    return %c0_i32, %c0_i32_0, %c0_i32_1 : i32, i32, i32
  }
  func.func @transform_2(%arg0: i32) -> (i32, i32, i32) {
    %c0_i32 = arith.constant 0 : i32
    %c0_i32_0 = arith.constant 0 : i32
    %c0_i32_1 = arith.constant 0 : i32
    %c0_i32_2 = arith.constant 0 : i32
    return %c0_i32, %c0_i32_0, %c0_i32_1 : i32, i32, i32
  }
  func.func @transform_3(%arg0: i32) -> (i32, i32, i32) {
    %c0_i32 = arith.constant 0 : i32
    %c0_i32_0 = arith.constant 0 : i32
    %c0_i32_1 = arith.constant 0 : i32
    %c0_i32_2 = arith.constant 0 : i32
    return %c0_i32, %c0_i32_0, %c0_i32_1 : i32, i32, i32
  }
  func.func @transform_4(%arg0: i32) -> (i32, i32, i32) {
    %c0_i32 = arith.constant 0 : i32
    %c0_i32_0 = arith.constant 0 : i32
    %c0_i32_1 = arith.constant 0 : i32
    %c0_i32_2 = arith.constant 0 : i32
    return %c0_i32, %c0_i32_0, %c0_i32_1 : i32, i32, i32
  }
  func.func @transform_5(%arg0: i32) -> (i32, i32, i32) {
    %c0_i32 = arith.constant 0 : i32
    %c0_i32_0 = arith.constant 0 : i32
    %c0_i32_1 = arith.constant 0 : i32
    %c0_i32_2 = arith.constant 0 : i32
    return %c0_i32, %c0_i32_0, %c0_i32_1 : i32, i32, i32
  }
  func.func @transform_6(%arg0: i32) -> (i32, i32, i32) {
    %c0_i32 = arith.constant 0 : i32
    %c0_i32_0 = arith.constant 0 : i32
    %c0_i32_1 = arith.constant 0 : i32
    %c0_i32_2 = arith.constant 0 : i32
    return %c0_i32, %c0_i32_0, %c0_i32_1 : i32, i32, i32
  }
  func.func @transform_7(%arg0: i32) -> (i32, i32, i32) {
    %c0_i32 = arith.constant 0 : i32
    %c0_i32_0 = arith.constant 0 : i32
    %c0_i32_1 = arith.constant 0 : i32
    %c0_i32_2 = arith.constant 0 : i32
    return %c0_i32, %c0_i32_0, %c0_i32_1 : i32, i32, i32
  }
  func.func @transform_8(%arg0: i32) -> (i32, i32, i32) {
    %c0_i32 = arith.constant 0 : i32
    %c0_i32_0 = arith.constant 0 : i32
    %c0_i32_1 = arith.constant 0 : i32
    %c0_i32_2 = arith.constant 0 : i32
    return %c0_i32, %c0_i32_0, %c0_i32_1 : i32, i32, i32
  }
  func.func @transform_9(%arg0: i32) -> (i32, i32) {
    %c0_i32 = arith.constant 0 : i32
    %c0_i32_0 = arith.constant 0 : i32
    %c0_i32_1 = arith.constant 0 : i32
    return %c0_i32, %c0_i32_0 : i32, i32
  }
  func.func @transform_10(%arg0: i32) -> (i32, i32) {
    %c0_i32 = arith.constant 0 : i32
    %c0_i32_0 = arith.constant 0 : i32
    %c0_i32_1 = arith.constant 0 : i32
    return %c0_i32, %c0_i32_0 : i32, i32
  }
  func.func @transform_11(%arg0: i32) -> (i32, i32) {
    %c0_i32 = arith.constant 0 : i32
    %c0_i32_0 = arith.constant 0 : i32
    %c0_i32_1 = arith.constant 0 : i32
    return %c0_i32, %c0_i32_0 : i32, i32
  }
  func.func @transform_12(%arg0: i32) -> (i32, i32) {
    %c0_i32 = arith.constant 0 : i32
    %c0_i32_0 = arith.constant 0 : i32
    %c0_i32_1 = arith.constant 0 : i32
    return %c0_i32, %c0_i32_0 : i32, i32
  }
  func.func @transform_13(%arg0: i32) -> (i32, i32) {
    %c0_i32 = arith.constant 0 : i32
    %c0_i32_0 = arith.constant 0 : i32
    %c0_i32_1 = arith.constant 0 : i32
    return %c0_i32, %c0_i32_0 : i32, i32
  }
  func.func @transform_14(%arg0: i32) -> (i32, i32) {
    %c0_i32 = arith.constant 0 : i32
    %c0_i32_0 = arith.constant 0 : i32
    %c0_i32_1 = arith.constant 0 : i32
    return %c0_i32, %c0_i32_0 : i32, i32
  }
  func.func @transform_15(%arg0: i32) -> (i32, i32) {
    %c0_i32 = arith.constant 0 : i32
    %c0_i32_0 = arith.constant 0 : i32
    %c0_i32_1 = arith.constant 0 : i32
    return %c0_i32, %c0_i32_0 : i32, i32
  }
  func.func @transform_16(%arg0: i32) -> (i32, i32) {
    %c0_i32 = arith.constant 0 : i32
    %c0_i32_0 = arith.constant 0 : i32
    %c0_i32_1 = arith.constant 0 : i32
    return %c0_i32, %c0_i32_0 : i32, i32
  }
  func.func @transform_17(%arg0: i32) -> (i32, i32) {
    %c0_i32 = arith.constant 0 : i32
    %c0_i32_0 = arith.constant 0 : i32
    %c0_i32_1 = arith.constant 0 : i32
    return %c0_i32, %c0_i32_0 : i32, i32
  }
  func.func @transform_18(%arg0: i32) -> (i32, i32, i32) {
    %c0_i32 = arith.constant 0 : i32
    %c0_i32_0 = arith.constant 0 : i32
    %c0_i32_1 = arith.constant 0 : i32
    return %arg0, %c0_i32, %c0_i32_0 : i32, i32, i32
  }
}

</mosaic_0001>

<bundles_post_ra>
// kernel: tpu_custom_call.1
= control target key start
LH: loop header
LB: loop body
LE: loop exit
PB: predicated region body
PF: predicated region fallthrough
CT: control target
= control target key end

     0   :  { %s7857_s0 = inlined_call_operand.vmem [shape: f32[8,2,32], index: 0, kind: input, shape index: {}]   ;;  %s7858_s1 = inlined_call_operand.vmem [shape: f32[8,2,32], index: 1, kind: input, shape index: {}]   ;;  %s7859_s2 = inlined_call_operand.vmem [shape: f32[4,32,8], index: 2, kind: input, shape index: {}]   ;;  %s7860_s3 = inlined_call_operand.vmem [shape: f32[4,32,8], index: 3, kind: input, shape index: {}]   ;;  %s7861_s4 = inlined_call_operand.vmem [shape: f32[4,32,8], index: 4, kind: input, shape index: {}]   ;;  %s7862_s5 = inlined_call_operand.vmem [shape: f32[4,1,8], index: 5, kind: input, shape index: {}]   ;;  %s7863_s6 = inlined_call_operand.vmem [shape: f32[4,1,8], index: 6, kind: input, shape index: {}]   ;;  %s7864_s7 = inlined_call_operand.vmem [shape: f32[4,1,8], index: 7, kind: input, shape index: {}]   ;;  %s7865_s8 = inlined_call_operand.vmem [shape: f32[4,8,32], index: 8, kind: input, shape index: {}]   ;;  %s7866_s9 = inlined_call_operand.vmem [shape: f32[1,32], index: 9, kind: input, shape index: {}]   ;;  %s7867_s10 = inlined_call_operand.vmem [shape: f32[32,64], index: 10, kind: input, shape index: {}]   ;;  %s7868_s11 = inlined_call_operand.vmem [shape: f32[1,64], index: 11, kind: input, shape index: {}]   ;;  %s7869_s12 = inlined_call_operand.vmem [shape: f32[64,32], index: 12, kind: input, shape index: {}]   ;;  %s7870_s13 = inlined_call_operand.vmem [shape: f32[1,32], index: 13, kind: input, shape index: {}]   ;;  %s7871_s14 = inlined_call_operand.vmem [shape: f32[1,32], index: 14, kind: input, shape index: {}]   ;;  %s7872_s15 = inlined_call_operand.vmem [shape: f32[1,32], index: 15, kind: input, shape index: {}]   ;;  %s7873_s16 = inlined_call_operand.vmem [shape: f32[1,32], index: 16, kind: input, shape index: {}]   ;;  %s7874_s17 = inlined_call_operand.vmem [shape: f32[1,32], index: 17, kind: input, shape index: {}]   ;;  %s7875_s18 = inlined_call_operand.hbm [shape: f32[8,2,32], index: 18, kind: output, shape index: {}]  }
   0x1   :  { %7884 = sst [smem:[#allocation11_spill]] %s7857_s0 }
   0x2   :  { %7885 = sst [smem:[#allocation12_spill]] %s7858_s1 }
   0x3   :  { %7886 = sst [smem:[#allocation13_spill]] %s7859_s2 }
   0x4   :  { %7887 = sst [smem:[#allocation14_spill]] %s7860_s3 }
   0x5   :  { %7888 = sst [smem:[#allocation15_spill]] %s7861_s4 }
   0x6   :  { %7889 = sst [smem:[#allocation16_spill]] %s7863_s6 }
   0x7   :  { %7890 = sst [smem:[#allocation17_spill]] %s7864_s7 }
   0x8   :  { %23 = vsyncpa [#allocation5], 0 }
   0x9   :  { %25 = vsyncpa [#allocation5 + $0x1], 0  ;;  %s6543_s27 = smov 0   ;;  %s6545_s28 = smov 0  }
   0xa   :  { %s6547_s29 = smov 0   ;;  %s6549_s30 = smov 0  }
   0xb LB: > { %7891 = sst [smem:[#allocation7_spill]] %s6435_s29  ;;  %s6564_s0 = sadd.s32 4294967295, %s6439_s30   ;;  %s6439_s30 = sphi %s6549_s30, %s7908_s30   ;;  %s6435_s29 = sphi %s6547_s29, %s7910_s29   ;;  %s6431_s28 = sphi %s6545_s28, %s7912_s28   ;;  %s6427_s27 = sphi %s6543_s27, %s7911_s27  }
   0xc   : > { %s5442_s19 = sadd.s32 4294967294, %s6439_s30   ;;  %s6568_s1 = sadd.s32 1, %s6439_s30  }
   0xd   : > { %7892 = sst [smem:[#allocation8_spill]] %s6568_s1  ;;  %s416_s20 = sadd.s32 1, %s6435_s29 }
   0xe   : > { %s413_s21 = ssub.s32 %s6439_s30, %s6568_s1  ;;  %p426_p0 = scmp.ne.s32.totalorder %s6435_s29, %s6431_s28 }
   0xf   : > { %p414_p1 = scmp.eq.s32.totalorder %s413_s21, 0  ;;  %p427_p2 = scmp.eq.s32.totalorder %s6564_s0, 1 }
  0x10   : > { %p432_p3 = scmp.ne.s32.totalorder %s6431_s28, %s6427_s27  ;;  %p433_p4 = scmp.eq.s32.totalorder %s5442_s19, 1 }
  0x11   : > { %s6579_s22 = scalar_select %p414_p1, %s6435_s29, %s416_s20  }
  0x12   : > { %p6581_p5 = por %p427_p2, %p426_p0  ;;  %p6585_p6 = por %p433_p4, %p432_p3 }
  0x13   : > { %7893 = sst [smem:[#allocation9_spill]] %s6579_s22  ;;  %p5444_p7 = scmp.ge.s32.totalorder %s6439_s30, 1 }
  0x14   : > { %s7895_s23 = scalar_select %p6585_p6, 1, 0 }
  0x15   : > { %p505_p8 = scmp.lt.s32.totalorder %s6439_s30, 3 }
  0x16   : > { %7896 = sst [smem:[#allocation10_spill]] %s7895_s23 }
  0x17   : > { %p506_p9 = pnand %p5444_p7, %p505_p8 }
  0x18   : > { %s7882_s24 = sand.u32 (!%p506_p9), 1, %s6431_s28   ;;  %p5446_p10 = scmp.ne.s32.totalorder (!%p506_p9), %s6564_s0, 0 }
  0x19   : > { %509 = sbr.rel (%p506_p9) target bundleno = 4126 (0x101e), region = 92  ;;  %s5445_s25 = sshll.u32 (!%p506_p9), %s7882_s24, 3 }
  0x1a   : > { %s6594_s26 = scalar_lea.vmem (!%p506_p9), [#allocation4], %s5445_s25 }
  0x1e   : > { %558 = sbr.rel (%p5446_p10) target bundleno = 317 (0x13d), region = 96  ;;  %s7897_s4 = sld [smem:[#allocation15_spill]] (!%p5446_p10) }
  0x1f   : > { %s7898_s3 = sld [smem:[#allocation14_spill]] (!%p5446_p10) }
  0x20   : > { %s7899_s24 = sld [smem:[#allocation11_spill]] (!%p5446_p10) }
  0x21   : > { %s7900_s22 = sld [smem:[#allocation12_spill]] (!%p5446_p10) }
  0x22   : > { %s7901_s7 = sld [smem:[#allocation17_spill]] (!%p5446_p10) }
  0x23   : > { %v6441_v3 = vmov 0.0   ;;  %vm603_vm0 = vcmask 1041409   ;;  %vm606_vm1 = vcmask 1042434   ;;  %vm609_vm2 = vcmask 1043459   ;;  %s7902_s6 = sld [smem:[#allocation16_spill]] }
  0x24   : > { %v6600_v0 = vld [vmem:[%s7897_s4 + $0x18] sm:$0xff]  ;;  %v6610_v2 = vld [vmem:[%s7897_s4 + $0x10] sm:$0xff]  ;;  %5857 = vmatprep.subr.mxu1 %v6441_v3  ;;  %5846 = vmatprep.subr.mxu0 %v6441_v3  ;;  %v6622_v5 = vld [vmem:[%s7897_s4 + $0x8] sm:$0xff]  ;;  %vm612_vm3 = vcmask 1044484   ;;  %vm615_vm4 = vcmask 1045509   ;;  %vm618_vm5 = vcmask 1046534  }
  0x25   : > { %v6605_v1 = vld [vmem:[%s7898_s3 + $0x18] sm:$0xff]  ;;  %v6617_v4 = vld [vmem:[%s7898_s3 + $0x10] sm:$0xff]  ;;  %v6627_v6 = vld [vmem:[%s7898_s3 + $0x8] sm:$0xff]  ;;  %5858 = vmatpush3.msra.mxu1 %v6600_v0  ;;  %vm621_vm6 = vcmask 1047559   ;;  %vm623_vm7 = vcmask 261120   ;;  %vm6442_vm8 = vmmov 0  }
  0x26   : > { %5847 = vmatpush3.msra.mxu0 %v6605_v1  ;;  %v6634_v7 = vld [vmem:[%s7899_s24] sm:$0x3]  ;;  %5859 = vmatprep.subr.mxu1 %v6441_v3  ;;  %v6646_v9 = vld [vmem:[%s7899_s24 + $0x2] sm:$0x3]  ;;  %v6651_v10 = vld [vmem:[%s7899_s24 + $0x4] sm:$0x3] }
  0x27   : > { %5848 = vmatprep.subr.mxu0 %v6441_v3  ;;  %v6641_v8 = vld [vmem:[%s7897_s4] sm:$0xff]  ;;  %5860 = vmatpush3.msra.mxu1 %v6610_v2  ;;  %v6663_v12 = vld [vmem:[%s7899_s24 + $0x8] sm:$0x3]  ;;  %v6668_v13 = vld [vmem:[%s7899_s24 + $0xa] sm:$0x3]  ;;  %v717_v16 = vrot.slane %v6646_v9, 7 }
  0x28   : > { %v6656_v11 = vld [vmem:[%s7899_s24 + $0x6] sm:$0x3]  ;;  %5849 = vmatpush3.msra.mxu0 %v6617_v4  ;;  %v6673_v14 = vld [vmem:[%s7899_s24 + $0xc] sm:$0x3]  ;;  %5861 = vmatprep.subr.mxu1 %v6441_v3  ;;  %v6680_v15 = vld [vmem:[%s7899_s24 + $0xe] sm:$0x3] }
  0x29   : > { %5850 = vmatprep.subr.mxu0 %v6441_v3  ;;  %v719_v17 = vrot.slane %v6651_v10, 6  ;;  %5862 = vmatpush3.msra.mxu1 %v6622_v5  ;;  %v6689_v18 = vld [vmem:[%s7898_s3] sm:$0xff]  ;;  %v721_v19 = vrot.slane %v6656_v11, 5  ;;  %v723_v20 = vrot.slane %v6663_v12, 4  ;;  %v725_v21 = vrot.slane %v6668_v13, 3  ;;  %v6766_v48 = vld [vmem:[%s7897_s4 + $0x38] sm:$0xff] }
  0x2a   : > { %5851 = vmatpush3.msra.mxu0 %v6627_v6  ;;  %5863 = vmatprep.subr.mxu1 %v6441_v3  ;;  %v718_v22 = vsel %vm603_vm0, %v717_v16, %v6634_v7  ;;  %v727_v23 = vrot.slane %v6673_v14, 2  ;;  %v729_v24 = vrot.slane %v6680_v15, 1  ;;  %v567_v25 = vld [vmem:[%s7900_s22] sm:$0x3]  ;;  %v568_v26 = vld [vmem:[%s7900_s22 + $0x2] sm:$0x3] }
  0x2b   : > { %5852 = vmatprep.subr.mxu0 %v6441_v3  ;;  %5864 = vmatpush3.msra.mxu1 %v6641_v8  ;;  %v720_v27 = vsel %vm606_vm1, %v719_v17, %v718_v22  ;;  %v569_v28 = vld [vmem:[%s7900_s22 + $0x4] sm:$0x3]  ;;  %v570_v29 = vld [vmem:[%s7900_s22 + $0x6] sm:$0x3]  ;;  %v571_v30 = vld [vmem:[%s7900_s22 + $0x8] sm:$0x3]  ;;  %v6720_v31 = vadd.f32 %v567_v25, %v6634_v7  ;;  %v6723_v32 = vadd.f32 %v568_v26, %v6646_v9 }
  0x2c   : > { %5865 = vmatprep.mubr.msk.f32.mxu1 %vm6442_vm8, %v6441_v3  ;;  %5879 = vmatprep.subr.mxu1 %v6441_v3  ;;  %v722_v33 = vsel %vm609_vm2, %v721_v19, %v720_v27  ;;  %v572_v34 = vld [vmem:[%s7900_s22 + $0xa] sm:$0x3]  ;;  %v573_v35 = vld [vmem:[%s7900_s22 + $0xc] sm:$0x3]  ;;  %v574_v36 = vld [vmem:[%s7900_s22 + $0xe] sm:$0x3]  ;;  %v6738_v37 = vadd.f32 %v569_v28, %v6651_v10  ;;  %v6741_v38 = vadd.f32 %v570_v29, %v6656_v11 }
  0x2d   : > { %5853 = vmatpush3.msra.mxu0 %v6689_v18  ;;  %v724_v39 = vsel %vm612_vm3, %v723_v20, %v722_v33  ;;  %5854 = vmatprep.mubr.msk.f32.mxu0 %vm6442_vm8, %v6441_v3  ;;  %v6748_v40 = vadd.f32 %v571_v30, %v6663_v12  ;;  %v6751_v41 = vadd.f32 %v572_v34, %v6668_v13  ;;  %v602_v42 = vrot.slane %v6723_v32, 7  ;;  %v6785_v58 = vld [vmem:[%s7897_s4 + $0x30] sm:$0xff]  ;;  %v6796_v61 = vld [vmem:[%s7897_s4 + $0x28] sm:$0xff]  ;;  %v6802_v63 = vld [vmem:[%s7898_s3 + $0x38] sm:$0xff] }
  0x2e   : > { %5868 = vmatprep.subr.mxu0 %v6441_v3  ;;  %v726_v43 = vsel %vm615_vm4, %v725_v21, %v724_v39  ;;  %v6756_v44 = vadd.f32 %v573_v35, %v6673_v14  ;;  %v6759_v45 = vadd.f32 %v574_v36, %v6680_v15  ;;  %v605_v46 = vrot.slane %v6738_v37, 6  ;;  %v6812_v17 = vld [vmem:[%s7897_s4 + $0x20] sm:$0xff]  ;;  %v6819_v19 = vld [vmem:[%s7898_s3 + $0x30] sm:$0xff]  ;;  %v6828_v20 = vld [vmem:[%s7898_s3 + $0x28] sm:$0xff] }
  0x2f   : > { %v728_v47 = vsel %vm618_vm5, %v727_v23, %v726_v43  ;;  %v604_v49 = vsel %vm603_vm0, %v602_v42, %v6720_v31  ;;  %v608_v50 = vrot.slane %v6741_v38, 5  ;;  %v611_v51 = vrot.slane %v6748_v40, 4  ;;  %v6836_v21 = vld [vmem:[%s7897_s4 + $0x58] sm:$0xff]  ;;  %v6842_v22 = vld [vmem:[%s7898_s3 + $0x20] sm:$0xff]  ;;  %v6869_v25 = vld [vmem:[%s7898_s3 + $0x50] sm:$0xff] }
  0x30   : > { %v6773_v52 = vsel %vm621_vm6, %v729_v24, %v728_v47  ;;  %v607_v53 = vsel %vm606_vm1, %v605_v46, %v604_v49  ;;  %v614_v54 = vrot.slane %v6751_v41, 3  ;;  %v617_v55 = vrot.slane %v6756_v44, 2  ;;  %v6854_v23 = vld [vmem:[%s7898_s3 + $0x58] sm:$0xff]  ;;  %v6859_v24 = vld [vmem:[%s7897_s4 + $0x50] sm:$0xff]  ;;  %v6874_v26 = vld [vmem:[%s7897_s4 + $0x48] sm:$0xff] }
  0x31   : > { %5866 = vmatmul.mubr.msk.f32.vlgmr.msra.gmra.mxu1 %vm623_vm7, %v6773_v52  ;;  %v610_v56 = vsel %vm609_vm2, %v608_v50, %v607_v53  ;;  %v620_v57 = vrot.slane %v6759_v45, 1  ;;  %v6883_v27 = vld [vmem:[%s7898_s3 + $0x48] sm:$0xff]  ;;  %v6888_v28 = vld [vmem:[%s7897_s4 + $0x40] sm:$0xff]  ;;  %v1424_v29 = vrot.slane %v6634_v7, 1  ;;  %v1325_v30 = vrot.slane %v6720_v31, 1  ;;  %v6909_v7 = vld [vmem:[%s7897_s4 + $0x78] sm:$0xff] }
  0x32   : > { %5880 = vmatpush3.msra.mxu1 %v6766_v48  ;;  %v613_v59 = vsel %vm612_vm3, %v611_v51, %v610_v56  ;;  %5887 = vmatprep.mubr.msk.f32.mxu1 %vm6442_vm8, %v6441_v3  ;;  %v6899_v33 = vld [vmem:[%s7898_s3 + $0x40] sm:$0xff]  ;;  %v1426_v31 = vrot.slane %v6651_v10, 7  ;;  %v1327_v35 = vrot.slane %v6738_v37, 7  ;;  %v6924_v36 = vld [vmem:[%s7898_s3 + $0x78] sm:$0xff]  ;;  %v6929_v10 = vld [vmem:[%s7897_s4 + $0x70] sm:$0xff]  ;;  %v1428_v37 = vrot.slane %v6656_v11, 6 }
  0x33   : > { %5881 = vmatprep.subr.mxu1 %v6441_v3  ;;  %v616_v60 = vsel %vm615_vm4, %v614_v54, %v613_v59  ;;  %v1425_v34 = vsel %vm603_vm0, %v6646_v9, %v1424_v29  ;;  %v1326_v9 = vsel %vm603_vm0, %v6723_v32, %v1325_v30  ;;  %v6942_v39 = vld [vmem:[%s7898_s3 + $0x70] sm:$0xff]  ;;  %v6947_v32 = vld [vmem:[%s7897_s4 + $0x68] sm:$0xff]  ;;  %v1329_v43 = vrot.slane %v6741_v38, 6  ;;  %v6964_v47 = vld [vmem:[%s7897_s4 + $0x60] sm:$0xff] }
  0x34   : > { %v619_v62 = vsel %vm618_vm5, %v617_v55, %v616_v60  ;;  %5882 = vmatpush3.msra.mxu1 %v6785_v58  ;;  %v1427_v42 = vsel %vm606_vm1, %v1426_v31, %v1425_v34  ;;  %v1328_v11 = vsel %vm606_vm1, %v1327_v35, %v1326_v9  ;;  %v6959_v46 = vld [vmem:[%s7898_s3 + $0x68] sm:$0xff]  ;;  %v1430_v38 = vrot.slane %v6663_v12, 5  ;;  %v6976_v51 = vld [vmem:[%s7898_s3 + $0x60] sm:$0xff] }
  0x35   : > { %v6806_v16 = vsel %vm621_vm6, %v620_v57, %v619_v62  ;;  %5883 = vmatprep.subr.mxu1 %v6441_v3  ;;  %v1429_v49 = vsel %vm609_vm2, %v1428_v37, %v1427_v42  ;;  %v1331_v50 = vrot.slane %v6748_v40, 5  ;;  %v1330_v53 = vsel %vm609_vm2, %v1329_v43, %v1328_v11  ;;  %v5456_v60 = vld [vmem:[%s7902_s6 + $0x1] ss:$0 sm:$0xff] }
  0x36   : > { %5855 = vmatmul.mubr.msk.f32.vlgmr.msra.gmra.mxu0 %vm623_vm7, %v6806_v16  ;;  %5884 = vmatpush3.msra.mxu1 %v6796_v61  ;;  %v1432_v12 = vrot.slane %v6668_v13, 4  ;;  %v1431_v40 = vsel %vm612_vm3, %v1430_v38, %v1429_v49  ;;  %v1333_v54 = vrot.slane %v6751_v41, 4  ;;  %v1434_v13 = vrot.slane %v6673_v14, 3 }
  0x37   : > { %5869 = vmatpush3.msra.mxu0 %v6802_v63  ;;  %5885 = vmatprep.subr.mxu1 %v6441_v3  ;;  %v1332_v55 = vsel %vm612_vm3, %v1331_v50, %v1330_v53  ;;  %v1335_v56 = vrot.slane %v6756_v44, 3  ;;  %v1436_v14 = vrot.slane %v6680_v15, 2  ;;  %v1337_v44 = vrot.slane %v6759_v45, 2  ;;  %v5447_v15 = vld [vmem:[%s7902_s6] ss:$0 sm:$0xff] }
  0x38   : > { %5870 = vmatprep.subr.mxu0 %v6441_v3  ;;  %5886 = vmatpush3.msra.mxu1 %v6812_v17  ;;  %v1433_v41 = vsel %vm615_vm4, %v1432_v12, %v1431_v40  ;;  %v1334_v57 = vsel %vm615_vm4, %v1333_v54, %v1332_v55  ;;  %vm696_vm9 = vcmask 64512  }
  0x39   : > { %5871 = vmatpush3.msra.mxu0 %v6819_v19  ;;  %5901 = vmatprep.subr.mxu1 %v6441_v3 }
  0x3a   : > { %5872 = vmatprep.subr.mxu0 %v6441_v3  ;;  %5876 = vmatprep.mubr.msk.f32.mxu0 %vm6442_vm8, %v6441_v3 }
  0x3b   : > { %5873 = vmatpush3.msra.mxu0 %v6828_v20  ;;  %5888 = vmatmul.mubr.msk.f32.vlgmr.msra.gmra.mxu1 %vm623_vm7, %v6773_v52 }
  0x3c   : > { %5874 = vmatprep.subr.mxu0 %v6441_v3  ;;  %5902 = vmatpush3.msra.mxu1 %v6836_v21 }
  0x3d   : > { %5875 = vmatpush3.msra.mxu0 %v6842_v22  ;;  %5903 = vmatprep.subr.mxu1 %v6441_v3 }
  0x3e   : > { %5877 = vmatmul.mubr.msk.f32.vlgmr.msra.gmra.mxu0 %vm623_vm7, %v6806_v16  ;;  %5890 = vmatprep.subr.mxu0 %v6441_v3 }
  0x3f   : > { %5891 = vmatpush3.msra.mxu0 %v6854_v23  ;;  %5904 = vmatpush3.msra.mxu1 %v6859_v24 }
  0x40   : > { %5892 = vmatprep.subr.mxu0 %v6441_v3  ;;  %5905 = vmatprep.subr.mxu1 %v6441_v3 }
  0x41   : > { %5893 = vmatpush3.msra.mxu0 %v6869_v25  ;;  %5906 = vmatpush3.msra.mxu1 %v6874_v26 }
  0x42   : > { %5894 = vmatprep.subr.mxu0 %v6441_v3  ;;  %5907 = vmatprep.subr.mxu1 %v6441_v3 }
  0x43   : > { %5895 = vmatpush3.msra.mxu0 %v6883_v27  ;;  %5908 = vmatpush3.msra.mxu1 %v6888_v28 }
  0x44   : > { %5896 = vmatprep.subr.mxu0 %v6441_v3  ;;  %5909 = vmatprep.mubr.msk.f32.mxu1 %vm6442_vm8, %v6441_v3 }
  0x45   : > { %5923 = vmatprep.subr.mxu1 %v6441_v3  ;;  %5897 = vmatpush3.msra.mxu0 %v6899_v33 }
  0x46   : > { %5898 = vmatprep.mubr.msk.f32.mxu0 %vm6442_vm8, %v6441_v3  ;;  %5910 = vmatmul.mubr.msk.f32.vlgmr.msra.gmra.mxu1 %vm623_vm7, %v6773_v52 }
  0x47   : > { %5924 = vmatpush3.msra.mxu1 %v6909_v7  ;;  %5899 = vmatmul.mubr.msk.f32.vlgmr.msra.gmra.mxu0 %vm623_vm7, %v6806_v16 }
  0x48   : > { %5912 = vmatprep.subr.mxu0 %v6441_v3  ;;  %5925 = vmatprep.subr.mxu1 %v6441_v3 }
  0x49   : > { %5913 = vmatpush3.msra.mxu0 %v6924_v36  ;;  %5926 = vmatpush3.msra.mxu1 %v6929_v10 }
  0x4a   : > { %5914 = vmatprep.subr.mxu0 %v6441_v3  ;;  %5927 = vmatprep.subr.mxu1 %v6441_v3 }
  0x4b   : > { %5915 = vmatpush3.msra.mxu0 %v6942_v39  ;;  %5928 = vmatpush3.msra.mxu1 %v6947_v32 }
  0x4c   : > { %5916 = vmatprep.subr.mxu0 %v6441_v3  ;;  %5929 = vmatprep.subr.mxu1 %v6441_v3 }
  0x4d   : > { %5917 = vmatpush3.msra.mxu0 %v6959_v46  ;;  %5930 = vmatpush3.msra.mxu1 %v6964_v47 }
  0x4e   : > { %5918 = vmatprep.subr.mxu0 %v6441_v3  ;;  %5931 = vmatprep.mubr.msk.f32.mxu1 %vm6442_vm8, %v6441_v3 }
  0x4f   : > { %5945 = vmatprep.subr.mxu1 %v6441_v3  ;;  %5919 = vmatpush3.msra.mxu0 %v6976_v51 }
  0x50   : > { %5920 = vmatprep.mubr.msk.f32.mxu0 %vm6442_vm8, %v6441_v3  ;;  %5932 = vmatmul.mubr.msk.f32.vlgmr.msra.gmra.mxu1 %vm623_vm7, %v6773_v52  ;;  %v1336_v52 = vsel %vm618_vm5, %v1335_v56, %v1334_v57 }
  0x51   : > { %5946 = vmatpush3.msra.mxu1 %v6600_v0  ;;  %5921 = vmatmul.mubr.msk.f32.vlgmr.msra.gmra.mxu0 %vm623_vm7, %v6806_v16  ;;  %v1435_v0 = vsel %vm618_vm5, %v1434_v13, %v1433_v41 }
  0x52   : > { %5934 = vmatprep.subr.mxu0 %v6441_v3  ;;  %5947 = vmatprep.subr.mxu1 %v6441_v3 }
  0x53   : > { %5935 = vmatpush3.msra.mxu0 %v6605_v1  ;;  %5948 = vmatpush3.msra.mxu1 %v6610_v2  ;;  %v7018_v1 = vsel %vm621_vm6, %v1436_v14, %v1435_v0  ;;  %v7024_v2 = vsel %vm621_vm6, %v1337_v44, %v1336_v52 }
  0x54   : > { %5936 = vmatprep.subr.mxu0 %v6441_v3  ;;  %5949 = vmatprep.subr.mxu1 %v6441_v3 }
  0x55   : > { %5937 = vmatpush3.msra.mxu0 %v6617_v4  ;;  %5950 = vmatpush3.msra.mxu1 %v6622_v5  ;;  %v5449_v4 = vld [vmem:[%s7901_s7] ss:$0 sm:$0xff] }
  0x56   : > { %5938 = vmatprep.subr.mxu0 %v6441_v3  ;;  %5951 = vmatprep.subr.mxu1 %v6441_v3 }
  0x57   : > { %5939 = vmatpush3.msra.mxu0 %v6627_v6  ;;  %5952 = vmatpush3.msra.mxu1 %v6641_v8 }
  0x58   : > { %5940 = vmatprep.subr.mxu0 %v6441_v3  ;;  %5953 = vmatprep.mubr.msk.f32.mxu1 %vm6442_vm8, %v6441_v3 }
  0x59   : > { %5967 = vmatprep.subr.mxu1 %v6441_v3  ;;  %5941 = vmatpush3.msra.mxu0 %v6689_v18 }
  0x5a   : > { %5942 = vmatprep.mubr.msk.f32.mxu0 %vm6442_vm8, %v6441_v3  ;;  %5954 = vmatmul.mubr.msk.f32.vlgmr.msra.gmra.mxu1 %vm623_vm7, %v7018_v1 }
  0x5b   : > { %5968 = vmatpush3.msra.mxu1 %v6766_v48  ;;  %5943 = vmatmul.mubr.msk.f32.vlgmr.msra.gmra.mxu0 %vm623_vm7, %v7024_v2  ;;  %v5463_v48 = vld [vmem:[%s7901_s7 + $0x1] ss:$0 sm:$0xff] }
  0x5c   : > { %5956 = vmatprep.subr.mxu0 %v6441_v3  ;;  %5969 = vmatprep.subr.mxu1 %v6441_v3 }
  0x5d   : > { %5957 = vmatpush3.msra.mxu0 %v6802_v63  ;;  %5970 = vmatpush3.msra.mxu1 %v6785_v58 }
  0x5e   : > { %5958 = vmatprep.subr.mxu0 %v6441_v3  ;;  %5971 = vmatprep.subr.mxu1 %v6441_v3 }
  0x5f   : > { %5959 = vmatpush3.msra.mxu0 %v6819_v19  ;;  %5972 = vmatpush3.msra.mxu1 %v6796_v61  ;;  %v5470_v19 = vld [vmem:[%s7902_s6 + $0x2] ss:$0 sm:$0xff] }
  0x60   : > { %5960 = vmatprep.subr.mxu0 %v6441_v3  ;;  %5973 = vmatprep.subr.mxu1 %v6441_v3 }
  0x61   : > { %5961 = vmatpush3.msra.mxu0 %v6828_v20  ;;  %5974 = vmatpush3.msra.mxu1 %v6812_v17  ;;  %v5477_v17 = vld [vmem:[%s7901_s7 + $0x2] ss:$0 sm:$0xff] }
  0x62   : > { %5962 = vmatprep.subr.mxu0 %v6441_v3  ;;  %5975 = vmatprep.mubr.msk.f32.mxu1 %vm6442_vm8, %v6441_v3 }
  0x63   : > { %5989 = vmatprep.subr.mxu1 %v6441_v3  ;;  %5963 = vmatpush3.msra.mxu0 %v6842_v22 }
  0x64   : > { %5964 = vmatprep.mubr.msk.f32.mxu0 %vm6442_vm8, %v6441_v3  ;;  %5976 = vmatmul.mubr.msk.f32.vlgmr.msra.gmra.mxu1 %vm623_vm7, %v7018_v1 }
  0x65   : > { %5990 = vmatpush3.msra.mxu1 %v6836_v21  ;;  %5965 = vmatmul.mubr.msk.f32.vlgmr.msra.gmra.mxu0 %vm623_vm7, %v7024_v2 }
  0x66   : > { %5978 = vmatprep.subr.mxu0 %v6441_v3  ;;  %5991 = vmatprep.subr.mxu1 %v6441_v3 }
  0x67   : > { %5979 = vmatpush3.msra.mxu0 %v6854_v23  ;;  %5992 = vmatpush3.msra.mxu1 %v6859_v24 }
  0x68   : > { %5980 = vmatprep.subr.mxu0 %v6441_v3  ;;  %5993 = vmatprep.subr.mxu1 %v6441_v3 }
  0x69   : > { %5981 = vmatpush3.msra.mxu0 %v6869_v25  ;;  %5994 = vmatpush3.msra.mxu1 %v6874_v26  ;;  %v5491_v26 = vld [vmem:[%s7901_s7 + $0x3] ss:$0 sm:$0xff] }
  0x6a   : > { %5982 = vmatprep.subr.mxu0 %v6441_v3  ;;  %5995 = vmatprep.subr.mxu1 %v6441_v3 }
  0x6b   : > { %5983 = vmatpush3.msra.mxu0 %v6883_v27  ;;  %5996 = vmatpush3.msra.mxu1 %v6888_v28  ;;  %v5484_v27 = vld [vmem:[%s7902_s6 + $0x3] ss:$0 sm:$0xff] }
  0x6c   : > { %5984 = vmatprep.subr.mxu0 %v6441_v3  ;;  %5997 = vmatprep.mubr.msk.f32.mxu1 %vm6442_vm8, %v6441_v3 }
  0x6d   : > { %6011 = vmatprep.subr.mxu1 %v6441_v3  ;;  %5985 = vmatpush3.msra.mxu0 %v6899_v33 }
  0x6e   : > { %5986 = vmatprep.mubr.msk.f32.mxu0 %vm6442_vm8, %v6441_v3  ;;  %5998 = vmatmul.mubr.msk.f32.vlgmr.msra.gmra.mxu1 %vm623_vm7, %v7018_v1 }
  0x6f   : > { %6012 = vmatpush3.msra.mxu1 %v6909_v7  ;;  %5987 = vmatmul.mubr.msk.f32.vlgmr.msra.gmra.mxu0 %vm623_vm7, %v7024_v2 }
  0x70   : > { %6000 = vmatprep.subr.mxu0 %v6441_v3  ;;  %6013 = vmatprep.subr.mxu1 %v6441_v3 }
  0x71   : > { %6001 = vmatpush3.msra.mxu0 %v6924_v36  ;;  %6014 = vmatpush3.msra.mxu1 %v6929_v10 }
  0x72   : > { %6002 = vmatprep.subr.mxu0 %v6441_v3  ;;  %6015 = vmatprep.subr.mxu1 %v6441_v3 }
  0x73   : > { %6003 = vmatpush3.msra.mxu0 %v6942_v39  ;;  %6016 = vmatpush3.msra.mxu1 %v6947_v32 }
  0x74   : > { %6004 = vmatprep.subr.mxu0 %v6441_v3  ;;  %6017 = vmatprep.subr.mxu1 %v6441_v3 }
  0x75   : > { %6005 = vmatpush3.msra.mxu0 %v6959_v46  ;;  %6018 = vmatpush3.msra.mxu1 %v6964_v47 }
  0x76   : > { %6019 = vmatprep.mubr.msk.f32.mxu1 %vm6442_vm8, %v6441_v3  ;;  %6006 = vmatprep.subr.mxu0 %v6441_v3 }
  0x77   : > { %6020 = vmatmul.mubr.msk.f32.vlgmr.msra.gmra.mxu1 %vm623_vm7, %v7018_v1  ;;  %6007 = vmatpush3.msra.mxu0 %v6976_v51 }
  0x78   : > { %6008 = vmatprep.mubr.msk.f32.mxu0 %vm6442_vm8, %v6441_v3 }
  0x79   : > { %6009 = vmatmul.mubr.msk.f32.vlgmr.msra.gmra.mxu0 %vm623_vm7, %v7024_v2 }
  0xf1   : > { %v799_v5 = vpop.f32.mrf.mxu1 }
  0xf2   : > { %v800_v6 = vadd.f32 %v5449_v4, %v799_v5 }
  0xf3   : > { %v5867_v8 = vpop.f32.mrf.mxu1 }
  0xf4   : > { %803 = vst.msk [vmem:[#allocation3] sm:$0xff] %vm696_vm9, %v800_v6 }
  0xf6   : > { %v692_v18 = vpop.f32.mrf.mxu0 }
  0xf7   : > { %v693_v45 = vadd.f32 %v5447_v15, %v692_v18 }
  0xf8   : > { %v5856_v3 = vpop.f32.mrf.mxu0 }
  0xf9   : > { %697 = vst.msk [vmem:[#allocation2] sm:$0xff] %vm696_vm9, %v693_v45 }
  0xfb   : > { %v968_v58 = vpop.f32.mrf.mxu1 }
  0xfc   : > { %v969_v59 = vadd.f32 %v5463_v48, %v968_v58 }
  0xfd   : > { %v5889_v61 = vpop.f32.mrf.mxu1 }
  0xfe   : > { %973 = vst.msk [vmem:[#allocation3 + $0x8] sm:$0xff] %vm696_vm9, %v969_v59  ;;  %v883_v62 = vpop.f32.mrf.mxu0 }
  0xff   : > { %v884_v63 = vadd.f32 %v5456_v60, %v883_v62 }
 0x100   : > { %v5878_v16 = vpop.f32.mrf.mxu0 }
 0x101   : > { %888 = vst.msk [vmem:[#allocation2 + $0x8] sm:$0xff] %vm696_vm9, %v884_v63 }
 0x106   : > { %v1138_v20 = vpop.f32.mrf.mxu1 }
 0x107   : > { %v1139_v21 = vadd.f32 %v5477_v17, %v1138_v20  ;;  %v1053_v22 = vpop.f32.mrf.mxu0 }
 0x108   : > { %v1054_v23 = vadd.f32 %v5470_v19, %v1053_v22  ;;  %v5911_v24 = vpop.f32.mrf.mxu1 }
 0x109   : > { %1143 = vst.msk [vmem:[#allocation3 + $0x10] sm:$0xff] %vm696_vm9, %v1139_v21  ;;  %v5900_v25 = vpop.f32.mrf.mxu0 }
 0x10a   : > { %1058 = vst.msk [vmem:[#allocation2 + $0x10] sm:$0xff] %vm696_vm9, %v1054_v23 }
 0x110   : > { %v1308_v28 = vpop.f32.mrf.mxu1 }
 0x111   : > { %v1309_v29 = vadd.f32 %v5491_v26, %v1308_v28  ;;  %v1223_v30 = vpop.f32.mrf.mxu0 }
 0x112   : > { %v1224_v33 = vadd.f32 %v5484_v27, %v1223_v30  ;;  %v5933_v7 = vpop.f32.mrf.mxu1 }
 0x113   : > { %1313 = vst.msk [vmem:[#allocation3 + $0x18] sm:$0xff] %vm696_vm9, %v1309_v29  ;;  %v5922_v31 = vpop.f32.mrf.mxu0 }
 0x114   : > { %1228 = vst.msk [vmem:[#allocation2 + $0x18] sm:$0xff] %vm696_vm9, %v1224_v33 }
 0x11a   : > { %v1506_v34 = vpop.f32.mrf.mxu1 }
 0x11b   : > { %v1507_v35 = vadd.f32 %v5449_v4, %v1506_v34  ;;  %v1407_v36 = vpop.f32.mrf.mxu0 }
 0x11c   : > { %v1408_v10 = vadd.f32 %v5447_v15, %v1407_v36  ;;  %v5955_v9 = vpop.f32.mrf.mxu1 }
 0x11d   : > { %1511 = vst.msk [vmem:[#allocation3 + $0x20] sm:$0xff] %vm696_vm9, %v1507_v35  ;;  %v5944_v37 = vpop.f32.mrf.mxu0 }
 0x11e   : > { %1412 = vst.msk [vmem:[#allocation2 + $0x20] sm:$0xff] %vm696_vm9, %v1408_v10 }
 0x124   : > { %v1672_v39 = vpop.f32.mrf.mxu1 }
 0x125   : > { %v1673_v32 = vadd.f32 %v5463_v48, %v1672_v39  ;;  %v1589_v42 = vpop.f32.mrf.mxu0 }
 0x126   : > { %v1590_v43 = vadd.f32 %v5456_v60, %v1589_v42  ;;  %v5977_v11 = vpop.f32.mrf.mxu1 }
 0x127   : > { %1677 = vst.msk [vmem:[#allocation3 + $0x28] sm:$0xff] %vm696_vm9, %v1673_v32  ;;  %v5966_v46 = vpop.f32.mrf.mxu0 }
 0x128   : > { %1594 = vst.msk [vmem:[#allocation2 + $0x28] sm:$0xff] %vm696_vm9, %v1590_v43 }
 0x12e   : > { %v1838_v47 = vpop.f32.mrf.mxu1 }
 0x12f   : > { %v1839_v38 = vadd.f32 %v5477_v17, %v1838_v47  ;;  %v1755_v49 = vpop.f32.mrf.mxu0 }
 0x130   : > { %v1756_v50 = vadd.f32 %v5470_v19, %v1755_v49  ;;  %v5999_v51 = vpop.f32.mrf.mxu1 }
 0x131   : > { %1843 = vst.msk [vmem:[#allocation3 + $0x30] sm:$0xff] %vm696_vm9, %v1839_v38  ;;  %v5988_v53 = vpop.f32.mrf.mxu0 }
 0x132   : > { %1760 = vst.msk [vmem:[#allocation2 + $0x30] sm:$0xff] %vm696_vm9, %v1756_v50 }
 0x137   : > { %v2004_v12 = vpop.f32.mrf.mxu1 }
 0x138   : > { %v2005_v40 = vadd.f32 %v5491_v26, %v2004_v12 }
 0x139   : > { %v1921_v54 = vpop.f32.mrf.mxu0  ;;  %v6021_v55 = vpop.f32.mrf.mxu1 }
 0x13a   : > { %2009 = vst.msk [vmem:[#allocation3 + $0x38] sm:$0xff] %vm696_vm9, %v2005_v40  ;;  %v1922_v13 = vadd.f32 %v5484_v27, %v1921_v54 }
 0x13b   : > { %v6010_v41 = vpop.f32.mrf.mxu0 }
 0x13c   : > { %1926 = vst.msk [vmem:[#allocation2 + $0x38] sm:$0xff] %vm696_vm9, %v1922_v13 }
 0x13d PF: > { %s7903_s21 = sld [smem:[#allocation13_spill]]  ;;  %s5648_s1 = sshll.u32 %s6564_s0, 3  ;;  %v6443_v14 = vmov 0.0   ;;  %vm6444_vm10 = vmmov 0   ;;  %vm2042_vm11 = vcmask 1041409   ;;  %vm2045_vm12 = vcmask 1042434  }
 0x13e   : > { %6022 = vmatprep.subr.mxu0 %v6443_v14  ;;  %6033 = vmatprep.subr.mxu1 %v6443_v14  ;;  %s7904_s4 = sld [smem:[#allocation11_spill]]  ;;  %vm2048_vm13 = vcmask 1043459   ;;  %vm2050_vm14 = vcmask 261120   ;;  %v2372_v29 = vld [vmem:[#allocation2] sm:$0xff]  ;;  %vm2380_vm15 = vcmask 64512   ;;  %v2375_v30 = vld [vmem:[#allocation2 + $0x18] sm:$0xff] }
 0x13f   : > { %s7905_s7 = sld [smem:[#allocation12_spill]]  ;;  %6030 = vmatprep.mubr.msk.f32.mxu0 %vm6444_vm10, %v6443_v14  ;;  %6041 = vmatprep.mubr.msk.f32.mxu1 %vm6444_vm10, %v6443_v14  ;;  %v7322_v33 = vld [vmem:[%s7862_s5] ss:$0 sm:$0xff]  ;;  %v7327_v31 = vld [vmem:[%s7862_s5 + $0x1] ss:$0 sm:$0xff]  ;;  %v2373_v36 = vld [vmem:[#allocation2 + $0x8] sm:$0xff] }
 0x140   : > { %v2374_v39 = vld [vmem:[#allocation2 + $0x10] sm:$0xff]  ;;  %v7339_v32 = vld [vmem:[%s7862_s5 + $0x2] ss:$0 sm:$0xff]  ;;  %v7346_v43 = vld [vmem:[%s7862_s5 + $0x3] ss:$0 sm:$0xff]  ;;  %vm2685_vm0 = vcmask 60416  }
 0x141   : > { %vm3354_vm1 = vcmask 257024   ;;  %vm3536_vm2 = vcmask 523264   ;;  %vm5013_vm3 = vcmask 1044484   ;;  %vm5016_vm4 = vcmask 258049   ;;  %s5649_s19 = sshll.u32 %s6564_s0, 7  ;;  %s7906_s3 = sand.u32 1, %s6431_s28  }
 0x142   : > { %vm5364_vm5 = vcmask 1040384   ;;  %vm5369_vm6 = vcmask 254976   ;;  %s7800_s20 = scalar_lea.hbm %s7875_s18, %s5649_s19 }
 0x143   : > { %v7148_v56 = vld [vmem:[%s7903_s21 + $0x18] sm:$0xff]  ;;  %v7160_v0 = vld [vmem:[%s7903_s21 + $0x10] sm:$0xff]  ;;  %v7166_v44 = vld [vmem:[%s7903_s21 + $0x8] sm:$0xff] }
 0x144   : > { %v7153_v57 = vld [vmem:[%s7903_s21 + $0x38] sm:$0xff]  ;;  %v7171_v52 = vld [vmem:[%s7903_s21 + $0x30] sm:$0xff]  ;;  %s7176_s6 = scalar_lea.vmem %s7904_s4, %s5648_s1  ;;  %6023 = vmatpush3.msra.mxu0 %v7148_v56  ;;  %v7186_v1 = vld [vmem:[%s7903_s21 + $0x28] sm:$0xff]  ;;  %s7817_s4 = scalar_lea.sflag [#allocation5], %s7906_s3 }
 0x145   : > { %s2017_s22 = scalar_lea.vmem %s7905_s7, %s5648_s1  ;;  %6034 = vmatpush3.msra.mxu1 %v7153_v57  ;;  %v7189_v2 = vld [vmem:[%s7176_s6] sm:$0x3]  ;;  %v7192_v4 = vld [vmem:[%s7176_s6 + $0x2] sm:$0x3]  ;;  %6024 = vmatprep.subr.mxu0 %v6443_v14  ;;  %v7197_v5 = vld [vmem:[%s7176_s6 + $0x4] sm:$0x3] }
 0x146   : > { %6035 = vmatprep.subr.mxu1 %v6443_v14  ;;  %v7200_v6 = vld [vmem:[%s7176_s6 + $0x6] sm:$0x3]  ;;  %v2018_v8 = vld [vmem:[%s2017_s22] sm:$0x3]  ;;  %6025 = vmatpush3.msra.mxu0 %v7160_v0  ;;  %v2019_v15 = vld [vmem:[%s2017_s22 + $0x2] sm:$0x3] }
 0x147   : > { %6036 = vmatpush3.msra.mxu1 %v7171_v52  ;;  %v2020_v18 = vld [vmem:[%s2017_s22 + $0x4] sm:$0x3]  ;;  %v2021_v45 = vld [vmem:[%s2017_s22 + $0x6] sm:$0x3]  ;;  %v7205_v3 = vadd.f32 %v2018_v8, %v7189_v2  ;;  %6026 = vmatprep.subr.mxu0 %v6443_v14  ;;  %v7215_v58 = vadd.f32 %v2019_v15, %v7192_v4  ;;  %v7246_v20 = vld [vmem:[%s7903_s21 + $0x58] sm:$0xff]  ;;  %s5388_s22 = sshll.u32 %s6594_s26, 4  ;;  %s7802_s22 = int_to_ptr.vmem [resolvable:$true] %s5388_s22 }
 0x148   : > { %v7211_v48 = vld [vmem:[%s7903_s21] sm:$0xff]  ;;  %6037 = vmatprep.subr.mxu1 %v6443_v14  ;;  %v7218_v59 = vadd.f32 %v2020_v18, %v7197_v5  ;;  %v7221_v60 = vadd.f32 %v2021_v45, %v7200_v6  ;;  %6027 = vmatpush3.msra.mxu0 %v7166_v44  ;;  %v7254_v21 = vld [vmem:[%s7903_s21 + $0x78] sm:$0xff]  ;;  %v7262_v23 = vld [vmem:[%s7903_s21 + $0x50] sm:$0xff]  ;;  %s6379_s7 = scalar_lea.vmem %s7802_s22, 128  ;;  %s6445_s1 = smov [#allocation4]  }
 0x149   : > { %v7229_v61 = vld [vmem:[%s7903_s21 + $0x20] sm:$0xff]  ;;  %6028 = vmatprep.subr.mxu0 %v6443_v14  ;;  %6038 = vmatpush3.msra.mxu1 %v7186_v1  ;;  %v2041_v62 = vrot.slane %v7215_v58, 7  ;;  %v7267_v24 = vld [vmem:[%s7903_s21 + $0x70] sm:$0xff]  ;;  %v7275_v25 = vld [vmem:[%s7903_s21 + $0x48] sm:$0xff]  ;;  %p6380_p11 = scmp.ne.s32.totalorder %s7802_s22, %s6379_s7 }
 0x14a   : > { %v2044_v63 = vrot.slane %v7218_v59, 6  ;;  %v2047_v16 = vrot.slane %v7221_v60, 5  ;;  %6029 = vmatpush3.msra.mxu0 %v7211_v48  ;;  %6039 = vmatprep.subr.mxu1 %v6443_v14  ;;  %v7283_v26 = vld [vmem:[%s7903_s21 + $0x68] sm:$0xff]  ;;  %v7289_v27 = vld [vmem:[%s7903_s21 + $0x40] sm:$0xff] }
 0x14b   : > { %6044 = vmatprep.subr.mxu0 %v6443_v14  ;;  %v2043_v17 = vsel %vm2042_vm11, %v2041_v62, %v7205_v3  ;;  %6040 = vmatpush3.msra.mxu1 %v7229_v61  ;;  %v7298_v28 = vld [vmem:[%s7903_s21 + $0x60] sm:$0xff]  ;;  %p6381_p12 = pnand %p6380_p11, %p6581_p5 }
 0x14c   : > { %v2046_v19 = vsel %vm2045_vm12, %v2044_v63, %v2043_v17  ;;  %6055 = vmatprep.subr.mxu1 %v6443_v14 }
 0x14d   : > { %v2049_v22 = vsel %vm2048_vm13, %v2047_v16, %v2046_v19  ;;  %p6382_p13 = pneg %p6381_p12 }
 0x14e   : > { %6031 = vmatmul.mubr.msk.f32.vlgmr.msra.gmra.mxu0 %vm2050_vm14, %v2049_v22  ;;  %6042 = vmatmul.mubr.msk.f32.vlgmr.msra.gmra.mxu1 %vm2050_vm14, %v2049_v22 }
 0x14f   : > { %6045 = vmatpush3.msra.mxu0 %v7246_v20  ;;  %6056 = vmatpush3.msra.mxu1 %v7254_v21 }
 0x150   : > { %6046 = vmatprep.subr.mxu0 %v6443_v14  ;;  %6057 = vmatprep.subr.mxu1 %v6443_v14 }
 0x151   : > { %6047 = vmatpush3.msra.mxu0 %v7262_v23  ;;  %6058 = vmatpush3.msra.mxu1 %v7267_v24 }
 0x152   : > { %6048 = vmatprep.subr.mxu0 %v6443_v14  ;;  %6052 = vmatprep.mubr.msk.f32.mxu0 %vm6444_vm10, %v6443_v14 }
 0x153   : > { %6049 = vmatpush3.msra.mxu0 %v7275_v25  ;;  %6059 = vmatprep.subr.mxu1 %v6443_v14 }
 0x154   : > { %6050 = vmatprep.subr.mxu0 %v6443_v14  ;;  %6060 = vmatpush3.msra.mxu1 %v7283_v26 }
 0x155   : > { %6051 = vmatpush3.msra.mxu0 %v7289_v27  ;;  %6061 = vmatprep.subr.mxu1 %v6443_v14 }
 0x156   : > { %6053 = vmatmul.mubr.msk.f32.vlgmr.msra.gmra.mxu0 %vm2050_vm14, %v2049_v22  ;;  %6062 = vmatpush3.msra.mxu1 %v7298_v28 }
 0x157   : > { %6063 = vmatprep.mubr.msk.f32.mxu1 %vm6444_vm10, %v6443_v14  ;;  %6066 = vmatprep.subr.mxu0 %v6443_v14 }
 0x158   : > { %6064 = vmatmul.mubr.msk.f32.vlgmr.msra.gmra.mxu1 %vm2050_vm14, %v2049_v22  ;;  %6067 = vmatpush3.xpose.msk.msra.mxu0 %vm2380_vm15, %v2372_v29 }
 0x159   : > { %6068 = vmatprep.mubr.msk.f32.mxu0 %vm6444_vm10, %v6443_v14  ;;  %6071 = vmatprep.subr.mxu0 %v6443_v14 }
 0x15a   : > { %6081 = vmatprep.subr.mxu1 %v6443_v14  ;;  %6083 = vmatprep.mubr.msk.f32.mxu1 %vm6444_vm10, %v6443_v14 }
 0x15b   : > { %6082 = vmatpush3.xpose.msk.msra.mxu1 %vm2380_vm15, %v2375_v30 }
 0x15c   : > { %6091 = vmatprep.subr.mxu1 %v6443_v14 }
 0x20e   : > { %v2119_v7 = vpop.f32.mrf.mxu0  ;;  %v2202_v34 = vpop.f32.mrf.mxu1 }
 0x20f   : > { %v2120_v35 = vadd.f32 %v7322_v33, %v2119_v7  ;;  %v2203_v37 = vadd.f32 %v7327_v31, %v2202_v34 }
 0x210   : > { %v6032_v10 = vpop.f32.mrf.mxu0  ;;  %v6043_v9 = vpop.f32.mrf.mxu1 }
 0x211   : > { %6069 = vmatmul.mubr.msk.f32.vlgmr.msra.gmra.mxu0 %vm2380_vm15, %v2120_v35 }
 0x212   : > { %6072 = vmatpush3.xpose.msk.msra.mxu0 %vm2380_vm15, %v2373_v36  ;;  %6073 = vmatprep.mubr.msk.f32.mxu0 %vm6444_vm10, %v6443_v14 }
 0x213   : > { %6076 = vmatprep.subr.mxu0 %v6443_v14 }
 0x215   : > { %6074 = vmatmul.mubr.msk.f32.vlgmr.msra.gmra.mxu0 %vm2380_vm15, %v2203_v37 }
 0x216   : > { %v2285_v42 = vpop.f32.mrf.mxu0  ;;  %6077 = vmatpush3.xpose.msk.msra.mxu0 %vm2380_vm15, %v2374_v39  ;;  %6078 = vmatprep.mubr.msk.f32.mxu0 %vm6444_vm10, %v6443_v14 }
 0x217   : > { %v2286_v11 = vadd.f32 %v7339_v32, %v2285_v42  ;;  %6086 = vmatprep.subr.mxu0 %v6443_v14 }
 0x218   : > { %v6054_v46 = vpop.f32.mrf.mxu0  ;;  %v2368_v47 = vpop.f32.mrf.mxu1 }
 0x219   : > { %v2369_v38 = vadd.f32 %v7346_v43, %v2368_v47  ;;  %6079 = vmatmul.mubr.msk.f32.vlgmr.msra.gmra.mxu0 %vm2380_vm15, %v2286_v11  ;;  %v2376_v47 = vld [vmem:[#allocation3] sm:$0xff] }
 0x21a   : > { %v6065_v49 = vpop.f32.mrf.mxu1  ;;  %6088 = vmatprep.mubr.msk.f32.mxu0 %vm6444_vm10, %v6443_v14  ;;  %6087 = vmatpush3.msra.mxu0 %v2376_v47 }
 0x21b   : > { %6084 = vmatmul.mubr.msk.f32.vlgmr.msra.gmra.mxu1 %vm2380_vm15, %v2369_v38  ;;  %6096 = vmatprep.subr.mxu0 %v6443_v14  ;;  %v2377_v38 = vld [vmem:[#allocation3 + $0x8] sm:$0xff] }
 0x21c   : > { %6093 = vmatprep.mubr.msk.f32.mxu1 %vm6444_vm10, %v6443_v14  ;;  %6092 = vmatpush3.msra.mxu1 %v2377_v38 }
 0x21d   : > { %6101 = vmatprep.subr.mxu1 %v6443_v14 }
 0x2d1   : > { %v2453_v50 = vpop.f32.mrf.mxu0 }
 0x2d2   : > { %v2686_v51 = vsel %vm2685_vm0, %v2453_v50, -inf }
 0x2d3   : > { %2687 = vmax.xlane.f32.xlu0 %v2686_v51  ;;  %v6070_v53 = vpop.f32.mrf.mxu0 }
 0x2d5   : > { %v2529_v12 = vpop.f32.mrf.mxu0 }
 0x2d6   : > { %v2689_v40 = vsel %vm2685_vm0, %v2529_v12, -inf }
 0x2d7   : > { %2690 = vmax.xlane.f32.xlu0 %v2689_v40  ;;  %v6075_v54 = vpop.f32.mrf.mxu0 }
 0x2d8   : > { %v2378_v54 = vld [vmem:[#allocation3 + $0x10] sm:$0xff] }
 0x2d9   : > { %v2605_v55 = vpop.f32.mrf.mxu0 }
 0x2da   : > { %v2692_v13 = vsel %vm2685_vm0, %v2605_v55, -inf }
 0x2db   : > { %v2681_v41 = vpop.f32.mrf.mxu1  ;;  %2693 = vmax.xlane.f32.xlu1 %v2692_v13  ;;  %v6080_v8 = vpop.f32.mrf.mxu0 }
 0x2dc   : > { %v2695_v15 = vsel %vm2685_vm0, %v2681_v41, -inf }
 0x2dd   : > { %v6085_v18 = vpop.f32.mrf.mxu1 }
 0x2df   : > { %2696 = vmax.xlane.f32.xlu1 %v2695_v15 }
 0x35c   : > { %v2688_v45 = vpop.xlane.xlu0 %2687 }
 0x35d   : > { %v2698_v62 = vsub.f32 %v2453_v50, %v2688_v45 }
 0x35f   : > { %v2702_v63 = vmul.f32 1.442695, %v2698_v62  ;;  %v7386_v62 = vld [vmem:[%s7865_s8] sm:$0xff] }
 0x360   : > { %v2691_v16 = vpop.xlane.xlu0 %2690 }
 0x361   : > { %6335 = vpow2.f32 %v2702_v63  ;;  %v2699_v17 = vsub.f32 %v2529_v12, %v2691_v16  ;;  %v7392_v63 = vld [vmem:[%s7865_s8 + $0x8] sm:$0xff]  ;;  %v7400_v16 = vld [vmem:[%s7865_s8 + $0x18] sm:$0xff] }
 0x363   : > { %v2704_v19 = vmul.f32 1.442695, %v2699_v17 }
 0x364   : > { %v2694_v22 = vpop.xlane.xlu1 %2693 }
 0x365   : > { %6337 = vpow2.f32 %v2704_v19  ;;  %v2700_v29 = vsub.f32 %v2605_v55, %v2694_v22  ;;  %v7409_v22 = vld [vmem:[%s7865_s8 + $0x10] sm:$0xff] }
 0x367   : > { %v2706_v30 = vmul.f32 1.442695, %v2700_v29 }
 0x368   : > { %v2697_v7 = vpop.xlane.xlu1 %2696 }
 0x369   : > { %6339 = vpow2.f32 %v2706_v30  ;;  %v2701_v34 = vsub.f32 %v2681_v41, %v2697_v7  ;;  %v2379_v41 = vld [vmem:[#allocation3 + $0x18] sm:$0xff] }
 0x36b   : > { %v2708_v35 = vmul.f32 1.442695, %v2701_v34 }
 0x36d   : > { %6341 = vpow2.f32 %v2708_v35 }
 0x36e   : > { %v6336_v36 = vpop.eup %6335 }
 0x36f   : > { %v2710_v10 = vsel %vm2685_vm0, %v6336_v36, 0.0 }
 0x370   : > { %2711 = vadd.xlane.f32.xlu0 %v2710_v10 }
 0x372   : > { %v6338_v9 = vpop.eup %6337 }
 0x373   : > { %v2713_v37 = vsel %vm2685_vm0, %v6338_v9, 0.0 }
 0x374   : > { %2714 = vadd.xlane.f32.xlu1 %v2713_v37 }
 0x376   : > { %v6340_v39 = vpop.eup %6339 }
 0x377   : > { %v2716_v42 = vsel %vm2685_vm0, %v6340_v39, 0.0 }
 0x378   : > { %2717 = vadd.xlane.f32.xlu0 %v2716_v42 }
 0x37a   : > { %v6342_v11 = vpop.eup %6341 }
 0x37b   : > { %v2719_v46 = vsel %vm2685_vm0, %v6342_v11, 0.0 }
 0x37c   : > { %2720 = vadd.xlane.f32.xlu1 %v2719_v46 }
 0x3f9   : > { %v2712_v49 = vpop.xlane.xlu0 %2711 }
 0x3fa   : > { %6343 = vrcp.f32 %v2712_v49  ;;  %v7426_v49 = vld [vmem:[%s7866_s9] ss:$0 sm:$0xff] }
 0x3fd   : > { %v2715_v50 = vpop.xlane.xlu1 %2714 }
 0x3fe   : > { %6345 = vrcp.f32 %v2715_v50 }
 0x401   : > { %v2718_v51 = vpop.xlane.xlu0 %2717 }
 0x402   : > { %6347 = vrcp.f32 %v2718_v51 }
 0x405   : > { %v2721_v53 = vpop.xlane.xlu1 %2720 }
 0x406   : > { %6349 = vrcp.f32 %v2721_v53 }
 0x407   : > { %v6344_v12 = vpop.eup %6343 }
 0x408   : > { %v2726_v40 = vmul.f32 %v6344_v12, %v6336_v36 }
 0x40a   : > { %6089 = vmatmul.mubr.msk.f32.vlgmr.msra.gmra.mxu0 %vm2380_vm15, %v2726_v40 }
 0x40b   : > { %v6346_v55 = vpop.eup %6345  ;;  %6097 = vmatpush3.msra.mxu0 %v2378_v54  ;;  %6098 = vmatprep.mubr.msk.f32.mxu0 %vm6444_vm10, %v6443_v14 }
 0x40c   : > { %v2727_v13 = vmul.f32 %v6346_v55, %v6338_v9  ;;  %6106 = vmatprep.subr.mxu0 %v6443_v14 }
 0x40e   : > { %6094 = vmatmul.mubr.msk.f32.vlgmr.msra.gmra.mxu1 %vm2380_vm15, %v2727_v13 }
 0x40f   : > { %v6348_v8 = vpop.eup %6347  ;;  %6102 = vmatpush3.msra.mxu1 %v2379_v41  ;;  %6103 = vmatprep.mubr.msk.f32.mxu1 %vm6444_vm10, %v6443_v14 }
 0x410   : > { %v2728_v15 = vmul.f32 %v6348_v8, %v6340_v39  ;;  %6111 = vmatprep.subr.mxu1 %v6443_v14 }
 0x412   : > { %6099 = vmatmul.mubr.msk.f32.vlgmr.msra.gmra.mxu0 %vm2380_vm15, %v2728_v15 }
 0x413   : > { %v6350_v18 = vpop.eup %6349  ;;  %6108 = vmatprep.mubr.msk.f32.mxu0 %vm6444_vm10, %v6443_v14  ;;  %6107 = vmatpush3.msra.mxu0 %v7392_v63 }
 0x414   : > { %v2729_v45 = vmul.f32 %v6350_v18, %v6342_v11  ;;  %6116 = vmatprep.subr.mxu0 %v6443_v14 }
 0x416   : > { %6104 = vmatmul.mubr.msk.f32.vlgmr.msra.gmra.mxu1 %vm2380_vm15, %v2729_v45 }
 0x417   : > { %6113 = vmatprep.mubr.msk.f32.mxu1 %vm6444_vm10, %v6443_v14  ;;  %6112 = vmatpush3.msra.mxu1 %v7386_v62 }
 0x418   : > { %6121 = vmatprep.subr.mxu1 %v6443_v14 }
 0x4ca   : > { %v2799_v17 = vpop.f32.mrf.mxu0 }
 0x4cb   : > { %6114 = vmatmul.mubr.msk.f32.vlgmr.msra.gmra.mxu1 %vm2380_vm15, %v2799_v17 }
 0x4cc   : > { %v6090_v19 = vpop.f32.mrf.mxu0  ;;  %6122 = vmatpush3.msra.mxu1 %v7400_v16  ;;  %6123 = vmatprep.mubr.msk.f32.mxu1 %vm6444_vm10, %v6443_v14 }
 0x4cd   : > { %6137 = vmatprep.subr.mxu1 %v6443_v14 }
 0x4ce   : > { %v2872_v29 = vpop.f32.mrf.mxu1 }
 0x4cf   : > { %6109 = vmatmul.mubr.msk.f32.vlgmr.msra.gmra.mxu0 %vm2380_vm15, %v2872_v29 }
 0x4d0   : > { %v6095_v30 = vpop.f32.mrf.mxu1  ;;  %6117 = vmatpush3.msra.mxu0 %v7409_v22  ;;  %6118 = vmatprep.mubr.msk.f32.mxu0 %vm6444_vm10, %v6443_v14 }
 0x4d1   : > { %6126 = vmatprep.subr.mxu0 %v6443_v14 }
 0x4d2   : > { %v2945_v7 = vpop.f32.mrf.mxu0 }
 0x4d3   : > { %6119 = vmatmul.mubr.msk.f32.vlgmr.msra.gmra.mxu0 %vm2380_vm15, %v2945_v7 }
 0x4d4   : > { %v6100_v34 = vpop.f32.mrf.mxu0  ;;  %6134 = vmatprep.mubr.msk.f32.mxu0 %vm6444_vm10, %v6443_v14 }
 0x4d6   : > { %v3018_v35 = vpop.f32.mrf.mxu1 }
 0x4d7   : > { %6124 = vmatmul.mubr.msk.f32.vlgmr.msra.gmra.mxu1 %vm2380_vm15, %v3018_v35 }
 0x4d8   : > { %v6105_v36 = vpop.f32.mrf.mxu1  ;;  %6153 = vmatprep.mubr.msk.f32.mxu1 %vm6444_vm10, %v6443_v14 }
 0x58b   : > { %v3167_v10 = vpop.f32.mrf.mxu1 }
 0x58d   : > { %v6115_v9 = vpop.f32.mrf.mxu1 }
 0x58f   : > { %v3094_v37 = vpop.f32.mrf.mxu0 }
 0x590   : > { %v3168_v11 = vadd.f32 %v3167_v10, %v3094_v37 }
 0x591   : > { %v6110_v39 = vpop.f32.mrf.mxu0 }
 0x593   : > { %v3242_v42 = vpop.f32.mrf.mxu0 }
 0x594   : > { %v3246_v47 = vadd.f32 %v3242_v42, %v3168_v11 }
 0x595   : > { %v6120_v46 = vpop.f32.mrf.mxu0 }
 0x597   : > { %v3318_v38 = vpop.f32.mrf.mxu1 }
 0x598   : > { %v3322_v50 = vadd.f32 %v3318_v38, %v3246_v47 }
 0x599   : > { %v6125_v51 = vpop.f32.mrf.mxu1 }
 0x59a   : > { %v3330_v53 = vadd.f32 %v7426_v49, %v3322_v50 }
 0x59c   : > { %v3332_v12 = vrot.slane %v3330_v53, 1  ;;  %v3333_v40 = vrot.slane %v3330_v53, 2  ;;  %v3334_v54 = vrot.slane %v3330_v53, 3  ;;  %v3339_v8 = vadd.f32 %v3330_v53, %v7189_v2 }
 0x59e   : > { %v3340_v55 = vadd.f32 %v3332_v12, %v7192_v4  ;;  %v3341_v13 = vadd.f32 %v3333_v40, %v7197_v5  ;;  %v3342_v41 = vadd.f32 %v3334_v54, %v7200_v6  ;;  %v7444_v12 = vld [vmem:[%s7867_s10 + $0x18] sm:$0xff]  ;;  %v7449_v40 = vld [vmem:[%s7867_s10 + $0x10] sm:$0xff]  ;;  %v7456_v54 = vld [vmem:[%s7867_s10 + $0x8] sm:$0xff] }
 0x59f   : > { %6127 = vmatpush3.msra.mxu0 %v7444_v12 }
 0x5a0   : > { %v3347_v15 = vrot.slane %v3340_v55, 7  ;;  %v3349_v18 = vrot.slane %v3341_v13, 6  ;;  %v3351_v17 = vrot.slane %v3342_v41, 5  ;;  %6128 = vmatprep.subr.mxu0 %v6443_v14 }
 0x5a1   : > { %6129 = vmatpush3.msra.mxu0 %v7449_v40 }
 0x5a2   : > { %v3348_v45 = vsel %vm2042_vm11, %v3347_v15, %v3339_v8  ;;  %6130 = vmatprep.subr.mxu0 %v6443_v14  ;;  %v7491_v15 = vld [vmem:[%s7869_s12 + $0x20] sm:$0xff] }
 0x5a3   : > { %v3350_v19 = vsel %vm2045_vm12, %v3349_v18, %v3348_v45  ;;  %6131 = vmatpush3.msra.mxu0 %v7456_v54  ;;  %v7498_v18 = vld [vmem:[%s7869_s12 + $0x18] sm:$0xff]  ;;  %v7505_v45 = vld [vmem:[%s7869_s12 + $0x10] sm:$0xff] }
 0x5a4   : > { %v3352_v29 = vsel %vm2048_vm13, %v3351_v17, %v3350_v19  ;;  %6132 = vmatprep.subr.mxu0 %v6443_v14 }
 0x5a5   : > { %v3355_v30 = vsel %vm3354_vm1, %v3352_v29, 0.0 }
 0x5a6   : > { %3356 = vadd.xlane.f32.xlu0 %v3355_v30 }
 0x62f   : > { %v3357_v4 = vpop.xlane.xlu0 %3356 }
 0x630   : > { %v3359_v7 = vmul.f32 0.03125, %v3357_v4 }
 0x632   : > { %v3361_v5 = vrot.slane %v3359_v7, 1  ;;  %v3362_v34 = vrot.slane %v3359_v7, 2  ;;  %v3363_v6 = vrot.slane %v3359_v7, 3  ;;  %v3368_v35 = vsub.f32 %v3339_v8, %v3359_v7  ;;  %v7484_v8 = vld [vmem:[%s7869_s12 + $0x28] sm:$0xff] }
 0x634   : > { %v3369_v2 = vsub.f32 %v3340_v55, %v3361_v5  ;;  %v3370_v36 = vsub.f32 %v3341_v13, %v3362_v34  ;;  %v3371_v10 = vsub.f32 %v3342_v41, %v3363_v6  ;;  %v3372_v42 = vmul.f32 %v3368_v35, %v3368_v35  ;;  %v7463_v55 = vld [vmem:[%s7867_s10] sm:$0xff]  ;;  %v7472_v13 = vld [vmem:[%s7869_s12 + $0x38] sm:$0xff]  ;;  %v7477_v41 = vld [vmem:[%s7869_s12 + $0x30] sm:$0xff] }
 0x635   : > { %6133 = vmatpush3.msra.mxu0 %v7463_v55  ;;  %6138 = vmatpush3.msra.mxu1 %v7472_v13  ;;  %v7514_v6 = vld [vmem:[%s7871_s14] ss:$0 sm:$0xff] }
 0x636   : > { %v3373_v9 = vmul.f32 %v3369_v2, %v3369_v2  ;;  %v3374_v37 = vmul.f32 %v3370_v36, %v3370_v36  ;;  %v3375_v39 = vmul.f32 %v3371_v10, %v3371_v10  ;;  %6156 = vmatprep.subr.mxu0 %v6443_v14  ;;  %6139 = vmatprep.subr.mxu1 %v6443_v14 }
 0x637   : > { %6140 = vmatpush3.msra.mxu1 %v7477_v41 }
 0x638   : > { %v3380_v11 = vrot.slane %v3373_v9, 7  ;;  %v3382_v46 = vrot.slane %v3374_v37, 6  ;;  %v3384_v38 = vrot.slane %v3375_v39, 5  ;;  %6141 = vmatprep.subr.mxu1 %v6443_v14 }
 0x639   : > { %6142 = vmatpush3.msra.mxu1 %v7484_v8 }
 0x63a   : > { %v3381_v47 = vsel %vm2042_vm11, %v3380_v11, %v3372_v42  ;;  %6143 = vmatprep.subr.mxu1 %v6443_v14 }
 0x63b   : > { %v3383_v50 = vsel %vm2045_vm12, %v3382_v46, %v3381_v47  ;;  %6144 = vmatpush3.msra.mxu1 %v7491_v15 }
 0x63c   : > { %v3385_v51 = vsel %vm2048_vm13, %v3384_v38, %v3383_v50  ;;  %6145 = vmatprep.subr.mxu1 %v6443_v14 }
 0x63d   : > { %v3387_v53 = vsel %vm3354_vm1, %v3385_v51, 0.0  ;;  %6146 = vmatpush3.msra.mxu1 %v7498_v18 }
 0x63e   : > { %3388 = vadd.xlane.f32.xlu1 %v3387_v53  ;;  %6147 = vmatprep.subr.mxu1 %v6443_v14 }
 0x63f   : > { %6148 = vmatpush3.msra.mxu1 %v7505_v45 }
 0x640   : > { %6149 = vmatprep.subr.mxu1 %v6443_v14 }
 0x6c7   : > { %v3389_v17 = vpop.xlane.xlu1 %3388 }
 0x6c8   : > { %v3390_v19 = vmul.f32 0.03125, %v3389_v17 }
 0x6ca   : > { %v3391_v29 = vadd.f32 1e-05, %v3390_v19 }
 0x6cc   : > { %6351 = vrsqrt.f32 %v3391_v29 }
 0x6d9   : > { %v6352_v30 = vpop.eup %6351 }
 0x6da   : > { %v3394_v4 = vrot.slane %v6352_v30, 1  ;;  %v3395_v7 = vrot.slane %v6352_v30, 2  ;;  %v3396_v5 = vrot.slane %v6352_v30, 3  ;;  %v3401_v34 = vmul.f32 %v6352_v30, %v3368_v35  ;;  %v7523_v35 = vld [vmem:[%s7872_s15] ss:$0 sm:$0xff] }
 0x6db   : > { %v3717_v30 = vrot.slane %v7218_v59, 7 }
 0x6dc   : > { %v3402_v9 = vmul.f32 %v3394_v4, %v3369_v2  ;;  %v3403_v37 = vmul.f32 %v3395_v7, %v3370_v36  ;;  %v3404_v39 = vmul.f32 %v3396_v5, %v3371_v10  ;;  %v3412_v42 = vmul.f32 %v7514_v6, %v3401_v34 }
 0x6dd   : > { %v3715_v10 = vrot.slane %v7205_v3, 1  ;;  %v3719_v7 = vrot.slane %v7221_v60, 6 }
 0x6de   : > { %v3413_v11 = vmul.f32 %v7514_v6, %v3402_v9  ;;  %v3414_v46 = vmul.f32 %v7514_v6, %v3403_v37  ;;  %v3415_v47 = vmul.f32 %v7514_v6, %v3404_v39  ;;  %v7536_v50 = vadd.f32 %v7523_v35, %v3412_v42 }
 0x6df   : > { %v3716_v3 = vsel %vm2042_vm11, %v7215_v58, %v3715_v10 }
 0x6e0   : > { %v7526_v38 = vadd.f32 %v7523_v35, %v3413_v11  ;;  %v7529_v2 = vadd.f32 %v7523_v35, %v3414_v46  ;;  %v7532_v36 = vadd.f32 %v7523_v35, %v3415_v47  ;;  %v3718_v5 = vsel %vm2045_vm12, %v3717_v30, %v3716_v3 }
 0x6e1   : > { %v3720_v58 = vsel %vm2048_vm13, %v3719_v7, %v3718_v5 }
 0x6e2   : > { %v3442_v51 = vrot.slane %v7526_v38, 7  ;;  %v3444_v53 = vrot.slane %v7529_v2, 6  ;;  %v3446_v19 = vrot.slane %v7532_v36, 5 }
 0x6e4   : > { %v3443_v17 = vsel %vm2042_vm11, %v3442_v51, %v7536_v50 }
 0x6e5   : > { %v3445_v29 = vsel %vm2045_vm12, %v3444_v53, %v3443_v17 }
 0x6e6   : > { %v3447_v4 = vsel %vm2048_vm13, %v3446_v19, %v3445_v29 }
 0x6e7   : > { %6135 = vmatmul.mubr.msk.f32.vlgmr.msra.gmra.mxu0 %vm2050_vm14, %v3447_v4 }
 0x6e8   : > { %6157 = vmatpush3.msra.mxu0 %v7148_v56  ;;  %6164 = vmatprep.mubr.msk.f32.mxu0 %vm6444_vm10, %v6443_v14  ;;  %v7590_v56 = vld [vmem:[%s7869_s12 + $0x8] sm:$0xff] }
 0x6e9   : > { %6158 = vmatprep.subr.mxu0 %v6443_v14  ;;  %6150 = vmatpush3.msra.mxu1 %v7590_v56 }
 0x6ea   : > { %6159 = vmatpush3.msra.mxu0 %v7160_v0  ;;  %6151 = vmatprep.subr.mxu1 %v6443_v14  ;;  %v7604_v0 = vld [vmem:[%s7868_s11] ss:$0 sm:$0xff] }
 0x6eb   : > { %6160 = vmatprep.subr.mxu0 %v6443_v14 }
 0x6ec   : > { %6161 = vmatpush3.msra.mxu0 %v7166_v44 }
 0x6ed   : > { %6162 = vmatprep.subr.mxu0 %v6443_v14 }
 0x6ee   : > { %6163 = vmatpush3.msra.mxu0 %v7211_v48 }
 0x6ef   : > { %6167 = vmatprep.subr.mxu0 %v6443_v14  ;;  %6165 = vmatmul.mubr.msk.f32.vlgmr.msra.gmra.mxu0 %vm2050_vm14, %v3720_v58 }
 0x6f0   : > { %6168 = vmatpush3.msra.mxu0 %v7153_v57  ;;  %6175 = vmatprep.mubr.msk.f32.mxu0 %vm6444_vm10, %v6443_v14  ;;  %v7597_v57 = vld [vmem:[%s7869_s12] sm:$0xff] }
 0x6f1   : > { %6169 = vmatprep.subr.mxu0 %v6443_v14  ;;  %6152 = vmatpush3.msra.mxu1 %v7597_v57 }
 0x6f2   : > { %6170 = vmatpush3.msra.mxu0 %v7171_v52  ;;  %6178 = vmatprep.subr.mxu1 %v6443_v14 }
 0x6f3   : > { %6171 = vmatprep.subr.mxu0 %v6443_v14 }
 0x6f4   : > { %6172 = vmatpush3.msra.mxu0 %v7186_v1 }
 0x6f5   : > { %6173 = vmatprep.subr.mxu0 %v6443_v14 }
 0x6f6   : > { %6174 = vmatpush3.msra.mxu0 %v7229_v61  ;;  %v4037_v61 = vld [vmem:[#allocation2 + $0x20] sm:$0xff] }
 0x6f7   : > { %6189 = vmatprep.subr.mxu0 %v6443_v14  ;;  %6176 = vmatmul.mubr.msk.f32.vlgmr.msra.gmra.mxu0 %vm2050_vm14, %v3720_v58 }
 0x6f8   : > { %6190 = vmatpush3.msra.mxu0 %v7254_v21  ;;  %6197 = vmatprep.mubr.msk.f32.mxu0 %vm6444_vm10, %v6443_v14  ;;  %v4038_v21 = vld [vmem:[#allocation2 + $0x28] sm:$0xff] }
 0x6f9   : > { %6191 = vmatprep.subr.mxu0 %v6443_v14 }
 0x6fa   : > { %6192 = vmatpush3.msra.mxu0 %v7267_v24 }
 0x6fb   : > { %6193 = vmatprep.subr.mxu0 %v6443_v14 }
 0x6fc   : > { %6194 = vmatpush3.msra.mxu0 %v7283_v26  ;;  %v4040_v26 = vld [vmem:[#allocation2 + $0x38] sm:$0xff] }
 0x6fd   : > { %6195 = vmatprep.subr.mxu0 %v6443_v14 }
 0x6fe   : > { %6196 = vmatpush3.msra.mxu0 %v7298_v28 }
 0x6ff   : > { %6198 = vmatmul.mubr.msk.f32.vlgmr.msra.gmra.mxu0 %vm2050_vm14, %v3720_v58  ;;  %6210 = vmatprep.subr.mxu0 %v6443_v14 }
 0x700   : > { %6212 = vmatprep.mubr.msk.f32.mxu0 %vm6444_vm10, %v6443_v14 }
 0x7a7   : > { %v3516_v44 = vpop.f32.mrf.mxu0 }
 0x7a8   : > { %v3517_v52 = vadd.f32 %v7604_v0, %v3516_v44 }
 0x7a9   : > { %v6136_v1 = vpop.f32.mrf.mxu0 }
 0x7aa   : > { %v3520_v48 = vmax.f32 %v3517_v52, 0.0 }
 0x7ac   : > { %6154 = vmatmul.mubr.msk.f32.vlgmr.msra.gmra.mxu1 %vm3536_vm2, %v3520_v48 }
 0x7ad   : > { %6179 = vmatpush3.msra.mxu1 %v7246_v20  ;;  %6186 = vmatprep.mubr.msk.f32.mxu1 %vm6444_vm10, %v6443_v14 }
 0x7ae   : > { %6180 = vmatprep.subr.mxu1 %v6443_v14 }
 0x7af   : > { %6181 = vmatpush3.msra.mxu1 %v7262_v23  ;;  %v3789_v59 = vpop.f32.mrf.mxu0 }
 0x7b0   : > { %6182 = vmatprep.subr.mxu1 %v6443_v14  ;;  %v3790_v20 = vadd.f32 %v7322_v33, %v3789_v59 }
 0x7b1   : > { %6183 = vmatpush3.msra.mxu1 %v7275_v25  ;;  %v6166_v60 = vpop.f32.mrf.mxu0 }
 0x7b2   : > { %6184 = vmatprep.subr.mxu1 %v6443_v14  ;;  %v4043_v60 = vld [vmem:[#allocation3 + $0x28] sm:$0xff] }
 0x7b3   : > { %6185 = vmatpush3.msra.mxu1 %v7289_v27 }
 0x7b4   : > { %6187 = vmatmul.mubr.msk.f32.vlgmr.msra.gmra.mxu1 %vm2050_vm14, %v3720_v58  ;;  %6200 = vmatprep.subr.mxu1 %v6443_v14 }
 0x7b5   : > { %6201 = vmatpush3.xpose.msk.msra.mxu1 %vm2380_vm15, %v4037_v61  ;;  %6202 = vmatprep.mubr.msk.f32.mxu1 %vm6444_vm10, %v6443_v14 }
 0x7b6   : > { %6205 = vmatprep.subr.mxu1 %v6443_v14 }
 0x7b7   : > { %v3870_v23 = vpop.f32.mrf.mxu0 }
 0x7b8   : > { %6203 = vmatmul.mubr.msk.f32.vlgmr.msra.gmra.mxu1 %vm2380_vm15, %v3790_v20  ;;  %v3871_v24 = vadd.f32 %v7327_v31, %v3870_v23  ;;  %v4039_v31 = vld [vmem:[#allocation2 + $0x30] sm:$0xff] }
 0x7b9   : > { %6206 = vmatpush3.xpose.msk.msra.mxu1 %vm2380_vm15, %v4038_v21  ;;  %6207 = vmatprep.mubr.msk.f32.mxu1 %vm6444_vm10, %v6443_v14  ;;  %v6177_v25 = vpop.f32.mrf.mxu0 }
 0x7ba   : > { %6215 = vmatprep.subr.mxu1 %v6443_v14  ;;  %6211 = vmatpush3.xpose.msk.msra.mxu0 %vm2380_vm15, %v4039_v31  ;;  %v4042_v25 = vld [vmem:[#allocation3 + $0x20] sm:$0xff]  ;;  %v4045_v31 = vld [vmem:[#allocation3 + $0x38] sm:$0xff] }
 0x7bb   : > { %6220 = vmatprep.subr.mxu0 %v6443_v14 }
 0x7bc   : > { %6208 = vmatmul.mubr.msk.f32.vlgmr.msra.gmra.mxu1 %vm2380_vm15, %v3871_v24 }
 0x7bd   : > { %6216 = vmatpush3.xpose.msk.msra.mxu1 %vm2380_vm15, %v4040_v26  ;;  %6217 = vmatprep.mubr.msk.f32.mxu1 %vm6444_vm10, %v6443_v14 }
 0x7be   : > { %6225 = vmatprep.subr.mxu1 %v6443_v14 }
 0x7bf   : > { %v4032_v27 = vpop.f32.mrf.mxu0 }
 0x7c0   : > { %v4033_v28 = vadd.f32 %v7346_v43, %v4032_v27 }
 0x7c1   : > { %v6199_v33 = vpop.f32.mrf.mxu0 }
 0x7c2   : > { %6218 = vmatmul.mubr.msk.f32.vlgmr.msra.gmra.mxu1 %vm2380_vm15, %v4033_v28 }
 0x7c3   : > { %6227 = vmatprep.mubr.msk.f32.mxu1 %vm6444_vm10, %v6443_v14  ;;  %6226 = vmatpush3.msra.mxu1 %v4043_v60 }
 0x7c4   : > { %6235 = vmatprep.subr.mxu1 %v6443_v14 }
 0x86c   : > { %v7641_v34 = vpop.f32.mrf.mxu1 }
 0x86e   : > { %v6155_v9 = vpop.f32.mrf.mxu1 }
 0x874   : > { %v3951_v37 = vpop.f32.mrf.mxu1 }
 0x875   : > { %v3952_v39 = vadd.f32 %v7339_v32, %v3951_v37 }
 0x876   : > { %v6188_v42 = vpop.f32.mrf.mxu1 }
 0x877   : > { %6213 = vmatmul.mubr.msk.f32.vlgmr.msra.gmra.mxu0 %vm2380_vm15, %v3952_v39 }
 0x878   : > { %v4118_v43 = vpop.f32.mrf.mxu1  ;;  %6222 = vmatprep.mubr.msk.f32.mxu0 %vm6444_vm10, %v6443_v14  ;;  %6221 = vmatpush3.msra.mxu0 %v4042_v25  ;;  %v6377_v25 = vld [vmem:[%s7176_s6 + $0x4] sm:$0x3] }
 0x879   : > { %v4350_v11 = vsel %vm2685_vm0, %v4118_v43, -inf  ;;  %6230 = vmatprep.subr.mxu0 %v6443_v14 }
 0x87a   : > { %v6204_v46 = vpop.f32.mrf.mxu1  ;;  %4351 = vmax.xlane.f32.xlu0 %v4350_v11 }
 0x87c   : > { %v4194_v47 = vpop.f32.mrf.mxu1 }
 0x87d   : > { %v4353_v10 = vsel %vm2685_vm0, %v4194_v47, -inf }
 0x87e   : > { %4354 = vmax.xlane.f32.xlu1 %v4353_v10  ;;  %v6209_v51 = vpop.f32.mrf.mxu1 }
 0x882   : > { %v4346_v53 = vpop.f32.mrf.mxu1 }
 0x883   : > { %v4359_v17 = vsel %vm2685_vm0, %v4346_v53, -inf }
 0x884   : > { %4360 = vmax.xlane.f32.xlu1 %v4359_v17  ;;  %v6219_v32 = vpop.f32.mrf.mxu1 }
 0x903   : > { %v4352_v52 = vpop.xlane.xlu0 %4351 }
 0x904   : > { %v4362_v48 = vsub.f32 %v4118_v43, %v4352_v52 }
 0x906   : > { %v4366_v59 = vmul.f32 1.442695, %v4362_v48 }
 0x907   : > { %v4355_v19 = vpop.xlane.xlu1 %4354 }
 0x908   : > { %v4363_v29 = vsub.f32 %v4194_v47, %v4355_v19 }
 0x90a   : > { %v4368_v30 = vmul.f32 1.442695, %v4363_v29 }
 0x90c   : > { %6353 = vpow2.f32 %v4368_v30 }
 0x90d   : > { %v4361_v4 = vpop.xlane.xlu1 %4360 }
 0x90e   : > { %v4365_v3 = vsub.f32 %v4346_v53, %v4361_v4 }
 0x910   : > { %v4372_v7 = vmul.f32 1.442695, %v4365_v3 }
 0x912   : > { %6355 = vpow2.f32 %v4372_v7 }
 0x913   : > { %6357 = vpow2.f32 %v4366_v59 }
 0x919   : > { %v6354_v5 = vpop.eup %6353 }
 0x91a   : > { %v4377_v58 = vsel %vm2685_vm0, %v6354_v5, 0.0 }
 0x91b   : > { %4378 = vadd.xlane.f32.xlu1 %v4377_v58 }
 0x91f   : > { %v6356_v44 = vpop.eup %6355 }
 0x920   : > { %v4383_v1 = vsel %vm2685_vm0, %v6356_v44, 0.0  ;;  %v6358_v61 = vpop.eup %6357 }
 0x921   : > { %4384 = vadd.xlane.f32.xlu1 %v4383_v1  ;;  %v4374_v24 = vsel %vm2685_vm0, %v6358_v61, 0.0 }
 0x937   : > { %v4270_v20 = vpop.f32.mrf.mxu0 }
 0x938   : > { %v4356_v21 = vsel %vm2685_vm0, %v4270_v20, -inf }
 0x939   : > { %4357 = vmax.xlane.f32.xlu0 %v4356_v21  ;;  %v6214_v23 = vpop.f32.mrf.mxu0 }
 0x93d   : > { %4375 = vadd.xlane.f32.xlu0 %v4374_v24  ;;  %v6376_v24 = vld [vmem:[%s7176_s6] sm:$0x3] }
 0x9a4   : > { %v4379_v26 = vpop.xlane.xlu1 %4378 }
 0x9a5   : > { %6359 = vrcp.f32 %v4379_v26 }
 0x9aa   : > { %v4385_v27 = vpop.xlane.xlu1 %4384 }
 0x9ab   : > { %6361 = vrcp.f32 %v4385_v27  ;;  %v6378_v27 = vld [vmem:[%s7176_s6 + $0x6] sm:$0x3] }
 0x9b2   : > { %v6360_v28 = vpop.eup %6359 }
 0x9b3   : > { %v4391_v33 = vmul.f32 %v6360_v28, %v6354_v5 }
 0x9b5   : > { %6228 = vmatmul.mubr.msk.f32.vlgmr.msra.gmra.mxu1 %vm2380_vm15, %v4391_v33 }
 0x9b6   : > { %6236 = vmatpush3.msra.mxu1 %v4045_v31  ;;  %6237 = vmatprep.mubr.msk.f32.mxu1 %vm6444_vm10, %v6443_v14 }
 0x9b7   : > { %6245 = vmatprep.subr.mxu1 %v6443_v14 }
 0x9b8   : > { %v6362_v9 = vpop.eup %6361 }
 0x9b9   : > { %v4393_v37 = vmul.f32 %v6362_v9, %v6356_v44 }
 0x9bb   : > { %6238 = vmatmul.mubr.msk.f32.vlgmr.msra.gmra.mxu1 %vm2380_vm15, %v4393_v37 }
 0x9bc   : > { %6246 = vmatpush3.msra.mxu1 %v7386_v62  ;;  %6247 = vmatprep.mubr.msk.f32.mxu1 %vm6444_vm10, %v6443_v14  ;;  %v4044_v62 = vld [vmem:[#allocation3 + $0x30] sm:$0xff] }
 0x9bd   : > { %6255 = vmatprep.subr.mxu1 %v6443_v14 }
 0x9c2   : > { %v4358_v39 = vpop.xlane.xlu0 %4357 }
 0x9c3   : > { %v4364_v42 = vsub.f32 %v4270_v20, %v4358_v39 }
 0x9c5   : > { %v4370_v43 = vmul.f32 1.442695, %v4364_v42 }
 0x9c6   : > { %v4376_v11 = vpop.xlane.xlu0 %4375 }
 0x9c7   : > { %6363 = vpow2.f32 %v4370_v43 }
 0x9c8   : > { %6365 = vrcp.f32 %v4376_v11 }
 0x9d4   : > { %v6364_v46 = vpop.eup %6363 }
 0x9d5   : > { %v6366_v47 = vpop.eup %6365  ;;  %v4380_v10 = vsel %vm2685_vm0, %v6364_v46, 0.0 }
 0x9d6   : > { %4381 = vadd.xlane.f32.xlu0 %v4380_v10  ;;  %v4390_v51 = vmul.f32 %v6366_v47, %v6358_v61  ;;  %v6375_v61 = vld [vmem:[%s7176_s6 + $0x2] sm:$0x3]  ;;  %s6383_s6 = sshll.u32 %s6445_s1, 4  ;;  %s6384_s6 = int_to_ptr.vmem [resolvable:$false] %s6383_s6 }
 0x9d7   : > { %s6385_s29 = scalar_lea.vmem %s6384_s6, 256  ;;  %p6386_p0 = scmp.lt.s32.totalorder %s7802_s22, %s6384_s6 }
 0x9d8   : > { %6223 = vmatmul.mubr.msk.f32.vlgmr.msra.gmra.mxu0 %vm2380_vm15, %v4390_v51  ;;  %p6387_p1 = scmp.lt.s32.totalorder %s6385_s29, %s6379_s7 }
 0x9d9   : > { %6232 = vmatprep.mubr.msk.f32.mxu0 %vm6444_vm10, %v6443_v14  ;;  %6231 = vmatpush3.msra.mxu0 %v4044_v62 }
 0x9da   : > { %6240 = vmatprep.subr.mxu0 %v6443_v14  ;;  %p6388_p2 = por %p6387_p1, %p6386_p0 }
 0x9dc   : > { %p6389_p3 = pnand %p6388_p2, %p6382_p13 }
 0xa5f   : > { %v4382_v53 = vpop.xlane.xlu0 %4381 }
 0xa60   : > { %6367 = vrcp.f32 %v4382_v53 }
 0xa6d   : > { %v6368_v17 = vpop.eup %6367 }
 0xa6e   : > { %v4392_v32 = vmul.f32 %v6368_v17, %v6364_v46 }
 0xa70   : > { %6233 = vmatmul.mubr.msk.f32.vlgmr.msra.gmra.mxu0 %vm2380_vm15, %v4392_v32 }
 0xa71   : > { %6241 = vmatpush3.msra.mxu0 %v7392_v63  ;;  %6242 = vmatprep.mubr.msk.f32.mxu0 %vm6444_vm10, %v6443_v14 }
 0xa72   : > { %6250 = vmatprep.subr.mxu0 %v6443_v14 }
 0xa75   : > { %v4536_v19 = vpop.f32.mrf.mxu1 }
 0xa76   : > { %6243 = vmatmul.mubr.msk.f32.vlgmr.msra.gmra.mxu0 %vm2380_vm15, %v4536_v19 }
 0xa77   : > { %v6229_v29 = vpop.f32.mrf.mxu1  ;;  %6251 = vmatpush3.msra.mxu0 %v7409_v22  ;;  %6252 = vmatprep.mubr.msk.f32.mxu0 %vm6444_vm10, %v6443_v14 }
 0xa78   : > { %6260 = vmatprep.subr.mxu0 %v6443_v14 }
 0xa7b   : > { %v4682_v30 = vpop.f32.mrf.mxu1 }
 0xa7d   : > { %v6239_v4 = vpop.f32.mrf.mxu1 }
 0xa98   : > { %v4463_v3 = vpop.f32.mrf.mxu0 }
 0xa99   : > { %6248 = vmatmul.mubr.msk.f32.vlgmr.msra.gmra.mxu1 %vm2380_vm15, %v4463_v3 }
 0xa9a   : > { %v6224_v63 = vpop.f32.mrf.mxu0  ;;  %6256 = vmatpush3.msra.mxu1 %v7400_v16  ;;  %6257 = vmatprep.mubr.msk.f32.mxu1 %vm6444_vm10, %v6443_v14 }
 0xa9b   : > { %6271 = vmatprep.subr.mxu1 %v6443_v14 }
 0xa9d   : > { %6258 = vmatmul.mubr.msk.f32.vlgmr.msra.gmra.mxu1 %vm2380_vm15, %v4682_v30 }
 0xa9e   : > { %6272 = vmatpush3.msra.mxu1 %v7472_v13  ;;  %6287 = vmatprep.mubr.msk.f32.mxu1 %vm6444_vm10, %v6443_v14 }
 0xa9f   : > { %6273 = vmatprep.subr.mxu1 %v6443_v14 }
 0xaa0   : > { %6274 = vmatpush3.msra.mxu1 %v7477_v41 }
 0xaa1   : > { %6275 = vmatprep.subr.mxu1 %v6443_v14 }
 0xaa2   : > { %6276 = vmatpush3.msra.mxu1 %v7484_v8 }
 0xaa3   : > { %6277 = vmatprep.subr.mxu1 %v6443_v14 }
 0xaa4   : > { %6278 = vmatpush3.msra.mxu1 %v7491_v15 }
 0xaa5   : > { %6279 = vmatprep.subr.mxu1 %v6443_v14 }
 0xaa6   : > { %6280 = vmatpush3.msra.mxu1 %v7498_v18 }
 0xaa7   : > { %6281 = vmatprep.subr.mxu1 %v6443_v14 }
 0xaa8   : > { %6282 = vmatpush3.msra.mxu1 %v7505_v45 }
 0xaa9   : > { %6283 = vmatprep.subr.mxu1 %v6443_v14 }
 0xaaa   : > { %6284 = vmatpush3.msra.mxu1 %v7590_v56  ;;  %v7716_v56 = vld [vmem:[%s7870_s13] ss:$0 sm:$0xff] }
 0xaab   : > { %6285 = vmatprep.subr.mxu1 %v6443_v14 }
 0xaac   : > { %6286 = vmatpush3.msra.mxu1 %v7597_v57 }
 0xb30   : > { %v4609_v16 = vpop.f32.mrf.mxu0 }
 0xb31   : > { %6253 = vmatmul.mubr.msk.f32.vlgmr.msra.gmra.mxu0 %vm2380_vm15, %v4609_v16 }
 0xb32   : > { %v6234_v22 = vpop.f32.mrf.mxu0  ;;  %6261 = vmatpush3.msra.mxu0 %v7444_v12  ;;  %6268 = vmatprep.mubr.msk.f32.mxu0 %vm6444_vm10, %v6443_v14 }
 0xb33   : > { %6262 = vmatprep.subr.mxu0 %v6443_v14 }
 0xb34   : > { %6263 = vmatpush3.msra.mxu0 %v7449_v40  ;;  %v3607_v40 = vadd.f32 %v7716_v56, %v7641_v34 }
 0xb35   : > { %6264 = vmatprep.subr.mxu0 %v6443_v14 }
 0xb36   : > { %v4757_v13 = vpop.f32.mrf.mxu0  ;;  %6265 = vmatpush3.msra.mxu0 %v7456_v54  ;;  %v3611_v54 = vrot.slane %v3607_v40, 1  ;;  %v3612_v57 = vrot.slane %v3607_v40, 2  ;;  %v3613_v1 = vrot.slane %v3607_v40, 3  ;;  %v3618_v21 = vadd.f32 %v3607_v40, %v7536_v50 }
 0xb37   : > { %6266 = vmatprep.subr.mxu0 %v6443_v14 }
 0xb38   : > { %v6244_v41 = vpop.f32.mrf.mxu0  ;;  %6267 = vmatpush3.msra.mxu0 %v7463_v55  ;;  %v3619_v55 = vadd.f32 %v3611_v54, %v7526_v38  ;;  %v3620_v44 = vadd.f32 %v3612_v57, %v7529_v2  ;;  %v3621_v2 = vadd.f32 %v3613_v1, %v7532_v36 }
 0xb3a   : > { %v3626_v48 = vrot.slane %v3619_v55, 7  ;;  %v3628_v23 = vrot.slane %v3620_v44, 6  ;;  %v3630_v43 = vrot.slane %v3621_v2, 5 }
 0xb59   : > { %v4830_v8 = vpop.f32.mrf.mxu1 }
 0xb5a   : > { %v4831_v15 = vadd.f32 %v4830_v8, %v4757_v13 }
 0xb5b   : > { %v6249_v12 = vpop.f32.mrf.mxu1 }
 0xb5d   : > { %v4979_v18 = vpop.f32.mrf.mxu1 }
 0xb5f   : > { %v6259_v45 = vpop.f32.mrf.mxu1 }
 0xbf1   : > { %v4904_v14 = vpop.f32.mrf.mxu0 }
 0xbf2   : > { %v4908_v7 = vadd.f32 %v4904_v14, %v4831_v15 }
 0xbf3   : > { %v6254_v5 = vpop.f32.mrf.mxu0 }
 0xbf4   : > { %v4983_v58 = vadd.f32 %v4979_v18, %v4908_v7 }
 0xbf6   : > { %v4991_v52 = vadd.f32 %v7426_v49, %v4983_v58  ;;  %v3627_v49 = vsel %vm2042_vm11, %v3626_v48, %v3618_v21 }
 0xbf7   : > { %v3629_v39 = vsel %vm2045_vm12, %v3628_v23, %v3627_v49 }
 0xbf8   : > { %v4993_v59 = vrot.slane %v4991_v52, 7  ;;  %v4994_v60 = vrot.slane %v4991_v52, 1  ;;  %v4995_v34 = vrot.slane %v4991_v52, 2  ;;  %v5001_v20 = vadd.f32 %v6375_v61, %v4991_v52 }
 0xbf9   : > { %v3631_v36 = vsel %vm2048_vm13, %v3630_v43, %v3629_v39 }
 0xbfa   : > { %v5000_v38 = vadd.f32 %v6376_v24, %v4993_v59  ;;  %v5002_v26 = vadd.f32 %v6377_v25, %v4994_v60  ;;  %v5003_v28 = vadd.f32 %v6378_v27, %v4995_v34  ;;  %v5008_v33 = vrot.slane %v5001_v20, 7 }
 0xbfb   : > { %v3633_v46 = vsel %vm3354_vm1, %v3631_v36, 0.0 }
 0xbfc   : > { %v5009_v31 = vsel %vm2045_vm12, %v5008_v33, %v5000_v38  ;;  %v5010_v9 = vrot.slane %v5002_v26, 6  ;;  %v5012_v37 = vrot.slane %v5003_v28, 5 }
 0xbfe   : > { %v5011_v50 = vsel %vm2048_vm13, %v5010_v9, %v5009_v31 }
 0xbff   : > { %v5014_v42 = vsel %vm5013_vm3, %v5012_v37, %v5011_v50 }
 0xc00   : > { %v5017_v11 = vsel %vm5016_vm4, %v5014_v42, 0.0 }
 0xc01   : > { %5018 = vadd.xlane.f32.xlu0 %v5017_v11 }
 0xc05   : > { %3634 = vadd.xlane.f32.xlu0 %v3633_v46 }
 0xc8a   : > { %v5019_v47 = vpop.xlane.xlu0 %5018 }
 0xc8b   : > { %v5020_v10 = vmul.f32 0.03125, %v5019_v47 }
 0xc8d   : > { %v5022_v51 = vrot.slane %v5020_v10, 1  ;;  %v5023_v62 = vrot.slane %v5020_v10, 2  ;;  %v5024_v53 = vrot.slane %v5020_v10, 3  ;;  %v5029_v4 = vsub.f32 %v5000_v38, %v5020_v10 }
 0xc8e   : > { %v3635_v17 = vpop.xlane.xlu0 %3634 }
 0xc8f   : > { %v5030_v32 = vsub.f32 %v5001_v20, %v5022_v51  ;;  %v5031_v19 = vsub.f32 %v5002_v26, %v5023_v62  ;;  %v3636_v29 = vmul.f32 0.03125, %v3635_v17  ;;  %v5032_v30 = vsub.f32 %v5003_v28, %v5024_v53 }
 0xc90   : > { %v5033_v45 = vmul.f32 %v5029_v4, %v5029_v4 }
 0xc91   : > { %v3638_v3 = vrot.slane %v3636_v29, 1  ;;  %v3639_v63 = vrot.slane %v3636_v29, 2  ;;  %v3640_v16 = vrot.slane %v3636_v29, 3  ;;  %v5034_v22 = vmul.f32 %v5030_v32, %v5030_v32 }
 0xc92   : > { %v5035_v13 = vmul.f32 %v5031_v19, %v5031_v19  ;;  %v5036_v41 = vmul.f32 %v5032_v30, %v5032_v30  ;;  %v7737_v8 = vsub.f32 %v3618_v21, %v3636_v29 }
 0xc93   : > { %v7739_v15 = vsub.f32 %v3619_v55, %v3638_v3  ;;  %v7741_v12 = vsub.f32 %v3620_v44, %v3639_v63  ;;  %v7743_v18 = vsub.f32 %v3621_v2, %v3640_v16  ;;  %v5041_v40 = vrot.slane %v5034_v22, 7 }
 0xc94   : > { %v5043_v54 = vrot.slane %v5035_v13, 6  ;;  %v5045_v55 = vrot.slane %v5036_v41, 5  ;;  %v3649_v44 = vmul.f32 %v7737_v8, %v7737_v8 }
 0xc95   : > { %v3650_v57 = vmul.f32 %v7739_v15, %v7739_v15  ;;  %v3651_v14 = vmul.f32 %v7741_v12, %v7741_v12  ;;  %v3652_v7 = vmul.f32 %v7743_v18, %v7743_v18  ;;  %v5042_v5 = vsel %vm2045_vm12, %v5041_v40, %v5033_v45 }
 0xc96   : > { %v5044_v58 = vsel %vm2048_vm13, %v5043_v54, %v5042_v5 }
 0xc97   : > { %v3657_v52 = vrot.slane %v3650_v57, 7  ;;  %v3659_v1 = vrot.slane %v3651_v14, 6  ;;  %v5046_v48 = vsel %vm5013_vm3, %v5045_v55, %v5044_v58  ;;  %v3661_v34 = vrot.slane %v3652_v7, 5 }
 0xc98   : > { %v5048_v59 = vsel %vm5016_vm4, %v5046_v48, 0.0 }
 0xc99   : > { %v3658_v60 = vsel %vm2042_vm11, %v3657_v52, %v3649_v44  ;;  %5049 = vadd.xlane.f32.xlu1 %v5048_v59 }
 0xc9a   : > { %v3660_v61 = vsel %vm2045_vm12, %v3659_v1, %v3658_v60 }
 0xc9b   : > { %v3662_v20 = vsel %vm2048_vm13, %v3661_v34, %v3660_v61 }
 0xc9c   : > { %v3664_v21 = vsel %vm3354_vm1, %v3662_v20, 0.0 }
 0xc9d   : > { %3665 = vadd.xlane.f32.xlu0 %v3664_v21 }
 0xd22   : > { %v5050_v23 = vpop.xlane.xlu1 %5049 }
 0xd23   : > { %v5051_v24 = vmul.f32 0.03125, %v5050_v23 }
 0xd25   : > { %v5052_v38 = vadd.f32 1e-05, %v5051_v24 }
 0xd27   : > { %6369 = vrsqrt.f32 %v5052_v38 }
 0xd34   : > { %v6370_v25 = vpop.eup %6369 }
 0xd35   : > { %v5055_v26 = vrot.slane %v6370_v25, 1  ;;  %v5056_v27 = vrot.slane %v6370_v25, 2  ;;  %v5057_v28 = vrot.slane %v6370_v25, 3  ;;  %v5062_v33 = vmul.f32 %v6370_v25, %v5029_v4 }
 0xd37   : > { %v5063_v2 = vmul.f32 %v5055_v26, %v5030_v32  ;;  %v5064_v49 = vmul.f32 %v5056_v27, %v5031_v19  ;;  %v5065_v31 = vmul.f32 %v5057_v28, %v5032_v30  ;;  %v5073_v9 = vmul.f32 %v7514_v6, %v5062_v33  ;;  %v3666_v28 = vpop.xlane.xlu0 %3665 }
 0xd38   : > { %v3667_v33 = vmul.f32 0.03125, %v3666_v28 }
 0xd39   : > { %v5074_v37 = vmul.f32 %v7514_v6, %v5063_v2  ;;  %v5075_v50 = vmul.f32 %v7514_v6, %v5064_v49  ;;  %v5076_v39 = vmul.f32 %v7514_v6, %v5065_v31  ;;  %v5084_v42 = vadd.f32 %v7523_v35, %v5073_v9 }
 0xd3a   : > { %v3668_v2 = vadd.f32 1e-05, %v3667_v33 }
 0xd3b   : > { %v5085_v43 = vadd.f32 %v7523_v35, %v5074_v37  ;;  %v5086_v11 = vadd.f32 %v7523_v35, %v5075_v50  ;;  %v5087_v36 = vadd.f32 %v7523_v35, %v5076_v39  ;;  %v5103_v46 = vrot.slane %v5084_v42, 1 }
 0xd3c   : > { %6371 = vrsqrt.f32 %v3668_v2 }
 0xd3d   : > { %v5104_v47 = vsel %vm2042_vm11, %v5085_v43, %v5103_v46  ;;  %v5105_v10 = vrot.slane %v5086_v11, 7  ;;  %v5107_v51 = vrot.slane %v5087_v36, 6 }
 0xd3f   : > { %v5106_v62 = vsel %vm2045_vm12, %v5105_v10, %v5104_v47 }
 0xd40   : > { %v5108_v53 = vsel %vm2048_vm13, %v5107_v51, %v5106_v62  ;;  %v5591_v62 = vld [vmem:[%s7874_s17] ss:$0 sm:$0xff] }
 0xd41   : > { %6269 = vmatmul.mubr.msk.f32.vlgmr.msra.gmra.mxu0 %vm2050_vm14, %v5108_v53 }
 0xd49   : > { %v6372_v37 = vpop.eup %6371 }
 0xd4a   : > { %v3671_v50 = vrot.slane %v6372_v37, 1  ;;  %v3672_v39 = vrot.slane %v6372_v37, 2 }
 0xd4c   : > { %v3680_v46 = vmul.f32 %v3672_v39, %v7741_v12 }
 0xe01   : > { %v5177_v6 = vpop.f32.mrf.mxu0 }
 0xe02   : > { %v5178_v17 = vadd.f32 %v7604_v0, %v5177_v6 }
 0xe03   : > { %v6270_v32 = vpop.f32.mrf.mxu0 }
 0xe04   : > { %v5181_v19 = vmax.f32 %v5178_v17, 0.0 }
 0xe06   : > { %6288 = vmatmul.mubr.msk.f32.vlgmr.msra.gmra.mxu1 %vm3536_vm2, %v5181_v19 }
 0xec6   : > { %v5266_v29 = vpop.f32.mrf.mxu1 }
 0xec7   : > { %v5267_v35 = vadd.f32 %v7716_v56, %v5266_v29 }
 0xec8   : > { %v6289_v30 = vpop.f32.mrf.mxu1 }
 0xec9   : > { %v5271_v4 = vrot.slane %v5267_v35, 7  ;;  %v5272_v3 = vrot.slane %v5267_v35, 1  ;;  %v5273_v63 = vrot.slane %v5267_v35, 2  ;;  %v5279_v16 = vadd.f32 %v5267_v35, %v5085_v43 }
 0xeca   : > { %v3678_v43 = vmul.f32 %v6372_v37, %v7737_v8 }
 0xecb   : > { %v5278_v22 = vadd.f32 %v5271_v4, %v5084_v42  ;;  %v5280_v13 = vadd.f32 %v5272_v3, %v5086_v11  ;;  %v5281_v41 = vadd.f32 %v5273_v63, %v5087_v36  ;;  %v5286_v45 = vrot.slane %v5279_v16, 7  ;;  %v5590_v11 = vld [vmem:[%s7873_s16] ss:$0 sm:$0xff] }
 0xecc   : > { %v3673_v42 = vrot.slane %v6372_v37, 3  ;;  %v3679_v36 = vmul.f32 %v3671_v50, %v7739_v15  ;;  %v3689_v51 = vmul.f32 %v5590_v11, %v3678_v43  ;;  %v3691_v19 = vmul.f32 %v5590_v11, %v3680_v46 }
 0xecd   : > { %v5287_v40 = vsel %vm2045_vm12, %v5286_v45, %v5278_v22  ;;  %v5288_v54 = vrot.slane %v5280_v13, 6  ;;  %v5290_v0 = vrot.slane %v5281_v41, 5 }
 0xece   : > { %v3681_v47 = vmul.f32 %v3673_v42, %v7743_v18  ;;  %v3690_v32 = vmul.f32 %v5590_v11, %v3679_v36  ;;  %v3700_v18 = vadd.f32 %v5591_v62, %v3689_v51 }
 0xecf   : > { %v5289_v57 = vsel %vm2048_vm13, %v5288_v54, %v5287_v40 }
 0xed0   : > { %v5291_v14 = vsel %vm5013_vm3, %v5290_v0, %v5289_v57  ;;  %v3692_v29 = vmul.f32 %v5590_v11, %v3681_v47 }
 0xed1   : > { %v5293_v7 = vsel %vm5016_vm4, %v5291_v14, 0.0 }
 0xed2   : > { %5294 = vadd.xlane.f32.xlu1 %v5293_v7 }
 0xf5b   : > { %v5295_v56 = vpop.xlane.xlu1 %5294 }
 0xf5c   : > { %v5296_v5 = vmul.f32 0.03125, %v5295_v56 }
 0xf5e   : > { %v5298_v55 = vrot.slane %v5296_v5, 1  ;;  %v5299_v58 = vrot.slane %v5296_v5, 2  ;;  %v5300_v44 = vrot.slane %v5296_v5, 3  ;;  %v5305_v52 = vsub.f32 %v5278_v22, %v5296_v5 }
 0xf5f   : > { %v3701_v22 = vadd.f32 %v5591_v62, %v3690_v32 }
 0xf60   : > { %v5306_v1 = vsub.f32 %v5279_v16, %v5298_v55  ;;  %v5307_v48 = vsub.f32 %v5280_v13, %v5299_v58  ;;  %v5308_v59 = vsub.f32 %v5281_v41, %v5300_v44  ;;  %v5309_v20 = vmul.f32 %v5305_v52, %v5305_v52 }
 0xf61   : > { %v3702_v13 = vadd.f32 %v5591_v62, %v3691_v19  ;;  %v3703_v41 = vadd.f32 %v5591_v62, %v3692_v29 }
 0xf62   : > { %v5310_v60 = vmul.f32 %v5306_v1, %v5306_v1  ;;  %v5311_v34 = vmul.f32 %v5307_v48, %v5307_v48  ;;  %v5312_v61 = vmul.f32 %v5308_v59, %v5308_v59 }
 0xf64   : > { %v5317_v21 = vrot.slane %v5310_v60, 7  ;;  %v5319_v23 = vrot.slane %v5311_v34, 6  ;;  %v5321_v38 = vrot.slane %v5312_v61, 5 }
 0xf66   : > { %v5318_v24 = vsel %vm2045_vm12, %v5317_v21, %v5309_v20 }
 0xf67   : > { %v5320_v25 = vsel %vm2048_vm13, %v5319_v23, %v5318_v24 }
 0xf68   : > { %v5322_v26 = vsel %vm5013_vm3, %v5321_v38, %v5320_v25 }
 0xf69   : > { %v5324_v27 = vsel %vm5016_vm4, %v5322_v26, 0.0 }
 0xf6a   : > { %5325 = vadd.xlane.f32.xlu1 %v5324_v27 }
 0xff3   : > { %v5326_v49 = vpop.xlane.xlu1 %5325 }
 0xff4   : > { %v5327_v31 = vmul.f32 0.03125, %v5326_v49 }
 0xff6   : > { %v5328_v9 = vadd.f32 1e-05, %v5327_v31 }
 0xff8   : > { %6373 = vrsqrt.f32 %v5328_v9 }
0x1005   : > { %v6374_v10 = vpop.eup %6373 }
0x1006   : > { %v5331_v53 = vrot.slane %v6374_v10, 1  ;;  %v5332_v8 = vrot.slane %v6374_v10, 2  ;;  %v5333_v6 = vrot.slane %v6374_v10, 3  ;;  %v5338_v17 = vmul.f32 %v6374_v10, %v5305_v52 }
0x1008   : > { %v5339_v15 = vmul.f32 %v5331_v53, %v5306_v1  ;;  %v5340_v35 = vmul.f32 %v5332_v8, %v5307_v48  ;;  %v5341_v12 = vmul.f32 %v5333_v6, %v5308_v59  ;;  %v5349_v30 = vmul.f32 %v5590_v11, %v5338_v17 }
0x100a   : > { %v5350_v4 = vmul.f32 %v5590_v11, %v5339_v15  ;;  %v5351_v3 = vmul.f32 %v5590_v11, %v5340_v35  ;;  %v5352_v63 = vmul.f32 %v5590_v11, %v5341_v12  ;;  %v5360_v16 = vadd.f32 %v5591_v62, %v5349_v30 }
0x100c   : > { %v5361_v45 = vadd.f32 %v5591_v62, %v5350_v4  ;;  %v5362_v40 = vadd.f32 %v5591_v62, %v5351_v3  ;;  %v5363_v54 = vadd.f32 %v5591_v62, %v5352_v63  ;;  %v5365_v0 = vsel %vm5364_vm5, %v3700_v18, %v5360_v16 }
0x100d   : > { %5370 = vst.msk [vmem:[%s6594_s26] sm:$0x3] %vm5369_vm6, %v5365_v0 }
0x100e   : > { %v5366_v57 = vsel %vm5364_vm5, %v3701_v22, %v5361_v45  ;;  %v5367_v14 = vsel %vm5364_vm5, %v3702_v13, %v5362_v40  ;;  %v5368_v7 = vsel %vm5364_vm5, %v3703_v41, %v5363_v54 }
0x100f   : > { %5371 = vst.msk [vmem:[%s6594_s26 + $0x2] sm:$0x3] %vm5369_vm6, %v5366_v57  ;;  %5372 = vst.msk [vmem:[%s6594_s26 + $0x4] sm:$0x3] %vm5369_vm6, %v5367_v14 }
0x1010   : > { %5373 = vst.msk [vmem:[%s6594_s26 + $0x6] sm:$0x3] %vm5369_vm6, %v5368_v7 }
0x1011   : > { %6392 = shalt.err (!%p6389_p3)
}
0x1012   : > { %s6393_s26 = scalar_lea.hbm %s7800_s20, 128  ;;  %s6397_s19 = scalar_lea.hbm %s7875_s18, 256 }
0x1013   : > { %p6394_p4 = scmp.ne.s32.totalorder %s7800_s20, %s6393_s26  ;;  %p6398_p9 = scmp.lt.s32.totalorder %s7800_s20, %s7875_s18 }
0x1014   : > { %p6399_p10 = scmp.lt.s32.totalorder %s6397_s19, %s6393_s26 }
0x1015   : > { %p6395_p7 = pnand %p6394_p4, %p6581_p5 }
0x1016   : > { %p6400_p11 = por %p6399_p10, %p6398_p9 }
0x1017   : > { %p6396_p8 = pneg %p6395_p7 }
0x1019   : > { %p6401_p12 = pnand %p6400_p11, %p6396_p8 }
0x101b   : > { %6404 = shalt.err (!%p6401_p12)
}
0x101c   : > { %s6446_s3 = smov 32   ;;  %s6447_s7 = smov 2  }
0x101d   : > { %6290 = dma.vmem_to_hbm [thread:$0]  (%p6581_p5), %s7802_s22, 128, %s7800_s20, %s7817_s4, %s6446_s3, %s6446_s3, %s6447_s7  }
0x101e PF: > { %p6296_p13 = scmp.ge.s32.totalorder %s6439_s30, 2  ;;  %s5403_s6 = sand.u32 1, %s6427_s27  }
0x101f   : > { %s5404_s29 = scalar_lea.sflag [#allocation5], %s5403_s6 }
0x1020   : > { %p6293_p0 = pnand %p6296_p13, %p6585_p6 }
0x1022   : > { %p6294_p1 = pneg %p6293_p0 }
0x1024   : > { %6422 = dma.done.wait (%p6294_p1), %s5404_s29, 128  }
0x1025   : > { %6424 = vsyncadd (%p6294_p1), %s5404_s29, 4294967168  ;;  %s7908_s30 = sld [smem:[#allocation8_spill]]  ;;  %s7911_s27 = smov %s6431_s28 }
0x1026   : > { %s7909_s26 = sld [smem:[#allocation7_spill]] }
0x1027   : > { %s7910_s29 = sld [smem:[#allocation9_spill]] }
0x102b   : > { %p28_p2 = scmp.ge.s32.totalorder %s7908_s30, 4  }
0x102c   : > { %s7912_s28 = smov %s7909_s26 }
0x102d   :  { %30 = sbr.rel (!%p28_p2) target bundleno = 11 (0xb), region = 167 }
0x1032   :  { %5409 = vsyncpa [#allocation5], 1 }
0x1033   :  { %5411 = vsyncpa [#allocation5 + $0x1], 1 }

</bundles_post_ra>
